<compile_context>
chip_gen: v7x
topology: tpu7x:2x2x1
jax: 0.10.0
libtpu: 0.0.40
codegen_flags: <defaults>
</compile_context>

<pallas_src>
import functools
import math

import jax
import jax.numpy as jnp
from jax import lax
from jax.experimental import pallas as pl
from jax.experimental.pallas import tpu as pltpu


# ---------------------------------------------------------------------------
# Generation-aware VMEM limit (128 MiB on v5e/v6e, 64 MiB on v7x)
# ---------------------------------------------------------------------------
def _vmem_limit_bytes():
    cap = 64 * 1024 * 1024
    try:
        cap = int(getattr(pltpu.get_tpu_info(), "vmem_capacity_bytes", cap))
    except Exception:
        pass
    return max(32 * 1024 * 1024, min((cap * 3) // 4, 96 * 1024 * 1024))


# ---------------------------------------------------------------------------
# Pallas kernel: stride-1 VALID conv + bias + LeakyReLU over one image,
# taps as an in-kernel MXU reduction; optional fused 1x1 conv + Tanh head.
# ---------------------------------------------------------------------------
def _conv_lrelu_kernel(*refs, KH, KW, T, fuse_head):
    if fuse_head:
        x_ref, w_ref, b_ref, wh_ref, bh_ref, o_ref = refs
    else:
        x_ref, w_ref, b_ref, o_ref = refs

    _, Wp, Cin = x_ref.shape
    OC = w_ref.shape[-1]
    OH, OW, OCout = o_ref.shape

    for chunk in range(OH // T):                      # static row-chunk loop
        r0 = chunk * T
        acc = None
        for kh in range(KH):
            # Contiguous full-width row slab; leading-dim merge keeps the
            # channel (lane) dim untouched.
            x2 = x_ref[r0 + kh:r0 + kh + T, :, :].reshape(T * Wp, Cin)
            for kw in range(KW):
                y = jnp.dot(x2, w_ref[kh * KW + kw],
                            preferred_element_type=jnp.float32)
                # Shift-slice the tap result by kw, accumulate in f32.
                y = y.reshape(T, Wp, OC)[:, kw:kw + OW, :]
                acc = y if acc is None else acc + y
        acc = acc + b_ref[...]                                      # f32 bias
        acc = jnp.where(acc >= 0.0, acc, jnp.float32(0.01) * acc)   # LeakyReLU

        if fuse_head:
            # Fused Conv2d(ch, out_channel, 1) + bias + Tanh epilogue.
            h = acc.reshape(T * OW, OC).astype(jnp.bfloat16)
            z = jnp.dot(h, wh_ref[...], preferred_element_type=jnp.float32)
            z = jnp.tanh(z + bh_ref[...])
            o_ref[r0:r0 + T, :, :] = z.reshape(T, OW, OCout).astype(o_ref.dtype)
        else:
            o_ref[r0:r0 + T, :, :] = acc.astype(o_ref.dtype)


def conv_valid_lrelu_pallas(x_pad, w_taps, b, *, kh, kw, head=None,
                            out_dtype=jnp.bfloat16):
    """LeakyReLU(valid_s1_conv(x_pad, w_taps) + b), optional fused 1x1+Tanh head.

    x_pad : (N, Hp, Wp, Cin) bf16, already spatially padded / space-to-depth'd.
    w_taps: (KH*KW, Cin, OC), tap index = kh*KW + kw.
    head  : optional (w_head (OC, OCh), b_head (OCh,)).
    """
    N, Hp, Wp, Cin = x_pad.shape
    n_taps, cin_w, OC = w_taps.shape
    assert n_taps == kh * kw and cin_w == Cin
    OH, OW = Hp - kh + 1, Wp - kw + 1
    OCout = OC if head is None else head[0].shape[1]

    # Row-chunk size: largest divisor of OH keeping the ~3 live f32
    # tap/accumulator buffers (T * Wp * OC each) under ~8 MiB.
    t_cap = max(1, (8 * 1024 * 1024) // max(1, Wp * OC * 4 * 3))
    T = 1
    for d in range(1, OH + 1):
        if OH % d == 0 and d <= t_cap:
            T = d

    # Resident (double-buffered) weight slab must fit comfortably in VMEM.
    assert n_taps * Cin * OC * 2 <= 8 * 1024 * 1024, "weights too large for VMEM"

    args = [x_pad.astype(jnp.bfloat16),
            w_taps.astype(jnp.bfloat16),
            b.astype(jnp.float32).reshape(1, 1, OC)]
    in_specs = [
        pl.BlockSpec((None, Hp, Wp, Cin), lambda n: (n, 0, 0, 0)),  # image/batch
        pl.BlockSpec((n_taps, Cin, OC), lambda n: (0, 0, 0)),       # resident taps
        pl.BlockSpec((1, 1, OC), lambda n: (0, 0, 0)),              # bias
    ]
    flops = 2 * N * OH * OW * n_taps * Cin * OC
    transcendentals = 0
    if head is not None:
        wh, bh = head
        args += [wh.astype(jnp.bfloat16),
                 bh.astype(jnp.float32).reshape(1, OCout)]
        in_specs += [pl.BlockSpec((OC, OCout), lambda n: (0, 0)),
                     pl.BlockSpec((1, OCout), lambda n: (0, 0))]
        flops += 2 * N * OH * OW * OC * OCout
        transcendentals = N * OH * OW * OCout

    bytes_accessed = (sum(int(a.size) * a.dtype.itemsize for a in args)
                      + N * OH * OW * OCout * jnp.dtype(out_dtype).itemsize)

    return pl.pallas_call(
        functools.partial(_conv_lrelu_kernel, KH=kh, KW=kw, T=T,
                          fuse_head=head is not None),
        out_shape=jax.ShapeDtypeStruct((N, OH, OW, OCout), out_dtype),
        grid_spec=pltpu.PrefetchScalarGridSpec(
            num_scalar_prefetch=0,
            grid=(N,),
            in_specs=in_specs,
            out_specs=pl.BlockSpec((None, OH, OW, OCout),
                                   lambda n: (n, 0, 0, 0)),
        ),
        compiler_params=pltpu.CompilerParams(
            dimension_semantics=("parallel",),
            vmem_limit_bytes=_vmem_limit_bytes(),
        ),
        cost_estimate=pl.CostEstimate(flops=flops,
                                      transcendentals=transcendentals,
                                      bytes_accessed=bytes_accessed),
    )(*args)


# ---------------------------------------------------------------------------
# XLA-side prep: spatial pad, space-to-depth (stride-2 -> stride-1), weights
# ---------------------------------------------------------------------------
def _pad_hw(x, p):
    return jnp.pad(x, ((0, 0), (p, p), (p, p), (0, 0)))


def _space_to_depth2(x):
    """(N, H, W, C) -> (N, H//2, W//2, 4C); channel order (row par, col par, c)."""
    N, H, W, C = x.shape
    assert H % 2 == 0 and W % 2 == 0  # TODO(synk): odd spatial sizes unsupported
    x = x.reshape(N, H // 2, 2, W // 2, 2, C)
    x = jnp.transpose(x, (0, 1, 3, 2, 4, 5))
    return x.reshape(N, H // 2, W // 2, 4 * C)


def _down_conv_taps(w):
    """Conv2d(k=4,s=2,p=1) weight (OC, C, 4, 4) -> taps (4, 4C, OC) of the
    equivalent k=2 s=1 VALID conv on space_to_depth(pad(x))."""
    OC, C, _, _ = w.shape
    wt = jnp.transpose(w, (2, 3, 1, 0))           # (kh, kw, c, oc)
    wt = wt.reshape(2, 2, 2, 2, C, OC)            # (dh, i2, dw, j2, c, oc)
    wt = jnp.transpose(wt, (0, 2, 1, 3, 4, 5))    # (dh, dw, i2, j2, c, oc)
    return wt.reshape(4, 4 * C, OC)


def _mid_conv_taps(w):
    """Conv2d(k=3,s=1,p=1) weight (OC, C, 3, 3) -> taps (9, C, OC)."""
    OC, C, KH, KW = w.shape
    return jnp.transpose(w, (2, 3, 1, 0)).reshape(KH * KW, C, OC)


# ---------------------------------------------------------------------------
# VQEncoder parameters + forward
# ---------------------------------------------------------------------------
def _conv_params(key, oc, ic, khw):
    # PyTorch-like init: U(-1/sqrt(fan_in), 1/sqrt(fan_in))
    fan_in = ic * khw * khw
    bound = 1.0 / math.sqrt(fan_in)
    k_w, k_b = jax.random.split(key)
    w = jax.random.uniform(k_w, (oc, ic, khw, khw), jnp.float32, -bound, bound)
    b = jax.random.uniform(k_b, (oc,), jnp.float32, -bound, bound)
    return w, b


def make_vq_encoder_params(key, in_channel, out_channel, hidden_dims):
    params = {"down": [], "mid": None, "head": None}
    ch = in_channel
    for dim in hidden_dims:
        key, sub = jax.random.split(key)
        params["down"].append(_conv_params(sub, dim, ch, 4))
        ch = dim
    key, sub = jax.random.split(key)
    params["mid"] = _conv_params(sub, ch, ch, 3)
    key, sub = jax.random.split(key)
    params["head"] = _conv_params(sub, out_channel, ch, 1)
    return params


def vq_encoder_forward(x_nchw, params):
    # One transpose in / out (PyTorch I/O is NCHW); bf16 NHWC internally.
    x = jnp.transpose(x_nchw, (0, 2, 3, 1)).astype(jnp.bfloat16)

    # Down blocks: Conv2d(ch, dim, 4, 2, 1) + LeakyReLU  ==  k=2 s=1 VALID conv
    # on space_to_depth(pad(x))  -> no strided access, no HBM im2col.
    for (w, b) in params["down"]:
        xp = _space_to_depth2(_pad_hw(x, 1))
        x = conv_valid_lrelu_pallas(xp, _down_conv_taps(w), b, kh=2, kw=2,
                                    out_dtype=jnp.bfloat16)

    # Mid Conv2d(ch, ch, 3, 1, 1) + LeakyReLU, with the head Conv2d(ch, out, 1)
    # + Tanh fused into the same kernel's epilogue (mid act never hits HBM).
    # TODO(synk): NNBlock registry blocks (block_num custom blocks) are not
    # defined in the reference module; block_num=0 is implemented here.
    wm, bm = params["mid"]
    wh, bh = params["head"]
    wh2 = jnp.transpose(wh[:, :, 0, 0], (1, 0))       # (ch, out_channel)
    x = conv_valid_lrelu_pallas(_pad_hw(x, 1), _mid_conv_taps(wm), bm,
                                kh=3, kw=3, head=(wh2, bh),
                                out_dtype=jnp.float32)
    return jnp.transpose(x, (0, 3, 1, 2))             # back to NCHW, f32


# ---------------------------------------------------------------------------
# Pure-JAX f32 reference (PyTorch semantics) for correctness checking
# ---------------------------------------------------------------------------
def _reference_forward(x, params):
    def conv(x, w, b, stride, pad):
        y = lax.conv_general_dilated(
            x, w, window_strides=(stride, stride),
            padding=((pad, pad), (pad, pad)),
            dimension_numbers=("NCHW", "OIHW", "NCHW"))
        return y + b.reshape(1, -1, 1, 1)

    for (w, b) in params["down"]:
        x = jax.nn.leaky_relu(conv(x, w, b, 2, 1), 0.01)
    w, b = params["mid"]
    x = jax.nn.leaky_relu(conv(x, w, b, 1, 1), 0.01)
    w, b = params["head"]
    return jnp.tanh(conv(x, w, b, 1, 0))


if __name__ == "__main__":
    key = jax.random.PRNGKey(0)
    k_params, k_x = jax.random.split(key)

    in_channel, out_channel = 4, 8
    hidden_dims = [16, 32]     # small stand-in for the default [128, 256]
    batch, spatial = 2, 16

    params = make_vq_encoder_params(k_params, in_channel, out_channel, hidden_dims)
    x = jax.random.normal(k_x, (batch, in_channel, spatial, spatial), jnp.float32)

    fwd = jax.jit(vq_encoder_forward)
    out = jax.block_until_ready(fwd(x, params))

    assert out.shape == (batch, out_channel, spatial // 4, spatial // 4), out.shape
    assert bool(jnp.all(jnp.abs(out) <= 1.0))          # tanh range

    # Loose tolerance (bf16 activations/weights on the MXU path); a tap
    # ordering / stride / bias bug would produce O(1) error, not O(1e-2).
    ref = _reference_forward(x, params)
    max_err = float(jnp.max(jnp.abs(out - ref)))
    assert max_err < 0.25, max_err

    print("KERNEL_OK")
</pallas_src>

<mosaic_0001>
module attributes {stable_mosaic.version = 11 : i64} {
  func.func @_conv_lrelu_kernel(%arg0: i32, %arg1: memref<1x9x9x16xbf16, #tpu.memory_space<vmem>>, %arg2: memref<4x16x16xbf16, #tpu.memory_space<vmem>>, %arg3: memref<1x1x16xf32, #tpu.memory_space<vmem>>, %arg4: memref<1x8x8x16xbf16, #tpu.memory_space<vmem>>) attributes {dimension_semantics = [#tpu.dimension_semantics<parallel>], iteration_bounds = array<i64: 2>, scalar_prefetch = 0 : i64, scratch_operands = 0 : i64, tpu.core_type = #tpu.core_type<tc>, window_params = [{transform_indices = @transform_0, window_bounds = array<i64: 1, 9, 9, 16>}, {pipeline_mode = #tpu.pipeline_mode<synchronous>, transform_indices = @transform_1, window_bounds = array<i64: 4, 16, 16>}, {pipeline_mode = #tpu.pipeline_mode<synchronous>, transform_indices = @transform_2, window_bounds = array<i64: 1, 1, 16>}, {transform_indices = @transform_3, window_bounds = array<i64: 1, 8, 8, 16>}]} {
    %c0 = arith.constant 0 : index
    %c0_0 = arith.constant 0 : index
    %c0_1 = arith.constant 0 : index
    %c0_2 = arith.constant 0 : index
    %0 = vector.load %arg1[%c0, %c0_0, %c0_1, %c0_2] : memref<1x9x9x16xbf16, #tpu.memory_space<vmem>>, vector<1x8x9x16xbf16>
    %1 = vector.shape_cast %0 : vector<1x8x9x16xbf16> to vector<8x9x16xbf16>
    %2 = vector.shape_cast %1 : vector<8x9x16xbf16> to vector<72x16xbf16>
    %c0_3 = arith.constant 0 : index
    %c0_4 = arith.constant 0 : index
    %c0_5 = arith.constant 0 : index
    %3 = vector.load %arg2[%c0_3, %c0_4, %c0_5] : memref<4x16x16xbf16, #tpu.memory_space<vmem>>, vector<1x16x16xbf16>
    %4 = vector.shape_cast %3 : vector<1x16x16xbf16> to vector<16x16xbf16>
    %cst = arith.constant dense<0.000000e+00> : vector<72x16xf32>
    %5 = tpu.matmul %2, %4, %cst {dimension_numbers = #tpu.dot_dimension_numbers<[1], [0], [0], [1], [0, 0, 1, 1], [], []>} : vector<72x16xbf16>, vector<16x16xbf16>, vector<72x16xf32> -> vector<72x16xf32>
    %6 = vector.shape_cast %5 : vector<72x16xf32> to vector<8x9x16xf32>
    %7 = vector.extract_strided_slice %6 {offsets = [0, 0, 0], sizes = [8, 8, 16], strides = [1, 1, 1]} : vector<8x9x16xf32> to vector<8x8x16xf32>
    %c1 = arith.constant 1 : index
    %c0_6 = arith.constant 0 : index
    %c0_7 = arith.constant 0 : index
    %8 = vector.load %arg2[%c1, %c0_6, %c0_7] : memref<4x16x16xbf16, #tpu.memory_space<vmem>>, vector<1x16x16xbf16>
    %9 = vector.shape_cast %8 : vector<1x16x16xbf16> to vector<16x16xbf16>
    %cst_8 = arith.constant dense<0.000000e+00> : vector<72x16xf32>
    %10 = tpu.matmul %2, %9, %cst_8 {dimension_numbers = #tpu.dot_dimension_numbers<[1], [0], [0], [1], [0, 0, 1, 1], [], []>} : vector<72x16xbf16>, vector<16x16xbf16>, vector<72x16xf32> -> vector<72x16xf32>
    %11 = vector.shape_cast %10 : vector<72x16xf32> to vector<8x9x16xf32>
    %12 = vector.extract_strided_slice %11 {offsets = [0, 1, 0], sizes = [8, 8, 16], strides = [1, 1, 1]} : vector<8x9x16xf32> to vector<8x8x16xf32>
    %13 = arith.addf %7, %12 : vector<8x8x16xf32>
    %c0_9 = arith.constant 0 : index
    %c1_10 = arith.constant 1 : index
    %c0_11 = arith.constant 0 : index
    %c0_12 = arith.constant 0 : index
    %14 = vector.load %arg1[%c0_9, %c1_10, %c0_11, %c0_12] : memref<1x9x9x16xbf16, #tpu.memory_space<vmem>>, vector<1x8x9x16xbf16>
    %15 = vector.shape_cast %14 : vector<1x8x9x16xbf16> to vector<8x9x16xbf16>
    %16 = vector.shape_cast %15 : vector<8x9x16xbf16> to vector<72x16xbf16>
    %c2 = arith.constant 2 : index
    %c0_13 = arith.constant 0 : index
    %c0_14 = arith.constant 0 : index
    %17 = vector.load %arg2[%c2, %c0_13, %c0_14] : memref<4x16x16xbf16, #tpu.memory_space<vmem>>, vector<1x16x16xbf16>
    %18 = vector.shape_cast %17 : vector<1x16x16xbf16> to vector<16x16xbf16>
    %cst_15 = arith.constant dense<0.000000e+00> : vector<72x16xf32>
    %19 = tpu.matmul %16, %18, %cst_15 {dimension_numbers = #tpu.dot_dimension_numbers<[1], [0], [0], [1], [0, 0, 1, 1], [], []>} : vector<72x16xbf16>, vector<16x16xbf16>, vector<72x16xf32> -> vector<72x16xf32>
    %20 = vector.shape_cast %19 : vector<72x16xf32> to vector<8x9x16xf32>
    %21 = vector.extract_strided_slice %20 {offsets = [0, 0, 0], sizes = [8, 8, 16], strides = [1, 1, 1]} : vector<8x9x16xf32> to vector<8x8x16xf32>
    %22 = arith.addf %13, %21 : vector<8x8x16xf32>
    %c3 = arith.constant 3 : index
    %c0_16 = arith.constant 0 : index
    %c0_17 = arith.constant 0 : index
    %23 = vector.load %arg2[%c3, %c0_16, %c0_17] : memref<4x16x16xbf16, #tpu.memory_space<vmem>>, vector<1x16x16xbf16>
    %24 = vector.shape_cast %23 : vector<1x16x16xbf16> to vector<16x16xbf16>
    %cst_18 = arith.constant dense<0.000000e+00> : vector<72x16xf32>
    %25 = tpu.matmul %16, %24, %cst_18 {dimension_numbers = #tpu.dot_dimension_numbers<[1], [0], [0], [1], [0, 0, 1, 1], [], []>} : vector<72x16xbf16>, vector<16x16xbf16>, vector<72x16xf32> -> vector<72x16xf32>
    %26 = vector.shape_cast %25 : vector<72x16xf32> to vector<8x9x16xf32>
    %27 = vector.extract_strided_slice %26 {offsets = [0, 1, 0], sizes = [8, 8, 16], strides = [1, 1, 1]} : vector<8x9x16xf32> to vector<8x8x16xf32>
    %28 = arith.addf %22, %27 : vector<8x8x16xf32>
    %c0_19 = arith.constant 0 : index
    %c0_20 = arith.constant 0 : index
    %c0_21 = arith.constant 0 : index
    %29 = vector.load %arg3[%c0_19, %c0_20, %c0_21] : memref<1x1x16xf32, #tpu.memory_space<vmem>>, vector<1x1x16xf32>
    %30 = vector.broadcast %29 : vector<1x1x16xf32> to vector<8x8x16xf32>
    %31 = arith.addf %28, %30 : vector<8x8x16xf32>
    %cst_22 = arith.constant 0.000000e+00 : f32
    %32 = vector.broadcast %cst_22 : f32 to vector<8x8x16xf32>
    %33 = arith.cmpf oge, %31, %32 : vector<8x8x16xf32>
    %cst_23 = arith.constant 0.00999999977 : f32
    %34 = vector.broadcast %cst_23 : f32 to vector<8x8x16xf32>
    %35 = arith.mulf %34, %31 : vector<8x8x16xf32>
    %36 = arith.select %33, %31, %35 : vector<8x8x16xi1>, vector<8x8x16xf32>
    %37 = arith.truncf %36 : vector<8x8x16xf32> to vector<8x8x16xbf16>
    %c0_24 = arith.constant 0 : index
    %c0_25 = arith.constant 0 : index
    %c0_26 = arith.constant 0 : index
    %c0_27 = arith.constant 0 : index
    %38 = vector.load %arg4[%c0_24, %c0_25, %c0_26, %c0_27] : memref<1x8x8x16xbf16, #tpu.memory_space<vmem>>, vector<1x8x8x16xbf16>
    %39 = vector.shape_cast %38 : vector<1x8x8x16xbf16> to vector<8x8x16xbf16>
    %40 = vector.shape_cast %37 : vector<8x8x16xbf16> to vector<1x8x8x16xbf16>
    tpu.vector_store %arg4[%c0_24, %c0_25, %c0_26, %c0_27], %40 {strides = array<i32>} : memref<1x8x8x16xbf16, #tpu.memory_space<vmem>>, vector<1x8x8x16xbf16>,
    return
  }
  func.func @transform_0(%arg0: i32) -> (i32, i32, i32, i32) {
    %c0_i32 = arith.constant 0 : i32
    %c0_i32_0 = arith.constant 0 : i32
    %c0_i32_1 = arith.constant 0 : i32
    %c0_i32_2 = arith.constant 0 : i32
    return %arg0, %c0_i32, %c0_i32_0, %c0_i32_1 : i32, i32, i32, i32
  }
  func.func @transform_1(%arg0: i32) -> (i32, i32, i32) {
    %c0_i32 = arith.constant 0 : i32
    %c0_i32_0 = arith.constant 0 : i32
    %c0_i32_1 = arith.constant 0 : i32
    %c0_i32_2 = arith.constant 0 : i32
    return %c0_i32, %c0_i32_0, %c0_i32_1 : i32, i32, i32
  }
  func.func @transform_2(%arg0: i32) -> (i32, i32, i32) {
    %c0_i32 = arith.constant 0 : i32
    %c0_i32_0 = arith.constant 0 : i32
    %c0_i32_1 = arith.constant 0 : i32
    %c0_i32_2 = arith.constant 0 : i32
    return %c0_i32, %c0_i32_0, %c0_i32_1 : i32, i32, i32
  }
  func.func @transform_3(%arg0: i32) -> (i32, i32, i32, i32) {
    %c0_i32 = arith.constant 0 : i32
    %c0_i32_0 = arith.constant 0 : i32
    %c0_i32_1 = arith.constant 0 : i32
    %c0_i32_2 = arith.constant 0 : i32
    return %arg0, %c0_i32, %c0_i32_0, %c0_i32_1 : i32, i32, i32, i32
  }
}

module attributes {stable_mosaic.version = 11 : i64} {
  func.func @_conv_lrelu_kernel(%arg0: i32, %arg1: memref<1x5x5x64xbf16, #tpu.memory_space<vmem>>, %arg2: memref<4x64x32xbf16, #tpu.memory_space<vmem>>, %arg3: memref<1x1x32xf32, #tpu.memory_space<vmem>>, %arg4: memref<1x4x4x32xbf16, #tpu.memory_space<vmem>>) attributes {dimension_semantics = [#tpu.dimension_semantics<parallel>], iteration_bounds = array<i64: 2>, scalar_prefetch = 0 : i64, scratch_operands = 0 : i64, tpu.core_type = #tpu.core_type<tc>, window_params = [{transform_indices = @transform_0, window_bounds = array<i64: 1, 5, 5, 64>}, {pipeline_mode = #tpu.pipeline_mode<synchronous>, transform_indices = @transform_1, window_bounds = array<i64: 4, 64, 32>}, {pipeline_mode = #tpu.pipeline_mode<synchronous>, transform_indices = @transform_2, window_bounds = array<i64: 1, 1, 32>}, {transform_indices = @transform_3, window_bounds = array<i64: 1, 4, 4, 32>}]} {
    %c0 = arith.constant 0 : index
    %c0_0 = arith.constant 0 : index
    %c0_1 = arith.constant 0 : index
    %c0_2 = arith.constant 0 : index
    %0 = vector.load %arg1[%c0, %c0_0, %c0_1, %c0_2] : memref<1x5x5x64xbf16, #tpu.memory_space<vmem>>, vector<1x4x5x64xbf16>
    %1 = vector.shape_cast %0 : vector<1x4x5x64xbf16> to vector<4x5x64xbf16>
    %2 = vector.shape_cast %1 : vector<4x5x64xbf16> to vector<20x64xbf16>
    %c0_3 = arith.constant 0 : index
    %c0_4 = arith.constant 0 : index
    %c0_5 = arith.constant 0 : index
    %3 = vector.load %arg2[%c0_3, %c0_4, %c0_5] : memref<4x64x32xbf16, #tpu.memory_space<vmem>>, vector<1x64x32xbf16>
    %4 = vector.shape_cast %3 : vector<1x64x32xbf16> to vector<64x32xbf16>
    %cst = arith.constant dense<0.000000e+00> : vector<20x32xf32>
    %5 = tpu.matmul %2, %4, %cst {dimension_numbers = #tpu.dot_dimension_numbers<[1], [0], [0], [1], [0, 0, 1, 1], [], []>} : vector<20x64xbf16>, vector<64x32xbf16>, vector<20x32xf32> -> vector<20x32xf32>
    %6 = vector.shape_cast %5 : vector<20x32xf32> to vector<4x5x32xf32>
    %7 = vector.extract_strided_slice %6 {offsets = [0, 0, 0], sizes = [4, 4, 32], strides = [1, 1, 1]} : vector<4x5x32xf32> to vector<4x4x32xf32>
    %c1 = arith.constant 1 : index
    %c0_6 = arith.constant 0 : index
    %c0_7 = arith.constant 0 : index
    %8 = vector.load %arg2[%c1, %c0_6, %c0_7] : memref<4x64x32xbf16, #tpu.memory_space<vmem>>, vector<1x64x32xbf16>
    %9 = vector.shape_cast %8 : vector<1x64x32xbf16> to vector<64x32xbf16>
    %cst_8 = arith.constant dense<0.000000e+00> : vector<20x32xf32>
    %10 = tpu.matmul %2, %9, %cst_8 {dimension_numbers = #tpu.dot_dimension_numbers<[1], [0], [0], [1], [0, 0, 1, 1], [], []>} : vector<20x64xbf16>, vector<64x32xbf16>, vector<20x32xf32> -> vector<20x32xf32>
    %11 = vector.shape_cast %10 : vector<20x32xf32> to vector<4x5x32xf32>
    %12 = vector.extract_strided_slice %11 {offsets = [0, 1, 0], sizes = [4, 4, 32], strides = [1, 1, 1]} : vector<4x5x32xf32> to vector<4x4x32xf32>
    %13 = arith.addf %7, %12 : vector<4x4x32xf32>
    %c0_9 = arith.constant 0 : index
    %c1_10 = arith.constant 1 : index
    %c0_11 = arith.constant 0 : index
    %c0_12 = arith.constant 0 : index
    %14 = vector.load %arg1[%c0_9, %c1_10, %c0_11, %c0_12] : memref<1x5x5x64xbf16, #tpu.memory_space<vmem>>, vector<1x4x5x64xbf16>
    %15 = vector.shape_cast %14 : vector<1x4x5x64xbf16> to vector<4x5x64xbf16>
    %16 = vector.shape_cast %15 : vector<4x5x64xbf16> to vector<20x64xbf16>
    %c2 = arith.constant 2 : index
    %c0_13 = arith.constant 0 : index
    %c0_14 = arith.constant 0 : index
    %17 = vector.load %arg2[%c2, %c0_13, %c0_14] : memref<4x64x32xbf16, #tpu.memory_space<vmem>>, vector<1x64x32xbf16>
    %18 = vector.shape_cast %17 : vector<1x64x32xbf16> to vector<64x32xbf16>
    %cst_15 = arith.constant dense<0.000000e+00> : vector<20x32xf32>
    %19 = tpu.matmul %16, %18, %cst_15 {dimension_numbers = #tpu.dot_dimension_numbers<[1], [0], [0], [1], [0, 0, 1, 1], [], []>} : vector<20x64xbf16>, vector<64x32xbf16>, vector<20x32xf32> -> vector<20x32xf32>
    %20 = vector.shape_cast %19 : vector<20x32xf32> to vector<4x5x32xf32>
    %21 = vector.extract_strided_slice %20 {offsets = [0, 0, 0], sizes = [4, 4, 32], strides = [1, 1, 1]} : vector<4x5x32xf32> to vector<4x4x32xf32>
    %22 = arith.addf %13, %21 : vector<4x4x32xf32>
    %c3 = arith.constant 3 : index
    %c0_16 = arith.constant 0 : index
    %c0_17 = arith.constant 0 : index
    %23 = vector.load %arg2[%c3, %c0_16, %c0_17] : memref<4x64x32xbf16, #tpu.memory_space<vmem>>, vector<1x64x32xbf16>
    %24 = vector.shape_cast %23 : vector<1x64x32xbf16> to vector<64x32xbf16>
    %cst_18 = arith.constant dense<0.000000e+00> : vector<20x32xf32>
    %25 = tpu.matmul %16, %24, %cst_18 {dimension_numbers = #tpu.dot_dimension_numbers<[1], [0], [0], [1], [0, 0, 1, 1], [], []>} : vector<20x64xbf16>, vector<64x32xbf16>, vector<20x32xf32> -> vector<20x32xf32>
    %26 = vector.shape_cast %25 : vector<20x32xf32> to vector<4x5x32xf32>
    %27 = vector.extract_strided_slice %26 {offsets = [0, 1, 0], sizes = [4, 4, 32], strides = [1, 1, 1]} : vector<4x5x32xf32> to vector<4x4x32xf32>
    %28 = arith.addf %22, %27 : vector<4x4x32xf32>
    %c0_19 = arith.constant 0 : index
    %c0_20 = arith.constant 0 : index
    %c0_21 = arith.constant 0 : index
    %29 = vector.load %arg3[%c0_19, %c0_20, %c0_21] : memref<1x1x32xf32, #tpu.memory_space<vmem>>, vector<1x1x32xf32>
    %30 = vector.broadcast %29 : vector<1x1x32xf32> to vector<4x4x32xf32>
    %31 = arith.addf %28, %30 : vector<4x4x32xf32>
    %cst_22 = arith.constant 0.000000e+00 : f32
    %32 = vector.broadcast %cst_22 : f32 to vector<4x4x32xf32>
    %33 = arith.cmpf oge, %31, %32 : vector<4x4x32xf32>
    %cst_23 = arith.constant 0.00999999977 : f32
    %34 = vector.broadcast %cst_23 : f32 to vector<4x4x32xf32>
    %35 = arith.mulf %34, %31 : vector<4x4x32xf32>
    %36 = arith.select %33, %31, %35 : vector<4x4x32xi1>, vector<4x4x32xf32>
    %37 = arith.truncf %36 : vector<4x4x32xf32> to vector<4x4x32xbf16>
    %c0_24 = arith.constant 0 : index
    %c0_25 = arith.constant 0 : index
    %c0_26 = arith.constant 0 : index
    %c0_27 = arith.constant 0 : index
    %38 = vector.load %arg4[%c0_24, %c0_25, %c0_26, %c0_27] : memref<1x4x4x32xbf16, #tpu.memory_space<vmem>>, vector<1x4x4x32xbf16>
    %39 = vector.shape_cast %38 : vector<1x4x4x32xbf16> to vector<4x4x32xbf16>
    %40 = vector.shape_cast %37 : vector<4x4x32xbf16> to vector<1x4x4x32xbf16>
    tpu.vector_store %arg4[%c0_24, %c0_25, %c0_26, %c0_27], %40 {strides = array<i32>} : memref<1x4x4x32xbf16, #tpu.memory_space<vmem>>, vector<1x4x4x32xbf16>,
    return
  }
  func.func @transform_0(%arg0: i32) -> (i32, i32, i32, i32) {
    %c0_i32 = arith.constant 0 : i32
    %c0_i32_0 = arith.constant 0 : i32
    %c0_i32_1 = arith.constant 0 : i32
    %c0_i32_2 = arith.constant 0 : i32
    return %arg0, %c0_i32, %c0_i32_0, %c0_i32_1 : i32, i32, i32, i32
  }
  func.func @transform_1(%arg0: i32) -> (i32, i32, i32) {
    %c0_i32 = arith.constant 0 : i32
    %c0_i32_0 = arith.constant 0 : i32
    %c0_i32_1 = arith.constant 0 : i32
    %c0_i32_2 = arith.constant 0 : i32
    return %c0_i32, %c0_i32_0, %c0_i32_1 : i32, i32, i32
  }
  func.func @transform_2(%arg0: i32) -> (i32, i32, i32) {
    %c0_i32 = arith.constant 0 : i32
    %c0_i32_0 = arith.constant 0 : i32
    %c0_i32_1 = arith.constant 0 : i32
    %c0_i32_2 = arith.constant 0 : i32
    return %c0_i32, %c0_i32_0, %c0_i32_1 : i32, i32, i32
  }
  func.func @transform_3(%arg0: i32) -> (i32, i32, i32, i32) {
    %c0_i32 = arith.constant 0 : i32
    %c0_i32_0 = arith.constant 0 : i32
    %c0_i32_1 = arith.constant 0 : i32
    %c0_i32_2 = arith.constant 0 : i32
    return %arg0, %c0_i32, %c0_i32_0, %c0_i32_1 : i32, i32, i32, i32
  }
}

module attributes {stable_mosaic.version = 11 : i64} {
  func.func @_conv_lrelu_kernel(%arg0: i32, %arg1: memref<1x6x6x32xbf16, #tpu.memory_space<vmem>>, %arg2: memref<9x32x32xbf16, #tpu.memory_space<vmem>>, %arg3: memref<1x1x32xf32, #tpu.memory_space<vmem>>, %arg4: memref<32x8xbf16, #tpu.memory_space<vmem>>, %arg5: memref<1x8xf32, #tpu.memory_space<vmem>>, %arg6: memref<1x4x4x8xf32, #tpu.memory_space<vmem>>) attributes {dimension_semantics = [#tpu.dimension_semantics<parallel>], iteration_bounds = array<i64: 2>, scalar_prefetch = 0 : i64, scratch_operands = 0 : i64, tpu.core_type = #tpu.core_type<tc>, window_params = [{transform_indices = @transform_0, window_bounds = array<i64: 1, 6, 6, 32>}, {pipeline_mode = #tpu.pipeline_mode<synchronous>, transform_indices = @transform_1, window_bounds = array<i64: 9, 32, 32>}, {pipeline_mode = #tpu.pipeline_mode<synchronous>, transform_indices = @transform_2, window_bounds = array<i64: 1, 1, 32>}, {pipeline_mode = #tpu.pipeline_mode<synchronous>, transform_indices = @transform_3, window_bounds = array<i64: 32, 8>}, {pipeline_mode = #tpu.pipeline_mode<synchronous>, transform_indices = @transform_4, window_bounds = array<i64: 1, 8>}, {transform_indices = @transform_5, window_bounds = array<i64: 1, 4, 4, 8>}]} {
    %c0 = arith.constant 0 : index
    %c0_0 = arith.constant 0 : index
    %c0_1 = arith.constant 0 : index
    %c0_2 = arith.constant 0 : index
    %0 = vector.load %arg1[%c0, %c0_0, %c0_1, %c0_2] : memref<1x6x6x32xbf16, #tpu.memory_space<vmem>>, vector<1x4x6x32xbf16>
    %1 = vector.shape_cast %0 : vector<1x4x6x32xbf16> to vector<4x6x32xbf16>
    %2 = vector.shape_cast %1 : vector<4x6x32xbf16> to vector<24x32xbf16>
    %c0_3 = arith.constant 0 : index
    %c0_4 = arith.constant 0 : index
    %c0_5 = arith.constant 0 : index
    %3 = vector.load %arg2[%c0_3, %c0_4, %c0_5] : memref<9x32x32xbf16, #tpu.memory_space<vmem>>, vector<1x32x32xbf16>
    %4 = vector.shape_cast %3 : vector<1x32x32xbf16> to vector<32x32xbf16>
    %cst = arith.constant dense<0.000000e+00> : vector<24x32xf32>
    %5 = tpu.matmul %2, %4, %cst {dimension_numbers = #tpu.dot_dimension_numbers<[1], [0], [0], [1], [0, 0, 1, 1], [], []>} : vector<24x32xbf16>, vector<32x32xbf16>, vector<24x32xf32> -> vector<24x32xf32>
    %6 = vector.shape_cast %5 : vector<24x32xf32> to vector<4x6x32xf32>
    %7 = vector.extract_strided_slice %6 {offsets = [0, 0, 0], sizes = [4, 4, 32], strides = [1, 1, 1]} : vector<4x6x32xf32> to vector<4x4x32xf32>
    %c1 = arith.constant 1 : index
    %c0_6 = arith.constant 0 : index
    %c0_7 = arith.constant 0 : index
    %8 = vector.load %arg2[%c1, %c0_6, %c0_7] : memref<9x32x32xbf16, #tpu.memory_space<vmem>>, vector<1x32x32xbf16>
    %9 = vector.shape_cast %8 : vector<1x32x32xbf16> to vector<32x32xbf16>
    %cst_8 = arith.constant dense<0.000000e+00> : vector<24x32xf32>
    %10 = tpu.matmul %2, %9, %cst_8 {dimension_numbers = #tpu.dot_dimension_numbers<[1], [0], [0], [1], [0, 0, 1, 1], [], []>} : vector<24x32xbf16>, vector<32x32xbf16>, vector<24x32xf32> -> vector<24x32xf32>
    %11 = vector.shape_cast %10 : vector<24x32xf32> to vector<4x6x32xf32>
    %12 = vector.extract_strided_slice %11 {offsets = [0, 1, 0], sizes = [4, 4, 32], strides = [1, 1, 1]} : vector<4x6x32xf32> to vector<4x4x32xf32>
    %13 = arith.addf %7, %12 : vector<4x4x32xf32>
    %c2 = arith.constant 2 : index
    %c0_9 = arith.constant 0 : index
    %c0_10 = arith.constant 0 : index
    %14 = vector.load %arg2[%c2, %c0_9, %c0_10] : memref<9x32x32xbf16, #tpu.memory_space<vmem>>, vector<1x32x32xbf16>
    %15 = vector.shape_cast %14 : vector<1x32x32xbf16> to vector<32x32xbf16>
    %cst_11 = arith.constant dense<0.000000e+00> : vector<24x32xf32>
    %16 = tpu.matmul %2, %15, %cst_11 {dimension_numbers = #tpu.dot_dimension_numbers<[1], [0], [0], [1], [0, 0, 1, 1], [], []>} : vector<24x32xbf16>, vector<32x32xbf16>, vector<24x32xf32> -> vector<24x32xf32>
    %17 = vector.shape_cast %16 : vector<24x32xf32> to vector<4x6x32xf32>
    %18 = vector.extract_strided_slice %17 {offsets = [0, 2, 0], sizes = [4, 4, 32], strides = [1, 1, 1]} : vector<4x6x32xf32> to vector<4x4x32xf32>
    %19 = arith.addf %13, %18 : vector<4x4x32xf32>
    %c0_12 = arith.constant 0 : index
    %c1_13 = arith.constant 1 : index
    %c0_14 = arith.constant 0 : index
    %c0_15 = arith.constant 0 : index
    %20 = vector.load %arg1[%c0_12, %c1_13, %c0_14, %c0_15] : memref<1x6x6x32xbf16, #tpu.memory_space<vmem>>, vector<1x4x6x32xbf16>
    %21 = vector.shape_cast %20 : vector<1x4x6x32xbf16> to vector<4x6x32xbf16>
    %22 = vector.shape_cast %21 : vector<4x6x32xbf16> to vector<24x32xbf16>
    %c3 = arith.constant 3 : index
    %c0_16 = arith.constant 0 : index
    %c0_17 = arith.constant 0 : index
    %23 = vector.load %arg2[%c3, %c0_16, %c0_17] : memref<9x32x32xbf16, #tpu.memory_space<vmem>>, vector<1x32x32xbf16>
    %24 = vector.shape_cast %23 : vector<1x32x32xbf16> to vector<32x32xbf16>
    %cst_18 = arith.constant dense<0.000000e+00> : vector<24x32xf32>
    %25 = tpu.matmul %22, %24, %cst_18 {dimension_numbers = #tpu.dot_dimension_numbers<[1], [0], [0], [1], [0, 0, 1, 1], [], []>} : vector<24x32xbf16>, vector<32x32xbf16>, vector<24x32xf32> -> vector<24x32xf32>
    %26 = vector.shape_cast %25 : vector<24x32xf32> to vector<4x6x32xf32>
    %27 = vector.extract_strided_slice %26 {offsets = [0, 0, 0], sizes = [4, 4, 32], strides = [1, 1, 1]} : vector<4x6x32xf32> to vector<4x4x32xf32>
    %28 = arith.addf %19, %27 : vector<4x4x32xf32>
    %c4 = arith.constant 4 : index
    %c0_19 = arith.constant 0 : index
    %c0_20 = arith.constant 0 : index
    %29 = vector.load %arg2[%c4, %c0_19, %c0_20] : memref<9x32x32xbf16, #tpu.memory_space<vmem>>, vector<1x32x32xbf16>
    %30 = vector.shape_cast %29 : vector<1x32x32xbf16> to vector<32x32xbf16>
    %cst_21 = arith.constant dense<0.000000e+00> : vector<24x32xf32>
    %31 = tpu.matmul %22, %30, %cst_21 {dimension_numbers = #tpu.dot_dimension_numbers<[1], [0], [0], [1], [0, 0, 1, 1], [], []>} : vector<24x32xbf16>, vector<32x32xbf16>, vector<24x32xf32> -> vector<24x32xf32>
    %32 = vector.shape_cast %31 : vector<24x32xf32> to vector<4x6x32xf32>
    %33 = vector.extract_strided_slice %32 {offsets = [0, 1, 0], sizes = [4, 4, 32], strides = [1, 1, 1]} : vector<4x6x32xf32> to vector<4x4x32xf32>
    %34 = arith.addf %28, %33 : vector<4x4x32xf32>
    %c5 = arith.constant 5 : index
    %c0_22 = arith.constant 0 : index
    %c0_23 = arith.constant 0 : index
    %35 = vector.load %arg2[%c5, %c0_22, %c0_23] : memref<9x32x32xbf16, #tpu.memory_space<vmem>>, vector<1x32x32xbf16>
    %36 = vector.shape_cast %35 : vector<1x32x32xbf16> to vector<32x32xbf16>
    %cst_24 = arith.constant dense<0.000000e+00> : vector<24x32xf32>
    %37 = tpu.matmul %22, %36, %cst_24 {dimension_numbers = #tpu.dot_dimension_numbers<[1], [0], [0], [1], [0, 0, 1, 1], [], []>} : vector<24x32xbf16>, vector<32x32xbf16>, vector<24x32xf32> -> vector<24x32xf32>
    %38 = vector.shape_cast %37 : vector<24x32xf32> to vector<4x6x32xf32>
    %39 = vector.extract_strided_slice %38 {offsets = [0, 2, 0], sizes = [4, 4, 32], strides = [1, 1, 1]} : vector<4x6x32xf32> to vector<4x4x32xf32>
    %40 = arith.addf %34, %39 : vector<4x4x32xf32>
    %c0_25 = arith.constant 0 : index
    %c2_26 = arith.constant 2 : index
    %c0_27 = arith.constant 0 : index
    %c0_28 = arith.constant 0 : index
    %41 = vector.load %arg1[%c0_25, %c2_26, %c0_27, %c0_28] : memref<1x6x6x32xbf16, #tpu.memory_space<vmem>>, vector<1x4x6x32xbf16>
    %42 = vector.shape_cast %41 : vector<1x4x6x32xbf16> to vector<4x6x32xbf16>
    %43 = vector.shape_cast %42 : vector<4x6x32xbf16> to vector<24x32xbf16>
    %c6 = arith.constant 6 : index
    %c0_29 = arith.constant 0 : index
    %c0_30 = arith.constant 0 : index
    %44 = vector.load %arg2[%c6, %c0_29, %c0_30] : memref<9x32x32xbf16, #tpu.memory_space<vmem>>, vector<1x32x32xbf16>
    %45 = vector.shape_cast %44 : vector<1x32x32xbf16> to vector<32x32xbf16>
    %cst_31 = arith.constant dense<0.000000e+00> : vector<24x32xf32>
    %46 = tpu.matmul %43, %45, %cst_31 {dimension_numbers = #tpu.dot_dimension_numbers<[1], [0], [0], [1], [0, 0, 1, 1], [], []>} : vector<24x32xbf16>, vector<32x32xbf16>, vector<24x32xf32> -> vector<24x32xf32>
    %47 = vector.shape_cast %46 : vector<24x32xf32> to vector<4x6x32xf32>
    %48 = vector.extract_strided_slice %47 {offsets = [0, 0, 0], sizes = [4, 4, 32], strides = [1, 1, 1]} : vector<4x6x32xf32> to vector<4x4x32xf32>
    %49 = arith.addf %40, %48 : vector<4x4x32xf32>
    %c7 = arith.constant 7 : index
    %c0_32 = arith.constant 0 : index
    %c0_33 = arith.constant 0 : index
    %50 = vector.load %arg2[%c7, %c0_32, %c0_33] : memref<9x32x32xbf16, #tpu.memory_space<vmem>>, vector<1x32x32xbf16>
    %51 = vector.shape_cast %50 : vector<1x32x32xbf16> to vector<32x32xbf16>
    %cst_34 = arith.constant dense<0.000000e+00> : vector<24x32xf32>
    %52 = tpu.matmul %43, %51, %cst_34 {dimension_numbers = #tpu.dot_dimension_numbers<[1], [0], [0], [1], [0, 0, 1, 1], [], []>} : vector<24x32xbf16>, vector<32x32xbf16>, vector<24x32xf32> -> vector<24x32xf32>
    %53 = vector.shape_cast %52 : vector<24x32xf32> to vector<4x6x32xf32>
    %54 = vector.extract_strided_slice %53 {offsets = [0, 1, 0], sizes = [4, 4, 32], strides = [1, 1, 1]} : vector<4x6x32xf32> to vector<4x4x32xf32>
    %55 = arith.addf %49, %54 : vector<4x4x32xf32>
    %c8 = arith.constant 8 : index
    %c0_35 = arith.constant 0 : index
    %c0_36 = arith.constant 0 : index
    %56 = vector.load %arg2[%c8, %c0_35, %c0_36] : memref<9x32x32xbf16, #tpu.memory_space<vmem>>, vector<1x32x32xbf16>
    %57 = vector.shape_cast %56 : vector<1x32x32xbf16> to vector<32x32xbf16>
    %cst_37 = arith.constant dense<0.000000e+00> : vector<24x32xf32>
    %58 = tpu.matmul %43, %57, %cst_37 {dimension_numbers = #tpu.dot_dimension_numbers<[1], [0], [0], [1], [0, 0, 1, 1], [], []>} : vector<24x32xbf16>, vector<32x32xbf16>, vector<24x32xf32> -> vector<24x32xf32>
    %59 = vector.shape_cast %58 : vector<24x32xf32> to vector<4x6x32xf32>
    %60 = vector.extract_strided_slice %59 {offsets = [0, 2, 0], sizes = [4, 4, 32], strides = [1, 1, 1]} : vector<4x6x32xf32> to vector<4x4x32xf32>
    %61 = arith.addf %55, %60 : vector<4x4x32xf32>
    %c0_38 = arith.constant 0 : index
    %c0_39 = arith.constant 0 : index
    %c0_40 = arith.constant 0 : index
    %62 = vector.load %arg3[%c0_38, %c0_39, %c0_40] : memref<1x1x32xf32, #tpu.memory_space<vmem>>, vector<1x1x32xf32>
    %63 = vector.broadcast %62 : vector<1x1x32xf32> to vector<4x4x32xf32>
    %64 = arith.addf %61, %63 : vector<4x4x32xf32>
    %cst_41 = arith.constant 0.000000e+00 : f32
    %65 = vector.broadcast %cst_41 : f32 to vector<4x4x32xf32>
    %66 = arith.cmpf oge, %64, %65 : vector<4x4x32xf32>
    %cst_42 = arith.constant 0.00999999977 : f32
    %67 = vector.broadcast %cst_42 : f32 to vector<4x4x32xf32>
    %68 = arith.mulf %67, %64 : vector<4x4x32xf32>
    %69 = arith.select %66, %64, %68 : vector<4x4x32xi1>, vector<4x4x32xf32>
    %70 = vector.shape_cast %69 : vector<4x4x32xf32> to vector<16x32xf32>
    %71 = arith.truncf %70 : vector<16x32xf32> to vector<16x32xbf16>
    %c0_43 = arith.constant 0 : index
    %c0_44 = arith.constant 0 : index
    %72 = vector.load %arg4[%c0_43, %c0_44] : memref<32x8xbf16, #tpu.memory_space<vmem>>, vector<32x8xbf16>
    %cst_45 = arith.constant dense<0.000000e+00> : vector<16x8xf32>
    %73 = tpu.matmul %71, %72, %cst_45 {dimension_numbers = #tpu.dot_dimension_numbers<[1], [0], [0], [1], [0, 0, 1, 1], [], []>} : vector<16x32xbf16>, vector<32x8xbf16>, vector<16x8xf32> -> vector<16x8xf32>
    %c0_46 = arith.constant 0 : index
    %c0_47 = arith.constant 0 : index
    %74 = vector.load %arg5[%c0_46, %c0_47] : memref<1x8xf32, #tpu.memory_space<vmem>>, vector<1x8xf32>
    %75 = vector.broadcast %74 : vector<1x8xf32> to vector<16x8xf32>
    %76 = arith.addf %73, %75 : vector<16x8xf32>
    %77 = math.tanh %76 : vector<16x8xf32>
    %78 = vector.shape_cast %77 : vector<16x8xf32> to vector<4x4x8xf32>
    %c0_48 = arith.constant 0 : index
    %c0_49 = arith.constant 0 : index
    %c0_50 = arith.constant 0 : index
    %c0_51 = arith.constant 0 : index
    %79 = vector.load %arg6[%c0_48, %c0_49, %c0_50, %c0_51] : memref<1x4x4x8xf32, #tpu.memory_space<vmem>>, vector<1x4x4x8xf32>
    %80 = vector.shape_cast %79 : vector<1x4x4x8xf32> to vector<4x4x8xf32>
    %81 = vector.shape_cast %78 : vector<4x4x8xf32> to vector<1x4x4x8xf32>
    tpu.vector_store %arg6[%c0_48, %c0_49, %c0_50, %c0_51], %81 {strides = array<i32>} : memref<1x4x4x8xf32, #tpu.memory_space<vmem>>, vector<1x4x4x8xf32>,
    return
  }
  func.func @transform_0(%arg0: i32) -> (i32, i32, i32, i32) {
    %c0_i32 = arith.constant 0 : i32
    %c0_i32_0 = arith.constant 0 : i32
    %c0_i32_1 = arith.constant 0 : i32
    %c0_i32_2 = arith.constant 0 : i32
    return %arg0, %c0_i32, %c0_i32_0, %c0_i32_1 : i32, i32, i32, i32
  }
  func.func @transform_1(%arg0: i32) -> (i32, i32, i32) {
    %c0_i32 = arith.constant 0 : i32
    %c0_i32_0 = arith.constant 0 : i32
    %c0_i32_1 = arith.constant 0 : i32
    %c0_i32_2 = arith.constant 0 : i32
    return %c0_i32, %c0_i32_0, %c0_i32_1 : i32, i32, i32
  }
  func.func @transform_2(%arg0: i32) -> (i32, i32, i32) {
    %c0_i32 = arith.constant 0 : i32
    %c0_i32_0 = arith.constant 0 : i32
    %c0_i32_1 = arith.constant 0 : i32
    %c0_i32_2 = arith.constant 0 : i32
    return %c0_i32, %c0_i32_0, %c0_i32_1 : i32, i32, i32
  }
  func.func @transform_3(%arg0: i32) -> (i32, i32) {
    %c0_i32 = arith.constant 0 : i32
    %c0_i32_0 = arith.constant 0 : i32
    %c0_i32_1 = arith.constant 0 : i32
    return %c0_i32, %c0_i32_0 : i32, i32
  }
  func.func @transform_4(%arg0: i32) -> (i32, i32) {
    %c0_i32 = arith.constant 0 : i32
    %c0_i32_0 = arith.constant 0 : i32
    %c0_i32_1 = arith.constant 0 : i32
    return %c0_i32, %c0_i32_0 : i32, i32
  }
  func.func @transform_5(%arg0: i32) -> (i32, i32, i32, i32) {
    %c0_i32 = arith.constant 0 : i32
    %c0_i32_0 = arith.constant 0 : i32
    %c0_i32_1 = arith.constant 0 : i32
    %c0_i32_2 = arith.constant 0 : i32
    return %arg0, %c0_i32, %c0_i32_0, %c0_i32_1 : i32, i32, i32, i32
  }
}

</mosaic_0001>

<bundles_post_ra>
// kernel: vq_encoder_forward.4
= control target key start
LH: loop header
LB: loop body
LE: loop exit
PB: predicated region body
PF: predicated region fallthrough
CT: control target
= control target key end

     0   :  { %s1990_s12 = smov 0   ;;  %s2328_s0 = inlined_call_operand.vmem [shape: bf16[2,5,5,64], index: 0, kind: input, shape index: {}]   ;;  %s2329_s1 = inlined_call_operand.vmem [shape: bf16[4,64,32], index: 1, kind: input, shape index: {}]   ;;  %s2330_s2 = inlined_call_operand.vmem [shape: f32[1,1,32], index: 2, kind: input, shape index: {}]   ;;  %s2331_s3 = inlined_call_operand.vmem [shape: bf16[2,4,4,32], index: 3, kind: output, shape index: {}]  }
   0x1 LB: > { %s1779_s13 = sadd.s32 4294967295, %s1967_s12   ;;  %p1783_p0 = scmp.ge.s32.totalorder %s1967_s12, 1  ;;  %s1967_s12 = sphi %s1990_s12, %s13_s12  }
   0x2   : > { %p137_p1 = scmp.lt.s32.totalorder %s1967_s12, 3 }
   0x4   : > { %p138_p2 = pnand %p1783_p0, %p137_p1 }
   0x5   : > { %v1945_v0 = vld [vmem:[%s2329_s1] sm:$0xff] (!%p138_p2)   ;;  %p161_p3 = scmp.lt.s32.totalorder (!%p138_p2), %s1779_s13, 1  ;;  %v1947_v2 = vld [vmem:[%s2329_s1 + $0x8] sm:$0xff] (!%p138_p2)   ;;  %v191_v4 = vlaneseq (!%p138_p2)  ;;  %v1949_v5 = vld [vmem:[%s2329_s1 + $0x10] sm:$0xff] (!%p138_p2)   ;;  %v1969_v12 = vmov (!%p138_p2), 1966171168  }
   0x6   : > { %141 = sbr.rel (%p138_p2) target bundleno = 325 (0x145), region = 32  ;;  %v1946_v1 = vld [vmem:[%s2329_s1 + $0x20] sm:$0xff] (!%p138_p2)   ;;  %1887 = vmatprep.subr.bf16.mxu0 (!%p138_p2), %v1945_v0  ;;  %v1948_v3 = vld [vmem:[%s2329_s1 + $0x28] sm:$0xff] (!%p138_p2)   ;;  %v1950_v6 = vld [vmem:[%s2329_s1 + $0x30] sm:$0xff] (!%p138_p2)   ;;  %v189_v13 = vunpack.c.l.s4 (!%p138_p2), %v1969_v12  ;;  %vm398_vm0 = vcmask (!%p138_p2), 523264   ;;  %vm1719_vm10 = vcmask (!%p138_p2), 254976  }
   0x7   : > { %1899 = vmatprep.subr.bf16.mxu1 (!%p138_p2), %v1946_v1  ;;  %1888 = vmatpush3.bf16.msra.mxu0 (!%p138_p2), %v1945_v0  ;;  %v1951_v7 = vld [vmem:[%s2329_s1 + $0x18] sm:$0xff] (!%p138_p2)   ;;  %v192_v9 = vshrl.u32 (!%p138_p2), %v191_v4, 7  ;;  %v2037_v19 = vld [vmem:[%s2329_s1 + $0x40] sm:$0xff] (!%p138_p2)  }
   0x8   : > { %1900 = vmatpush3.bf16.msra.mxu1 (!%p138_p2), %v1946_v1  ;;  %1889 = vmatprep.subr.bf16.mxu0 (!%p138_p2), %v1947_v2  ;;  %v1952_v8 = vld [vmem:[%s2329_s1 + $0x38] sm:$0xff] (!%p138_p2)   ;;  %v190_v17 = vunpack.c.0.s8 (!%p138_p2), %v189_v13  ;;  %v2044_v22 = vld [vmem:[%s2329_s1 + $0x60] sm:$0xff] (!%p138_p2)  }
   0x9   : > { %1901 = vmatprep.subr.bf16.mxu1 (!%p138_p2), %v1948_v3 }
   0xa   : > { %v2039_v21 = vsub.s32 (!%p138_p2), %v190_v17, %v192_v9 }
   0xb   : > { %1890 = vmatpush3.bf16.msra.mxu0 (!%p138_p2), %v1947_v2 }
   0xc   : > { %1902 = vmatpush3.bf16.msra.mxu1 (!%p138_p2), %v1948_v3  ;;  %1891 = vmatprep.subr.bf16.mxu0 (!%p138_p2), %v1949_v5 }
   0xd   : > { %s2333_s13 = smov (!%p161_p3, %s1779_s13), 1  ;;  %1903 = vmatprep.subr.bf16.mxu1 %v1950_v6 }
   0xe   : > { %s1935_s24 = smul.u32 20, %s2333_s13  ;;  %s1862_s27 = sshll.u32 %s2333_s13, 3 }
   0xf   : > { %1892 = vmatpush3.bf16.msra.mxu0 %v1949_v5  ;;  %s2289_s30 = scalar_lea.vmem %s2331_s3, %s1862_s27 }
  0x10   : > { %s2025_s4 = scalar_lea.vmem %s2328_s0, %s1935_s24  ;;  %1904 = vmatpush3.bf16.msra.mxu1 %v1950_v6  ;;  %1893 = vmatprep.subr.bf16.mxu0 %v1951_v7 }
  0x11   : > { %v1787_v10 = vld.sshfl [vmem:[%s2025_s4] sm:$0x13 pattern:$0x75316420]  ;;  %1905 = vmatprep.subr.bf16.mxu1 %v1952_v8 }
  0x12   : > { %v1788_v11 = vld.sshfl [vmem:[%s2025_s4 + $0x4] sm:$0x13 pattern:$0x75316420]  ;;  %v187_v16 = vcombine.high %v1787_v10, %v1787_v10  ;;  %v194_v24 = vrot.slane %v1787_v10, %v2039_v21 }
  0x13   : > { %v1789_v14 = vld.sshfl [vmem:[%s2025_s4 + $0x8] sm:$0x13 pattern:$0x75316420]  ;;  %v210_v18 = vcombine.high %v1788_v11, %v1788_v11  ;;  %1894 = vmatpush3.bf16.msra.mxu0 %v1951_v7  ;;  %v217_v26 = vrot.slane %v1788_v11, %v2039_v21 }
  0x14   : > { %v1790_v15 = vld.sshfl [vmem:[%s2025_s4 + $0xc] sm:$0x13 pattern:$0x75316420]  ;;  %v233_v20 = vcombine.high %v1789_v14, %v1789_v14  ;;  %v201_v25 = vrot.slane %v187_v16, %v2039_v21  ;;  %1906 = vmatpush3.bf16.msra.mxu1 %v1952_v8  ;;  %v240_v28 = vrot.slane %v1789_v14, %v2039_v21  ;;  %1911 = vmatprep.subr.bf16.mxu0 %v2037_v19 }
  0x15   : > { %v256_v23 = vcombine.high %v1790_v15, %v1790_v15  ;;  %v224_v27 = vrot.slane %v210_v18, %v2039_v21  ;;  %v263_v30 = vrot.slane %v1790_v15, %v2039_v21  ;;  %v202_v31 = vcombine.high %v194_v24, %v194_v24  ;;  %1923 = vmatprep.subr.bf16.mxu1 %v2044_v22  ;;  %v1824_v43 = vld.sshfl [vmem:[%s2025_s4 + $0x10] sm:$0x13 pattern:$0x75316420] }
  0x16   : > { %v247_v29 = vrot.slane %v233_v20, %v2039_v21  ;;  %v225_v32 = vcombine.high %v217_v26, %v217_v26  ;;  %v278_v33 = vunpack.i.h.s16 %v217_v26  ;;  %v248_v35 = vcombine.high %v240_v28, %v240_v28 }
  0x17   : > { %v280_v34 = vunpack.i.h.s16 %v224_v27  ;;  %v310_v36 = vcombine.low %v194_v24, %v201_v25  ;;  %v270_v37 = vrot.slane %v256_v23, %v2039_v21  ;;  %v271_v38 = vcombine.high %v263_v30, %v263_v30  ;;  %v1955_v24 = vld [vmem:[%s2329_s1 + $0x48] sm:$0xff]  }
  0x18   : > { %v1791_v39 = vpack.i.b16 %v217_v26, %v202_v31  ;;  %v1792_v40 = vpack.i.b16 %v224_v27, %v278_v33  ;;  %v288_v42 = vunpack.i.h.s16 %v263_v30  ;;  %v1794_v44 = vpack.i.b16 %v263_v30, %v248_v35  ;;  %v1956_v25 = vld [vmem:[%s2329_s1 + $0x68] sm:$0xff]   ;;  %v1957_v31 = vld [vmem:[%s2329_s1 + $0x50] sm:$0xff]  }
  0x19   : > { %v1793_v41 = vpack.i.b16 %v225_v32, %v280_v34  ;;  %v320_v45 = vrot.slane %v310_v36, %v2039_v21  ;;  %v290_v46 = vunpack.i.h.s16 %v270_v37  ;;  %v920_v47 = vrot.slane %v1824_v43, %v2039_v21  ;;  %v1859_v36 = vld [vmem:[%s2330_s2] ss:$0 sm:$0xff] }
  0x1a   : > { %v311_v48 = vcombine.low %v1791_v39, %v1792_v40  ;;  %v1795_v50 = vpack.i.b16 %v270_v37, %v288_v42  ;;  %v935_v51 = vunpack.i.h.s16 %v240_v28  ;;  %v313_v52 = vcombine.low %v247_v29, %v1794_v44 }
  0x1b   : > { %v312_v49 = vcombine.low %v1793_v41, %v240_v28  ;;  %v1796_v53 = vpack.i.b16 %v271_v38, %v290_v46  ;;  %v937_v54 = vunpack.i.h.s16 %v247_v29  ;;  %v1833_v55 = vpack.i.b16 %v240_v28, %v225_v32  ;;  %v1958_v32 = vld [vmem:[%s2329_s1 + $0x70] sm:$0xff]  }
  0x1c   : > { %v327_v56 = vrot.slane %v311_v48, %v2039_v21  ;;  %v1834_v58 = vpack.i.b16 %v247_v29, %v935_v51  ;;  %v1836_v59 = vpack.i.b16 %v920_v47, %v271_v38  ;;  %v341_v60 = vrot.slane %v313_v52, %v2039_v21 }
  0x1d   : > { %v334_v57 = vrot.slane %v312_v49, %v2039_v21  ;;  %v359_v61 = vcombine.low %v1795_v50, %v1796_v53  ;;  %v1835_v62 = vpack.i.b16 %v248_v35, %v937_v54  ;;  %v968_v63 = vcombine.low %v217_v26, %v224_v27 }
  0x1e   : > { %v342_v0 = vcombine.low %v320_v45, %v327_v56  ;;  %v969_v1 = vcombine.low %v1833_v55, %v1834_v58  ;;  %v971_v2 = vcombine.low %v270_v37, %v1836_v59  ;;  %v913_v3 = vcombine.high %v1824_v43, %v1824_v43 }
  0x1f   : > { %v343_v4 = vcombine.low %v334_v57, %v341_v60  ;;  %v366_v5 = vrot.slane %v359_v61, %v2039_v21  ;;  %v970_v6 = vcombine.low %v1835_v62, %v263_v30  ;;  %v978_v7 = vrot.slane %v968_v63, %v2039_v21 }
  0x20   : > { %v350_v8 = vrot.slane %v342_v0, %v2039_v21  ;;  %v985_v9 = vrot.slane %v969_v1, %v2039_v21  ;;  %v999_v10 = vrot.slane %v971_v2, %v2039_v21  ;;  %v927_v11 = vrot.slane %v913_v3, %v2039_v21 }
  0x21   : > { %v357_v12 = vrot.slane %v343_v4, %v2039_v21  ;;  %v373_v13 = vrot.slane %v366_v5, %v2039_v21  ;;  %v992_v14 = vrot.slane %v970_v6, %v2039_v21  ;;  %v928_v16 = vcombine.high %v920_v47, %v920_v47 }
  0x22   : > { %v1000_v15 = vcombine.low %v978_v7, %v985_v9  ;;  %v945_v17 = vunpack.i.h.s16 %v920_v47  ;;  %v947_v18 = vunpack.i.h.s16 %v927_v11  ;;  %v1513_v37 = vrot.slane %v1859_v36, %v2039_v21 }
  0x23   : > { %v358_v20 = vcombine.low %v350_v8, %v357_v12  ;;  %v1001_v23 = vcombine.low %v992_v14, %v999_v10 }
  0x24   : > { %v1008_v26 = vrot.slane %v1000_v15, %v2039_v21  ;;  %v1837_v28 = vpack.i.b16 %v927_v11, %v945_v17  ;;  %v1838_v29 = vpack.i.b16 %v928_v16, %v947_v18  ;;  %v1514_v38 = vcombine.high %v1513_v37, %v1513_v37 }
  0x25   : > { %1895 = vmatprep.mubr.msk.bf16.mxu0 %vm398_vm0, %v358_v20  ;;  %1907 = vmatprep.mubr.msk.bf16.mxu1 %vm398_vm0, %v358_v20  ;;  %v1015_v27 = vrot.slane %v1001_v23, %v2039_v21  ;;  %v2110_v45 = vrot.slane %v1513_v37, %v2039_v21 }
  0x26   : > { %1896 = vmatmul.mubr.msk.bf16.vlgmr.msra.gmra.mrb[0].mxu0 %vm398_vm0, %v373_v13  ;;  %1908 = vmatmul.mubr.msk.bf16.vlgmr.msra.gmra.mrb[0].mxu1 %vm398_vm0, %v373_v13  ;;  %v1017_v33 = vcombine.low %v1837_v28, %v1838_v29  ;;  %v2113_v46 = vrot.slane %v1514_v38, %v2039_v21 }
  0x27   : > { %1912 = vmatpush3.bf16.msra.mxu0 %v2037_v19  ;;  %1924 = vmatpush3.bf16.msra.mxu1 %v2044_v22  ;;  %v1016_v30 = vcombine.low %v1008_v26, %v1015_v27  ;;  %v1959_v19 = vld [vmem:[%s2329_s1 + $0x58] sm:$0xff]   ;;  %v2131_v4 = vcombine.high %v2110_v45, %v2110_v45 }
  0x28   : > { %1913 = vmatprep.subr.bf16.mxu0 %v1955_v24  ;;  %1925 = vmatprep.subr.bf16.mxu1 %v1956_v25  ;;  %v1960_v22 = vld [vmem:[%s2329_s1 + $0x78] sm:$0xff]   ;;  %v1024_v34 = vrot.slane %v1017_v33, %v2039_v21  ;;  %v2135_v5 = vcombine.high %v2113_v46, %v2113_v46 }
  0x29   : > { %1919 = vmatprep.mubr.msk.bf16.mxu0 %vm398_vm0, %v1016_v30  ;;  %1931 = vmatprep.mubr.msk.bf16.mxu1 %vm398_vm0, %v1016_v30 }
  0x2a   : > { %v1031_v35 = vrot.slane %v1024_v34, %v2039_v21 }
  0x2b   : > { %1914 = vmatpush3.bf16.msra.mxu0 %v1955_v24  ;;  %1926 = vmatpush3.bf16.msra.mxu1 %v1956_v25 }
  0x2c   : > { %1915 = vmatprep.subr.bf16.mxu0 %v1957_v31  ;;  %1927 = vmatprep.subr.bf16.mxu1 %v1958_v32 }
  0x2f   : > { %1916 = vmatpush3.bf16.msra.mxu0 %v1957_v31  ;;  %1928 = vmatpush3.bf16.msra.mxu1 %v1958_v32 }
  0x30   : > { %1917 = vmatprep.subr.bf16.mxu0 %v1959_v19  ;;  %1929 = vmatprep.subr.bf16.mxu1 %v1960_v22 }
  0x33   : > { %1918 = vmatpush3.bf16.msra.mxu0 %v1959_v19  ;;  %1930 = vmatpush3.bf16.msra.mxu1 %v1960_v22 }
  0x36   : > { %1920 = vmatmul.mubr.msk.bf16.vlgmr.msra.gmra.mrb[4].mxu0 %vm398_vm0, %v1031_v35  ;;  %1932 = vmatmul.mubr.msk.bf16.vlgmr.msra.gmra.mrb[4].mxu1 %vm398_vm0, %v1031_v35 }
  0xf9   : > { %v1897_v39 = vpop.f32.mrb[0].mxu0  ;;  %v1909_v40 = vpop.f32.mrb[0].mxu1 }
  0xfa   : > { %v559_v41 = vrot.slane %v1897_v39, %v2039_v21  ;;  %v778_v42 = vrot.slane %v1909_v40, %v2039_v21  ;;  %v439_v43 = vpop.f32.mrb[1].mxu0  ;;  %v659_v44 = vpop.f32.mrb[1].mxu1 }
  0xfb   : > { %v456_v47 = vcombine.high %v439_v43, %v439_v43  ;;  %v463_v48 = vrot.slane %v439_v43, %v2039_v21  ;;  %v676_v49 = vcombine.high %v659_v44, %v659_v44  ;;  %v683_v50 = vrot.slane %v659_v44, %v2039_v21  ;;  %v1898_v51 = vpop.f32.mrb[2].mxu0  ;;  %v1910_v52 = vpop.f32.mrb[2].mxu1 }
  0xfc   : > { %v560_v53 = vcombine.high %v559_v41, %v559_v41  ;;  %v567_v54 = vrot.slane %v559_v41, %v2039_v21  ;;  %v779_v55 = vcombine.high %v778_v42, %v778_v42  ;;  %v2119_v56 = vrot.slane %v778_v42, %v2039_v21  ;;  %v442_v57 = vpop.f32.mrb[3].mxu0  ;;  %v662_v58 = vpop.f32.mrb[3].mxu1 }
  0xfd   : > { %v470_v59 = vrot.slane %v456_v47, %v2039_v21  ;;  %v471_v60 = vcombine.high %v463_v48, %v463_v48  ;;  %v690_v61 = vrot.slane %v676_v49, %v2039_v21  ;;  %v479_v1 = vrot.slane %v463_v48, %v2039_v21 }
  0xfe   : > { %v574_v62 = vrot.slane %v560_v53, %v2039_v21  ;;  %v793_v63 = vrot.slane %v779_v55, %v2039_v21  ;;  %v794_v0 = vcombine.high %v2119_v56, %v2119_v56  ;;  %v575_v6 = vcombine.high %v567_v54, %v567_v54 }
  0xff   : > { %v472_v2 = vcombine.high %v470_v59, %v470_v59  ;;  %v493_v3 = vrot.slane %v471_v60, %v2039_v21  ;;  %v691_v8 = vcombine.high %v683_v50, %v683_v50  ;;  %v692_v9 = vcombine.high %v690_v61, %v690_v61 }
 0x100   : > { %v2137_v7 = vadd.f32 %v794_v0, %v574_v62  ;;  %v486_v10 = vrot.slane %v470_v59, %v2039_v21  ;;  %v699_v13 = vrot.slane %v683_v50, %v2039_v21  ;;  %v795_v14 = vcombine.high %v793_v63, %v793_v63 }
 0x101   : > { %v500_v11 = vrot.slane %v472_v2, %v2039_v21  ;;  %v503_v12 = vcombine.high %v493_v3, %v493_v3  ;;  %v501_v15 = vcombine.high %v479_v1, %v479_v1  ;;  %v706_v16 = vrot.slane %v690_v61, %v2039_v21 }
 0x102   : > { %v505_v17 = vcombine.high %v442_v57, %v442_v57  ;;  %v713_v18 = vrot.slane %v691_v8, %v2039_v21  ;;  %v721_v20 = vcombine.high %v699_v13, %v699_v13  ;;  %v512_v23 = vrot.slane %v442_v57, %v2039_v21 }
 0x103   : > { %v725_v24 = vcombine.high %v662_v58, %v662_v58  ;;  %v720_v25 = vrot.slane %v692_v9, %v2039_v21  ;;  %v722_v26 = vcombine.high %v706_v16, %v706_v16  ;;  %v2146_v27 = vadd.f32 %v706_v16, %v503_v12 }
 0x104   : > { %v504_v28 = vcombine.high %v500_v11, %v500_v11  ;;  %v2148_v29 = vadd.f32 %v721_v20, %v493_v3  ;;  %v2151_v30 = vrot.slane %v505_v17, %v2039_v21  ;;  %v520_v31 = vcombine.high %v512_v23, %v512_v23 }
 0x105   : > { %v2154_v32 = vrot.slane %v512_v23, %v2039_v21  ;;  %v2156_v33 = vadd.f32 %v722_v26, %v500_v11  ;;  %v732_v19 = vrot.slane %v662_v58, %v2039_v21  ;;  %v2160_v22 = vrot.slane %v725_v24, %v2039_v21 }
 0x106   : > { %v825_v34 = vadd.f32 %v793_v63, %v567_v54  ;;  %v502_v35 = vcombine.high %v486_v10, %v486_v10  ;;  %v723_v36 = vcombine.high %v713_v18, %v713_v18  ;;  %v521_v37 = vcombine.high %v2151_v30, %v2151_v30 }
 0x107   : > { %v542_v38 = vrot.slane %v520_v31, %v2039_v21  ;;  %v724_v39 = vcombine.high %v720_v25, %v720_v25  ;;  %v535_v40 = vrot.slane %v2151_v30, %v2039_v21  ;;  %v748_v41 = vrot.slane %v732_v19, %v2039_v21 }
 0x108   : > { %v755_v42 = vrot.slane %v2160_v22, %v2039_v21  ;;  %v549_v43 = vrot.slane %v521_v37, %v2039_v21  ;;  %v827_v47 = vadd.f32 %v795_v14, %v575_v6  ;;  %v812_v50 = vadd.f32 %v713_v18, %v479_v1 }
 0x109   : > { %v551_v44 = vcombine.high %v542_v38, %v542_v38  ;;  %v1921_v48 = vpop.f32.mrb[4].mxu0  ;;  %v1933_v49 = vpop.f32.mrb[4].mxu1  ;;  %v550_v51 = vcombine.high %v2154_v32, %v2154_v32  ;;  %v740_v52 = vcombine.high %v732_v19, %v732_v19  ;;  %v2173_v54 = vadd.f32 %v748_v41, %v504_v28 }
 0x10a   : > { %v770_v53 = vcombine.high %v755_v42, %v755_v42  ;;  %v1096_v55 = vpop.f32.mrb[5].mxu0  ;;  %v1332_v57 = vpop.f32.mrb[5].mxu1  ;;  %v552_v58 = vcombine.high %v549_v43, %v549_v43  ;;  %v1216_v60 = vrot.slane %v1921_v48, %v2039_v21  ;;  %v1451_v61 = vrot.slane %v1933_v49, %v2039_v21 }
 0x10b   : > { %v2175_v59 = vadd.f32 %v755_v42, %v551_v44  ;;  %v1922_v62 = vpop.f32.mrb[6].mxu0  ;;  %v1934_v63 = vpop.f32.mrb[6].mxu1  ;;  %v741_v0 = vcombine.high %v2160_v22, %v2160_v22  ;;  %v814_v2 = vadd.f32 %v723_v36, %v501_v15  ;;  %v817_v3 = vadd.f32 %v724_v39, %v502_v35 }
 0x10c   : > { %v2181_v1 = vadd.f32 %v770_v53, %v549_v43  ;;  %v2183_v6 = vpop.f32.mrb[7].mxu0  ;;  %v2185_v8 = vpop.f32.mrb[7].mxu1  ;;  %v2188_v9 = vadd.f32 %v2119_v56, %v552_v58  ;;  %v1217_v10 = vcombine.high %v1216_v60, %v1216_v60  ;;  %v1224_v11 = vrot.slane %v1216_v60, %v2039_v21 }
 0x10d   : > { %v1452_v12 = vcombine.high %v1451_v61, %v1451_v61  ;;  %v762_v13 = vrot.slane %v740_v52, %v2039_v21  ;;  %v2193_v14 = vrot.slane %v1451_v61, %v2039_v21  ;;  %v1113_v16 = vcombine.high %v1096_v55, %v1096_v55 }
 0x10e   : > { %v1120_v15 = vrot.slane %v1096_v55, %v2039_v21  ;;  %v1231_v17 = vrot.slane %v1217_v10, %v2039_v21  ;;  %v1232_v18 = vcombine.high %v1224_v11, %v1224_v11  ;;  %v1262_v20 = vadd.f32 %v1224_v11, %v825_v34 }
 0x10f   : > { %v1466_v23 = vrot.slane %v1452_v12, %v2039_v21  ;;  %v1467_v56 = vcombine.high %v2193_v14, %v2193_v14  ;;  %v1127_v24 = vrot.slane %v1113_v16, %v2039_v21  ;;  %v1349_v42 = vcombine.high %v1332_v57, %v1332_v57 }
 0x110   : > { %v1128_v25 = vcombine.high %v1120_v15, %v1120_v15  ;;  %v1136_v26 = vrot.slane %v1120_v15, %v2039_v21  ;;  %v1263_v28 = vadd.f32 %v1231_v17, %v2137_v7  ;;  %v1264_v31 = vadd.f32 %v1232_v18, %v827_v47 }
 0x111   : > { %v1468_v19 = vcombine.high %v1466_v23, %v1466_v23  ;;  %v1498_v22 = vadd.f32 %v1466_v23, %v1262_v20  ;;  %v1129_v35 = vcombine.high %v1127_v24, %v1127_v24  ;;  %v1143_v36 = vrot.slane %v1127_v24, %v2039_v21 }
 0x112   : > { %v1150_v34 = vrot.slane %v1128_v25, %v2039_v21  ;;  %v1158_v37 = vcombine.high %v1136_v26, %v1136_v26  ;;  %v1499_v38 = vadd.f32 %v1467_v56, %v1263_v28  ;;  %v1249_v41 = vadd.f32 %v1136_v26, %v812_v50 }
 0x113   : > { %v1500_v39 = vadd.f32 %v1468_v19, %v1264_v31  ;;  %v2206_v43 = vrot.slane %v1129_v35, %v2039_v21  ;;  %v1159_v44 = vcombine.high %v1143_v36, %v1143_v36  ;;  %v769_v47 = vrot.slane %v741_v0, %v2039_v21 }
 0x114   : > { %v1160_v48 = vcombine.high %v1150_v34, %v1150_v34  ;;  %v1250_v7 = vadd.f32 %v1150_v34, %v2148_v29  ;;  %v771_v49 = vcombine.high %v762_v13, %v762_v13  ;;  %v1549_v52 = vadd.f32 %v2131_v4, %v1499_v38 }
 0x115   : > { %v1550_v53 = vadd.f32 %v2135_v5, %v1500_v39  ;;  %v1251_v55 = vadd.f32 %v1158_v37, %v814_v2  ;;  %v1253_v58 = vadd.f32 %v2206_v43, %v2156_v33  ;;  %v1254_v50 = vadd.f32 %v1159_v44, %v817_v3 }
 0x116   : > { %v1252_v60 = vadd.f32 %v1160_v48, %v2146_v27  ;;  %vm1565_vm1 = vcmp.ge.f32.partialorder %v1549_v52, 0.0  ;;  %v1581_v61 = vmul.f32 0.01, %v1549_v52  ;;  %v1356_v29 = vrot.slane %v1332_v57, %v2039_v21 }
 0x117   : > { %vm1566_vm2 = vcmp.ge.f32.partialorder %v1550_v53, 0.0  ;;  %v1582_v62 = vmul.f32 0.01, %v1550_v53  ;;  %v1363_v63 = vrot.slane %v1349_v42, %v2039_v21  ;;  %v2218_v0 = vadd.f32 %v762_v13, %v2154_v32 }
 0x118   : > { %v2220_v10 = vsel %vm1565_vm1, %v1549_v52, %v1581_v61  ;;  %v2227_v33 = vadd.f32 %v771_v49, %v550_v51  ;;  %v2232_v27 = vadd.f32 %v769_v47, %v535_v40  ;;  %v1364_v3 = vcombine.high %v1356_v29, %v1356_v29 }
 0x119   : > { %v2222_v2 = vsel %vm1566_vm2, %v1550_v53, %v1582_v62  ;;  %v1365_v11 = vcombine.high %v1363_v63, %v1363_v63  ;;  %v1372_v12 = vrot.slane %v1356_v29, %v2039_v21  ;;  %v2238_v13 = vadd.f32 %v2113_v46, %v1498_v22 }
 0x11a   : > { %v1688_v57 = vcombine.low %v2220_v10, %v2222_v2  ;;  %v1379_v16 = vrot.slane %v1363_v63, %v2039_v21  ;;  %v1162_v32 = vcombine.high %v2183_v6, %v2183_v6  ;;  %v1169_v30 = vrot.slane %v2183_v6, %v2039_v21 }
 0x11b   : > { %v1386_v40 = vrot.slane %v1364_v3, %v2039_v21  ;;  %v1393_v51 = vrot.slane %v1365_v11, %v2039_v21  ;;  %v1394_v15 = vcombine.high %v1372_v12, %v1372_v12  ;;  %v1161_v17 = vcombine.high %v2206_v43, %v2206_v43 }
 0x11c   : > { %v1395_v18 = vcombine.high %v1379_v16, %v1379_v16  ;;  %v1488_v20 = vadd.f32 %v1379_v16, %v1252_v60  ;;  %v1176_v23 = vrot.slane %v1162_v32, %v2039_v21  ;;  %v1177_v56 = vcombine.high %v1169_v30, %v1169_v30 }
 0x11d   : > { %v1396_v24 = vcombine.high %v1386_v40, %v1386_v40  ;;  %v1397_v25 = vcombine.high %v1393_v51, %v1393_v51  ;;  %v1485_v26 = vadd.f32 %v1386_v40, %v1249_v41  ;;  %v1486_v28 = vadd.f32 %v1394_v15, %v1250_v7 }
 0x11e   : > { %v1489_v31 = vadd.f32 %v1395_v18, %v1253_v58  ;;  %v1538_v6 = vadd.f32 %v2135_v5, %v1488_v20  ;;  %v1178_v19 = vcombine.high %v1176_v23, %v1176_v23  ;;  %v1185_v22 = vrot.slane %v1169_v30, %v2039_v21 }
 0x11f   : > { %v1487_v35 = vadd.f32 %v1396_v24, %v1251_v55  ;;  %v1490_v36 = vadd.f32 %v1397_v25, %v1254_v50  ;;  %v1535_v34 = vadd.f32 %v2110_v45, %v1485_v26  ;;  %v1536_v37 = vadd.f32 %v2113_v46, %v1486_v28 }
 0x120   : > { %v1539_v38 = vadd.f32 %v2110_v45, %v1489_v31  ;;  %vm1554_vm3 = vcmp.ge.f32.partialorder %v1538_v6, 0.0  ;;  %v1570_v39 = vmul.f32 0.01, %v1538_v6  ;;  %v1192_v42 = vrot.slane %v1176_v23, %v2039_v21 }
 0x121   : > { %v1537_v41 = vadd.f32 %v2131_v4, %v1487_v35  ;;  %v1540_v43 = vadd.f32 %v2113_v46, %v1490_v36  ;;  %vm1551_vm4 = vcmp.ge.f32.partialorder %v1535_v34, 0.0  ;;  %vm1552_vm5 = vcmp.ge.f32.partialorder %v1536_v37, 0.0 }
 0x122   : > { %vm1555_vm6 = vcmp.ge.f32.partialorder %v1539_v38, 0.0  ;;  %v1567_v44 = vmul.f32 0.01, %v1535_v34  ;;  %v1568_v48 = vmul.f32 0.01, %v1536_v37  ;;  %v1586_v7 = vsel %vm1554_vm3, %v1538_v6, %v1570_v39 }
 0x123   : > { %vm1553_vm7 = vcmp.ge.f32.partialorder %v1537_v41, 0.0  ;;  %vm1556_vm8 = vcmp.ge.f32.partialorder %v1540_v43, 0.0  ;;  %v1569_v47 = vmul.f32 0.01, %v1537_v41  ;;  %v1571_v49 = vmul.f32 0.01, %v1539_v38 }
 0x124   : > { %v1572_v52 = vmul.f32 0.01, %v1540_v43  ;;  %v1583_v53 = vsel %vm1551_vm4, %v1535_v34, %v1567_v44  ;;  %v1584_v55 = vsel %vm1552_vm5, %v1536_v37, %v1568_v48  ;;  %v1199_v58 = vrot.slane %v1177_v56, %v2039_v21 }
 0x125   : > { %v1585_v50 = vsel %vm1553_vm7, %v1537_v41, %v1569_v47  ;;  %v2259_v60 = vsel %vm1555_vm6, %v1539_v38, %v1571_v49  ;;  %v1615_v61 = vcombine.low %v1583_v53, %v1584_v55  ;;  %v1206_v62 = vrot.slane %v1178_v19, %v2039_v21 }
 0x126   : > { %v2262_v29 = vsel %vm1556_vm8, %v1540_v43, %v1572_v52  ;;  %v1616_v63 = vcombine.low %v1585_v50, %v1586_v7  ;;  %v1207_v3 = vcombine.high %v1185_v22, %v1185_v22  ;;  %v1208_v11 = vcombine.high %v1199_v58, %v1199_v58 }
 0x127   : > { %v1623_v12 = vrot.slane %v1615_v61, %v2039_v21  ;;  %v1639_v16 = vcombine.low %v2259_v60, %v2262_v29  ;;  %v1209_v32 = vcombine.high %v1206_v62, %v1206_v62  ;;  %v1256_v30 = vadd.f32 %v1185_v22, %v2218_v0 }
 0x128   : > { %v1630_v40 = vrot.slane %v1616_v63, %v2039_v21  ;;  %v1257_v51 = vadd.f32 %v1207_v3, %v2227_v33  ;;  %v1258_v15 = vadd.f32 %v1208_v11, %v2175_v59  ;;  %v1259_v18 = vadd.f32 %v1192_v42, %v2232_v27 }
 0x129   : > { %v1260_v20 = vadd.f32 %v1206_v62, %v2181_v1  ;;  %v1261_v23 = vadd.f32 %v1209_v32, %v2188_v9  ;;  %v1255_v56 = vadd.f32 %v1161_v17, %v2173_v54  ;;  %v1398_v24 = vcombine.high %v2185_v8, %v2185_v8 }
 0x12a   : > { %v1580_v25 = vmul.f32 0.01, %v2238_v13  ;;  %v1631_v0 = vcombine.low %v1623_v12, %v1630_v40  ;;  %v1405_v33 = vrot.slane %v2185_v8, %v2039_v21  ;;  %vm1564_vm9 = vcmp.ge.f32.partialorder %v2238_v13, 0.0 }
 0x12b   : > { %v1497_v59 = vadd.f32 %v2193_v14, %v1261_v23  ;;  %v1412_v1 = vrot.slane %v1398_v24, %v2039_v21 }
 0x12c   : > { %v1638_v9 = vrot.slane %v1631_v0, %v2039_v21  ;;  %v1413_v27 = vcombine.high %v1405_v33, %v1405_v33  ;;  %v1421_v54 = vrot.slane %v1405_v33, %v2039_v21  ;;  %v1596_v14 = vsel %vm1564_vm9, %v2238_v13, %v1580_v25 }
 0x12d   : > { %v1547_v8 = vadd.f32 %v2110_v45, %v1497_v59  ;;  %v1414_v17 = vcombine.high %v1412_v1, %v1412_v1  ;;  %v1428_v26 = vrot.slane %v1412_v1, %v2039_v21  ;;  %v1702_v13 = vrot.slane %v1688_v57, %v2039_v21 }
 0x12e   : > { %v1715_v28 = vpack.c.bf16 %v1638_v9, %v1638_v9  ;;  %v1435_v31 = vrot.slane %v1413_v27, %v2039_v21  ;;  %v1491_v6 = vadd.f32 %v1421_v54, %v1255_v56 }
 0x12f   : > { %vm1563_vm11 = vcmp.ge.f32.partialorder %v1547_v8, 0.0  ;;  %v1579_v19 = vmul.f32 0.01, %v1547_v8  ;;  %v1442_v22 = vrot.slane %v1414_v17, %v2039_v21  ;;  %v1443_v35 = vcombine.high %v1428_v26, %v1428_v26 }
 0x130   : > { %1720 = vst.msk [vmem:[%s2289_s30] sm:$0x3] %vm1719_vm10, %v1715_v28  ;;  %v1444_v36 = vcombine.high %v1435_v31, %v1435_v31  ;;  %v1492_v34 = vadd.f32 %v1435_v31, %v1256_v30  ;;  %v1494_v37 = vadd.f32 %v1428_v26, %v1258_v15  ;;  %v1541_v38 = vadd.f32 %v2131_v4, %v1491_v6 }
 0x131   : > { %v1595_v39 = vsel %vm1563_vm11, %v1547_v8, %v1579_v19  ;;  %v1495_v42 = vadd.f32 %v1442_v22, %v1259_v18  ;;  %v1496_v41 = vadd.f32 %v1443_v35, %v1260_v20  ;;  %v1647_v30 = vrot.slane %v1639_v16, %v2039_v21 }
 0x132   : > { %v1687_v43 = vcombine.low %v1595_v39, %v1596_v14  ;;  %v1493_v44 = vadd.f32 %v1444_v36, %v1257_v51  ;;  %v1542_v48 = vadd.f32 %v2135_v5, %v1492_v34  ;;  %v1544_v7 = vadd.f32 %v2113_v46, %v1494_v37 }
 0x133   : > { %v1545_v47 = vadd.f32 %v2131_v4, %v1495_v42  ;;  %v1546_v49 = vadd.f32 %v2135_v5, %v1496_v41  ;;  %vm1557_vm12 = vcmp.ge.f32.partialorder %v1541_v38, 0.0  ;;  %v1573_v52 = vmul.f32 0.01, %v1541_v38 }
 0x134   : > { %v1695_v53 = vrot.slane %v1687_v43, %v2039_v21  ;;  %v1543_v10 = vadd.f32 %v2110_v45, %v1493_v44  ;;  %vm1558_vm13 = vcmp.ge.f32.partialorder %v1542_v48, 0.0  ;;  %vm1560_vm14 = vcmp.ge.f32.partialorder %v1544_v7, 0.0 }
 0x135   : > { %vm1561_vm15 = vcmp.ge.f32.partialorder %v1545_v47, 0.0  ;;  %vm1562_vm0 = vcmp.ge.f32.partialorder %v1546_v49, 0.0  ;;  %v1574_v2 = vmul.f32 0.01, %v1542_v48  ;;  %v1576_v57 = vmul.f32 0.01, %v1544_v7 }
 0x136   : > { %v1703_v55 = vcombine.low %v1695_v53, %v1702_v13  ;;  %vm1559_vm1 = vcmp.ge.f32.partialorder %v1543_v10, 0.0  ;;  %v1575_v58 = vmul.f32 0.01, %v1543_v10  ;;  %v1577_v46 = vmul.f32 0.01, %v1545_v47 }
 0x137   : > { %v1578_v4 = vmul.f32 0.01, %v1546_v49  ;;  %v1589_v50 = vsel %vm1557_vm12, %v1541_v38, %v1573_v52  ;;  %v1590_v5 = vsel %vm1558_vm13, %v1542_v48, %v1574_v2  ;;  %v1592_v61 = vsel %vm1560_vm14, %v1544_v7, %v1576_v57 }
 0x138   : > { %v1710_v62 = vrot.slane %v1703_v55, %v2039_v21  ;;  %v1591_v63 = vsel %vm1559_vm1, %v1543_v10, %v1575_v58  ;;  %v1640_v3 = vcombine.low %v1589_v50, %v1590_v5  ;;  %v1593_v45 = vsel %vm1561_vm15, %v1545_v47, %v1577_v46 }
 0x139   : > { %v1594_v11 = vsel %vm1562_vm0, %v1546_v49, %v1578_v4  ;;  %v1663_v12 = vcombine.low %v1591_v63, %v1592_v61 }
 0x13a   : > { %v1718_v32 = vpack.c.bf16 %v1710_v62, %v1710_v62  ;;  %v1654_v40 = vrot.slane %v1640_v3, %v2039_v21  ;;  %v1664_v51 = vcombine.low %v1593_v45, %v1594_v11 }
 0x13b   : > { %v1671_v15 = vrot.slane %v1663_v12, %v2039_v21 }
 0x13c   : > { %1723 = vst.msk [vmem:[%s2289_s30 + $0x6] sm:$0x3] %vm1719_vm10, %v1718_v32  ;;  %v1655_v18 = vcombine.low %v1647_v30, %v1654_v40  ;;  %v1678_v20 = vrot.slane %v1664_v51, %v2039_v21 }
 0x13e   : > { %v1662_v23 = vrot.slane %v1655_v18, %v2039_v21  ;;  %v1679_v56 = vcombine.low %v1671_v15, %v1678_v20 }
 0x140   : > { %v1686_v24 = vrot.slane %v1679_v56, %v2039_v21  ;;  %v1716_v25 = vpack.c.bf16 %v1662_v23, %v1662_v23 }
 0x142   : > { %v1717_v0 = vpack.c.bf16 %v1686_v24, %v1686_v24  ;;  %1721 = vst.msk [vmem:[%s2289_s30 + $0x2] sm:$0x3] %vm1719_vm10, %v1716_v25 }
 0x144   : > { %1722 = vst.msk [vmem:[%s2289_s30 + $0x4] sm:$0x3] %vm1719_vm10, %v1717_v0 }
 0x145 PF: > { %s13_s12 = sadd.s32 1, %s1967_s12  }
 0x146   : > { %p10_p4 = scmp.ge.s32.totalorder %s13_s12, 4  }
 0x148   :  { %12 = sbr.rel (!%p10_p4) target bundleno = 1 (0x1), region = 66 }

// kernel: vq_encoder_forward.3
= control target key start
LH: loop header
LB: loop body
LE: loop exit
PB: predicated region body
PF: predicated region fallthrough
CT: control target
= control target key end

     0   :  { %s5235_s12 = smov 0   ;;  %s6674_s0 = inlined_call_operand.vmem [shape: bf16[2,9,9,16], index: 0, kind: input, shape index: {}]   ;;  %s6675_s1 = inlined_call_operand.vmem [shape: bf16[4,16,16], index: 1, kind: input, shape index: {}]   ;;  %s6676_s2 = inlined_call_operand.vmem [shape: f32[1,1,16], index: 2, kind: input, shape index: {}]   ;;  %s6677_s3 = inlined_call_operand.vmem [shape: bf16[2,8,8,16], index: 3, kind: output, shape index: {}]  }
   0x1 LB: > { %s4942_s13 = sadd.s32 4294967295, %s5210_s12   ;;  %p4946_p0 = scmp.ge.s32.totalorder %s5210_s12, 1  ;;  %s5210_s12 = sphi %s5235_s12, %s13_s12  }
   0x2   : > { %p137_p1 = scmp.lt.s32.totalorder %s5210_s12, 3 }
   0x4   : > { %p138_p2 = pnand %p4946_p0, %p137_p1 }
   0x6   : > { %141 = sbr.rel (%p138_p2) target bundleno = 525 (0x20d), region = 32 }
   0xd   : > { %v5200_v0 = vld [vmem:[%s6675_s1] sm:$0xff]   ;;  %v215_v1 = vlaneseq  ;;  %v5212_v2 = vmov 0.0   ;;  %v5201_v3 = vld [vmem:[%s6675_s1 + $0x8] sm:$0xff]   ;;  %vm5213_vm0 = vmmov 0   ;;  %p161_p3 = scmp.lt.s32.totalorder %s4942_s13, 1  ;;  %vm844_vm1 = vcmask 130048  }
   0xe   : > { %5100 = vmatprep.subr.bf16.mxu0 %v5212_v2  ;;  %5122 = vmatprep.subr.bf16.mxu1 %v5212_v2  ;;  %v5214_v4 = vmov 1966171168  }
   0xf   : > { %5101 = vmatpush3.bf16.msra.mxu0 %v5200_v0  ;;  %5102 = vmatprep.mubr.msk.bf16.mxu0 %vm5213_vm0, %v5212_v2  ;;  %v213_v5 = vunpack.c.l.s4 %v5214_v4  ;;  %s6853_s13 = smov (!%p161_p3, %s4942_s13), 1  ;;  %v216_v6 = vshrl.u32 %v215_v1, 7 }
  0x10   : > { %5123 = vmatpush3.bf16.msra.mxu1 %v5201_v3  ;;  %5124 = vmatprep.mubr.msk.bf16.mxu1 %vm5213_vm0, %v5212_v2  ;;  %s5188_s18 = smul.u32 72, %s6853_s13  ;;  %s5075_s28 = sshll.u32 %s6853_s13, 5 }
  0x11   : > { %5144 = vmatprep.subr.bf16.mxu0 %v5212_v2  ;;  %5166 = vmatprep.subr.bf16.mxu1 %v5212_v2  ;;  %v214_v7 = vunpack.c.0.s8 %v213_v5  ;;  %s6221_s4 = scalar_lea.vmem %s6677_s3, %s5075_s28 }
  0x12   : > { %s5263_s21 = scalar_lea.vmem %s6674_s0, %s5188_s18 }
  0x13   : > { %v5265_v8 = vsub.s32 %v214_v7, %v216_v6  ;;  %v4950_v9 = vld.sshfl [vmem:[%s5263_s21] sm:$0x33 pattern:$0x75316420] }
  0x14   : > { %v4951_v10 = vld.sshfl [vmem:[%s5263_s21 + $0x4] sm:$0x1 pattern:$0x75316420]  ;;  %v211_v11 = vcombine.high %v4950_v9, %v4950_v9 }
  0x15   : > { %v4952_v12 = vld.sshfl [vmem:[%s5263_s21 + $0x8] sm:$0x33 pattern:$0x75316420]  ;;  %v218_v13 = vrot.slane %v4950_v9, %v5265_v8  ;;  %v241_v14 = vrot.slane %v4951_v10, %v5265_v8 }
  0x16   : > { %v225_v15 = vrot.slane %v211_v11, %v5265_v8  ;;  %v249_v16 = vcombine.high %v4952_v12, %v4952_v12  ;;  %v5274_v17 = vrot.slane %v4952_v12, %v5265_v8  ;;  %v4953_v18 = vld.sshfl [vmem:[%s5263_s21 + $0xc] sm:$0x1 pattern:$0x75316420] }
  0x17   : > { %v4954_v19 = vld.sshfl [vmem:[%s5263_s21 + $0x10] sm:$0x33 pattern:$0x75316420]  ;;  %v5279_v20 = vrot.slane %v4953_v18, %v5265_v8 }
  0x18   : > { %v5282_v21 = vrot.slane %v249_v16, %v5265_v8  ;;  %v264_v22 = vcombine.high %v5274_v17, %v5274_v17  ;;  %v518_v23 = vunpack.i.h.s16 %v5274_v17  ;;  %v4966_v24 = vpack.i.b16 %v5274_v17, %v241_v14  ;;  %v4955_v27 = vld.sshfl [vmem:[%s5263_s21 + $0x14] sm:$0x1 pattern:$0x75316420] }
  0x19   : > { %v618_v25 = vcombine.low %v218_v13, %v225_v15  ;;  %v4986_v26 = vcombine.high %v218_v13, %v225_v15  ;;  %v287_v28 = vcombine.high %v4954_v19, %v4954_v19  ;;  %v5290_v29 = vrot.slane %v4954_v19, %v5265_v8  ;;  %v4956_v34 = vld.sshfl [vmem:[%s5263_s21 + $0x18] sm:$0x33 pattern:$0x75316420]  ;;  %v5202_v18 = vld [vmem:[%s6675_s1 + $0x10] sm:$0xff]  }
  0x1a   : > { %v265_v30 = vcombine.high %v5282_v21, %v5282_v21  ;;  %v520_v31 = vunpack.i.h.s16 %v5282_v21  ;;  %v522_v32 = vunpack.i.h.s16 %v264_v22  ;;  %v4967_v33 = vpack.i.b16 %v5282_v21, %v518_v23  ;;  %v4957_v47 = vld.sshfl [vmem:[%s5263_s21 + $0x1c] sm:$0x1 pattern:$0x75316420] }
  0x1b   : > { %v628_v35 = vrot.slane %v618_v25, %v5265_v8  ;;  %v635_v36 = vrot.slane %v4986_v26, %v5265_v8  ;;  %v5300_v37 = vrot.slane %v287_v28, %v5265_v8  ;;  %v5304_v38 = vcombine.high %v5290_v29, %v5290_v29  ;;  %v4958_v52 = vld.sshfl [vmem:[%s5263_s21 + $0x20] sm:$0x33 pattern:$0x75316420]  ;;  %v5203_v19 = vld [vmem:[%s6675_s1 + $0x18] sm:$0xff]  }
  0x1c   : > { %v4968_v39 = vpack.i.b16 %v264_v22, %v520_v31  ;;  %v4969_v40 = vpack.i.b16 %v265_v30, %v522_v32  ;;  %v620_v41 = vcombine.low %v4966_v24, %v4967_v33  ;;  %v5307_v42 = vrot.slane %v4955_v27, %v5265_v8  ;;  %v4959_v57 = vld.sshfl [vmem:[%s5263_s21 + $0x24] sm:$0x1 pattern:$0x75316420] }
  0x1d   : > { %v650_v43 = vcombine.low %v628_v35, %v635_v36  ;;  %v5311_v44 = vcombine.high %v5300_v37, %v5300_v37  ;;  %v325_v45 = vcombine.high %v4956_v34, %v4956_v34  ;;  %v5314_v46 = vrot.slane %v4956_v34, %v5265_v8  ;;  %v4960_v62 = vld.sshfl [vmem:[%s5263_s21 + $0x28] sm:$0x33 pattern:$0x75316420] }
  0x1e   : > { %v621_v48 = vcombine.low %v4968_v39, %v4969_v40  ;;  %v642_v49 = vrot.slane %v620_v41, %v5265_v8  ;;  %v524_v50 = vunpack.i.h.s16 %v265_v30  ;;  %v668_v51 = vcombine.low %v5300_v37, %v5304_v38  ;;  %v4961_v35 = vld.sshfl [vmem:[%s5263_s21 + $0x2c] sm:$0x1 pattern:$0x75316420] }
  0x1f   : > { %v658_v53 = vrot.slane %v650_v43, %v5265_v8  ;;  %v5323_v54 = vrot.slane %v325_v45, %v5265_v8  ;;  %v5327_v55 = vcombine.high %v5314_v46, %v5314_v46  ;;  %v536_v56 = vunpack.i.h.s16 %v5314_v46  ;;  %v4962_v41 = vld.sshfl [vmem:[%s5263_s21 + $0x30] sm:$0x33 pattern:$0x75316420] }
  0x20   : > { %v649_v58 = vrot.slane %v621_v48, %v5265_v8  ;;  %v4970_v59 = vpack.i.b16 %v5279_v20, %v524_v50  ;;  %v4971_v60 = vpack.i.b16 %v5314_v46, %v5307_v42  ;;  %v684_v61 = vrot.slane %v668_v51, %v5265_v8  ;;  %v4963_v48 = vld.sshfl [vmem:[%s5263_s21 + $0x34] sm:$0x1 pattern:$0x75316420] }
  0x21   : > { %v538_v63 = vunpack.i.h.s16 %v5323_v54  ;;  %v4972_v0 = vpack.i.b16 %v5323_v54, %v536_v56  ;;  %v5341_v1 = vcombine.high %v5323_v54, %v5323_v54  ;;  %v5344_v3 = vrot.slane %v4957_v47, %v5265_v8  ;;  %v4964_v51 = vld.sshfl [vmem:[%s5263_s21 + $0x38] sm:$0x33 pattern:$0x75316420] }
  0x22   : > { %v651_v4 = vcombine.low %v642_v49, %v649_v58  ;;  %v667_v5 = vcombine.low %v4970_v59, %v5290_v29  ;;  %v669_v6 = vcombine.low %v5311_v44, %v4971_v60  ;;  %v363_v7 = vcombine.high %v4958_v52, %v4958_v52 }
  0x23   : > { %v4973_v9 = vpack.i.b16 %v5327_v55, %v538_v63  ;;  %v5350_v10 = vrot.slane %v4958_v52, %v5265_v8  ;;  %v5353_v11 = vrot.slane %v4959_v57, %v5265_v8  ;;  %v401_v12 = vcombine.high %v4960_v62, %v4960_v62 }
  0x24   : > { %v665_v13 = vrot.slane %v651_v4, %v5265_v8  ;;  %v677_v14 = vrot.slane %v667_v5, %v5265_v8  ;;  %v691_v15 = vrot.slane %v669_v6, %v5265_v8  ;;  %v5359_v16 = vrot.slane %v363_v7, %v5265_v8 }
  0x25   : > { %v670_v22 = vcombine.low %v4972_v0, %v4973_v9  ;;  %v5368_v23 = vrot.slane %v4960_v62, %v5265_v8  ;;  %v5371_v24 = vrot.slane %v401_v12, %v5265_v8  ;;  %v540_v25 = vunpack.i.h.s16 %v5327_v55 }
  0x26   : > { %v666_v26 = vcombine.low %v658_v53, %v665_v13  ;;  %v699_v27 = vcombine.low %v677_v14, %v684_v61  ;;  %v542_v28 = vunpack.i.h.s16 %v5341_v1  ;;  %v717_v30 = vcombine.low %v5350_v10, %v5359_v16 }
  0x27   : > { %v698_v31 = vrot.slane %v670_v22, %v5265_v8  ;;  %v554_v32 = vunpack.i.h.s16 %v5368_v23  ;;  %v4974_v33 = vpack.i.b16 %v5341_v1, %v540_v25  ;;  %v4976_v34 = vpack.i.b16 %v5368_v23, %v5353_v11 }
  0x28   : > { %5103 = vmatmul.mubr.msk.bf16.vlgmr.msra.gmra.mrb[0].mxu0 %vm844_vm1, %v666_v26  ;;  %5125 = vmatmul.mubr.msk.bf16.vlgmr.msra.gmra.mrb[0].mxu1 %vm844_vm1, %v666_v26  ;;  %v707_v36 = vrot.slane %v699_v27, %v5265_v8  ;;  %v4975_v39 = vpack.i.b16 %v5344_v3, %v542_v28  ;;  %v4987_v40 = vcombine.high %v5350_v10, %v5359_v16  ;;  %v556_v53 = vunpack.i.h.s16 %v5371_v24 }
  0x29   : > { %5145 = vmatpush3.bf16.msra.mxu0 %v5202_v18  ;;  %5167 = vmatpush3.bf16.msra.mxu1 %v5203_v19  ;;  %v700_v43 = vcombine.low %v691_v15, %v698_v31  ;;  %v4977_v45 = vpack.i.b16 %v5371_v24, %v554_v32  ;;  %v733_v47 = vrot.slane %v717_v30, %v5265_v8  ;;  %v2444_v27 = vunpack.i.h.s16 %v5290_v29 }
  0x2a   : > { %5106 = vmatprep.mubr.msk.bf16.mxu0 %vm5213_vm0, %v5212_v2  ;;  %5128 = vmatprep.mubr.msk.bf16.mxu1 %vm5213_vm0, %v5212_v2  ;;  %v716_v49 = vcombine.low %v4974_v33, %v4975_v39  ;;  %v740_v50 = vrot.slane %v4987_v40, %v5265_v8  ;;  %v416_v52 = vcombine.high %v5368_v23, %v5368_v23  ;;  %v2446_v32 = vunpack.i.h.s16 %v5300_v37 }
  0x2b   : > { %v714_v56 = vrot.slane %v700_v43, %v5265_v8  ;;  %v719_v57 = vcombine.low %v4976_v34, %v4977_v45  ;;  %v417_v58 = vcombine.high %v5371_v24, %v5371_v24  ;;  %v5406_v59 = vrot.slane %v4961_v35, %v5265_v8  ;;  %v4965_v35 = vld.sshfl [vmem:[%s5263_s21 + $0x3c] sm:$0x1 pattern:$0x75316420] }
  0x2c   : > { %v726_v60 = vrot.slane %v716_v49, %v5265_v8  ;;  %v439_v61 = vcombine.high %v4962_v41, %v4962_v41  ;;  %v5410_v62 = vrot.slane %v4962_v41, %v5265_v8  ;;  %v5413_v63 = vrot.slane %v4963_v48, %v5265_v8 }
  0x2d   : > { %v715_v0 = vcombine.low %v707_v36, %v714_v56  ;;  %v747_v4 = vrot.slane %v719_v57, %v5265_v8  ;;  %v5417_v5 = vrot.slane %v4964_v51, %v5265_v8  ;;  %v558_v6 = vunpack.i.h.s16 %v416_v52 }
  0x2e   : > { %v748_v7 = vcombine.low %v726_v60, %v733_v47  ;;  %v5420_v9 = vrot.slane %v439_v61, %v5265_v8  ;;  %v5424_v12 = vcombine.high %v5410_v62, %v5410_v62  ;;  %v560_v13 = vunpack.i.h.s16 %v417_v58 }
  0x2f   : > { %v749_v14 = vcombine.low %v740_v50, %v747_v4  ;;  %v4978_v15 = vpack.i.b16 %v416_v52, %v556_v53  ;;  %v4979_v18 = vpack.i.b16 %v417_v58, %v558_v6  ;;  %v4981_v19 = vpack.i.b16 %v5417_v5, %v5413_v63 }
  0x30   : > { %5107 = vmatmul.mubr.msk.bf16.gmra.mrb[4].mxu0 %vm844_vm1, %v715_v0  ;;  %5129 = vmatmul.mubr.msk.bf16.gmra.mrb[4].mxu1 %vm844_vm1, %v715_v0  ;;  %v756_v22 = vrot.slane %v748_v7, %v5265_v8  ;;  %v5433_v25 = vcombine.high %v5420_v9, %v5420_v9  ;;  %v4980_v26 = vpack.i.b16 %v5406_v59, %v560_v13  ;;  %v572_v43 = vunpack.i.h.s16 %v5417_v5 }
  0x31   : > { %5110 = vmatprep.mubr.msk.bf16.mxu0 %vm5213_vm0, %v5212_v2  ;;  %5132 = vmatprep.mubr.msk.bf16.mxu1 %vm5213_vm0, %v5212_v2  ;;  %v763_v28 = vrot.slane %v749_v14, %v5265_v8  ;;  %v765_v30 = vcombine.low %v4978_v15, %v4979_v18  ;;  %v767_v31 = vcombine.low %v5420_v9, %v5424_v12  ;;  %v2448_v45 = vunpack.i.h.s16 %v5304_v38 }
  0x32   : > { %v766_v33 = vcombine.low %v4980_v26, %v5410_v62  ;;  %v768_v34 = vcombine.low %v5433_v25, %v4981_v19  ;;  %v477_v36 = vcombine.high %v4964_v51, %v4964_v51  ;;  %v5450_v39 = vcombine.high %v5417_v5, %v5417_v5 }
  0x33   : > { %v775_v40 = vrot.slane %v765_v30, %v5265_v8  ;;  %v789_v41 = vrot.slane %v767_v31, %v5265_v8  ;;  %v764_v47 = vcombine.low %v756_v22, %v763_v28  ;;  %v5462_v51 = vrot.slane %v4965_v35, %v5265_v8 }
  0x34   : > { %v782_v48 = vrot.slane %v766_v33, %v5265_v8  ;;  %v796_v49 = vrot.slane %v768_v34, %v5265_v8  ;;  %v5459_v50 = vrot.slane %v477_v36, %v5265_v8  ;;  %v576_v52 = vunpack.i.h.s16 %v5450_v39 }
  0x35   : > { %v5036_v53 = vpack.i.b16 %v5290_v29, %v5279_v20  ;;  %v5037_v56 = vpack.i.b16 %v5300_v37, %v2444_v27  ;;  %v5038_v4 = vpack.i.b16 %v5304_v38, %v2446_v32  ;;  %v5039_v6 = vpack.i.b16 %v5311_v44, %v2448_v45 }
  0x36   : > { %v797_v57 = vcombine.low %v775_v40, %v782_v48  ;;  %v798_v58 = vcombine.low %v789_v41, %v796_v49  ;;  %v5470_v60 = vcombine.high %v5459_v50, %v5459_v50  ;;  %v574_v61 = vunpack.i.h.s16 %v5459_v50 }
  0x37   : > { %v4982_v0 = vpack.i.b16 %v5459_v50, %v572_v43  ;;  %v2545_v13 = vcombine.low %v5274_v17, %v5282_v21  ;;  %v5056_v18 = vcombine.high %v5274_v17, %v5282_v21  ;;  %v2547_v19 = vcombine.low %v5036_v53, %v5037_v56 }
  0x38   : > { %5111 = vmatmul.mubr.msk.bf16.gmra.mrb[8].mxu0 %vm844_vm1, %v764_v47  ;;  %5133 = vmatmul.mubr.msk.bf16.gmra.mrb[8].mxu1 %vm844_vm1, %v764_v47  ;;  %v805_v20 = vrot.slane %v797_v57, %v5265_v8  ;;  %v812_v29 = vrot.slane %v798_v58, %v5265_v8  ;;  %v578_v37 = vunpack.i.h.s16 %v5470_v60  ;;  %v4983_v7 = vpack.i.b16 %v5450_v39, %v574_v61 }
  0x39   : > { %5114 = vmatprep.mubr.msk.bf16.mxu0 %vm5213_vm0, %v5212_v2  ;;  %5136 = vmatprep.mubr.msk.bf16.mxu1 %vm5213_vm0, %v5212_v2  ;;  %v4984_v38 = vpack.i.b16 %v5470_v60, %v576_v52  ;;  %v2548_v26 = vcombine.low %v5038_v4, %v5039_v6  ;;  %v2266_v27 = vcombine.high %v5350_v10, %v5350_v10  ;;  %v2450_v28 = vunpack.i.h.s16 %v5311_v44 }
  0x3a   : > { %v4985_v14 = vpack.i.b16 %v5462_v51, %v578_v37  ;;  %v814_v15 = vcombine.low %v4982_v0, %v4983_v7  ;;  %v813_v22 = vcombine.low %v805_v20, %v812_v29  ;;  %v2462_v32 = vunpack.i.h.s16 %v5350_v10 }
  0x3b   : > { %v2464_v33 = vunpack.i.h.s16 %v5359_v16  ;;  %v2555_v35 = vrot.slane %v2545_v13, %v5265_v8  ;;  %v2562_v17 = vrot.slane %v5056_v18, %v5265_v8  ;;  %v2569_v21 = vrot.slane %v2547_v19, %v5265_v8 }
  0x3c   : > { %v815_v30 = vcombine.low %v4984_v38, %v4985_v14  ;;  %v822_v31 = vrot.slane %v814_v15, %v5265_v8  ;;  %v2576_v36 = vrot.slane %v2548_v26, %v5265_v8  ;;  %v5040_v40 = vpack.i.b16 %v5307_v42, %v2450_v28 }
  0x3d   : > { %v5041_v44 = vpack.i.b16 %v5350_v10, %v5344_v3  ;;  %v2267_v41 = vcombine.high %v5359_v16, %v5359_v16  ;;  %v5042_v45 = vpack.i.b16 %v5359_v16, %v2462_v32  ;;  %v5043_v47 = vpack.i.b16 %v2266_v27, %v2464_v33 }
  0x3e   : > { %v829_v34 = vrot.slane %v815_v30, %v5265_v8  ;;  %v2577_v42 = vcombine.low %v2555_v35, %v2562_v17  ;;  %v2466_v48 = vunpack.i.h.s16 %v2266_v27  ;;  %v2578_v10 = vcombine.low %v2569_v21, %v2576_v36 }
  0x3f   : > { %v2468_v3 = vunpack.i.h.s16 %v2267_v41  ;;  %v2595_v49 = vcombine.low %v5323_v54, %v5327_v55  ;;  %v2480_v52 = vunpack.i.h.s16 %v5410_v62  ;;  %v2594_v16 = vcombine.low %v5040_v40, %v5314_v46 }
  0x40   : > { %5115 = vmatmul.mubr.msk.bf16.gmra.mrb[12].mxu0 %vm844_vm1, %v813_v22  ;;  %5137 = vmatmul.mubr.msk.bf16.gmra.mrb[12].mxu1 %vm844_vm1, %v813_v22  ;;  %v830_v43 = vcombine.low %v822_v31, %v829_v34  ;;  %v2596_v56 = vcombine.low %v5341_v1, %v5041_v44  ;;  %v2597_v57 = vcombine.low %v5042_v45, %v5043_v47  ;;  %v2482_v37 = vunpack.i.h.s16 %v5420_v9  ;;  %v5033_v44 = vld.sshfl [vmem:[%s5263_s21 + $0x44] sm:$0x1 pattern:$0x75316420] }
  0x41   : > { %5118 = vmatprep.mubr.msk.bf16.mxu0 %vm5213_vm0, %v5212_v2  ;;  %5140 = vmatprep.mubr.msk.bf16.mxu1 %vm5213_vm0, %v5212_v2  ;;  %v2585_v58 = vrot.slane %v2577_v42, %v5265_v8  ;;  %v5044_v61 = vpack.i.b16 %v2267_v41, %v2466_v48  ;;  %v5045_v0 = vpack.i.b16 %v5353_v11, %v2468_v3  ;;  %v5032_v11 = vld.sshfl [vmem:[%s5263_s21 + $0x40] sm:$0x33 pattern:$0x75316420]  ;;  %v2484_v13 = vunpack.i.h.s16 %v5424_v12 }
  0x42   : > { %v837_v53 = vrot.slane %v830_v43, %v5265_v8  ;;  %v2592_v4 = vrot.slane %v2578_v10, %v5265_v8  ;;  %v2611_v6 = vrot.slane %v2595_v49, %v5265_v8  ;;  %v5046_v54 = vpack.i.b16 %v5410_v62, %v5406_v59 }
  0x43   : > { %v5047_v55 = vpack.i.b16 %v5420_v9, %v2480_v52  ;;  %v2604_v46 = vrot.slane %v2594_v16, %v5265_v8  ;;  %v2618_v1 = vrot.slane %v2596_v56, %v5265_v8  ;;  %v2625_v20 = vrot.slane %v2597_v57, %v5265_v8 }
  0x44   : > { %v2643_v59 = vcombine.low %v5044_v61, %v5045_v0  ;;  %v2644_v62 = vcombine.low %v5368_v23, %v5371_v24  ;;  %v5057_v29 = vcombine.high %v5368_v23, %v5371_v24  ;;  %v2410_v38 = vrot.slane %v5032_v11, %v5265_v8 }
  0x45   : > { %v2646_v7 = vcombine.low %v5046_v54, %v5047_v55  ;;  %v2486_v14 = vunpack.i.h.s16 %v5433_v25  ;;  %v2593_v15 = vcombine.low %v2585_v58, %v2592_v4  ;;  %v2626_v18 = vcombine.low %v2604_v46, %v2611_v6 }
  0x46   : > { %v2627_v19 = vcombine.low %v2618_v1, %v2625_v20  ;;  %v2403_v22 = vcombine.high %v5032_v11, %v5032_v11  ;;  %v2653_v26 = vrot.slane %v2643_v59, %v5265_v8  ;;  %v2660_v27 = vrot.slane %v2644_v62, %v5265_v8  ;;  %v5072_v20 = vld [vmem:[%s6676_s2] ss:$0 sm:$0xff] }
  0x47   : > { %v2667_v28 = vrot.slane %v5057_v29, %v5265_v8  ;;  %v5048_v23 = vpack.i.b16 %v5424_v12, %v2482_v37  ;;  %v2674_v24 = vrot.slane %v2646_v7, %v5265_v8  ;;  %v5049_v9 = vpack.i.b16 %v5433_v25, %v2484_v13 }
  0x48   : > { %5119 = vmatmul.mubr.msk.bf16.gmra.mrb[16].mxu0 %vm844_vm1, %v837_v53  ;;  %5141 = vmatmul.mubr.msk.bf16.gmra.mrb[16].mxu1 %vm844_vm1, %v837_v53  ;;  %v5050_v30 = vpack.i.b16 %v5413_v63, %v2486_v14  ;;  %v5051_v31 = vpack.i.b16 %v2410_v38, %v5462_v51  ;;  %v2634_v32 = vrot.slane %v2626_v18, %v5265_v8  ;;  %v2498_v45 = vunpack.i.h.s16 %v2410_v38 }
  0x49   : > { %5146 = vmatprep.mubr.msk.bf16.mxu0 %vm5213_vm0, %v5212_v2  ;;  %5168 = vmatprep.mubr.msk.bf16.mxu1 %vm5213_vm0, %v5212_v2  ;;  %v2641_v33 = vrot.slane %v2627_v19, %v5265_v8  ;;  %v2417_v34 = vrot.slane %v2403_v22, %v5265_v8  ;;  %v2675_v63 = vcombine.low %v2653_v26, %v2660_v27 }
  0x4a   : > { %v2694_v12 = vcombine.low %v5459_v50, %v5450_v39  ;;  %v2676_v25 = vcombine.low %v2667_v28, %v2674_v24  ;;  %v2692_v51 = vcombine.low %v5048_v23, %v5049_v9  ;;  %v2693_v35 = vcombine.low %v5050_v30, %v5417_v5 }
  0x4b   : > { %v2695_v17 = vcombine.low %v5470_v60, %v5051_v31  ;;  %v2642_v21 = vcombine.low %v2634_v32, %v2641_v33  ;;  %v2418_v36 = vcombine.high %v2410_v38, %v2410_v38  ;;  %v2419_v40 = vcombine.high %v2417_v34, %v2417_v34 }
  0x4c   : > { %v2683_v41 = vrot.slane %v2675_v63, %v5265_v8  ;;  %v2716_v43 = vrot.slane %v2694_v12, %v5265_v8  ;;  %v2690_v47 = vrot.slane %v2676_v25, %v5265_v8  ;;  %v2702_v42 = vrot.slane %v2692_v51, %v5265_v8 }
  0x4d   : > { %v2709_v39 = vrot.slane %v2693_v35, %v5265_v8  ;;  %v2723_v50 = vrot.slane %v2695_v17, %v5265_v8  ;;  %v2433_v5 = vrot.slane %v5033_v44, %v5265_v8  ;;  %v2500_v60 = vunpack.i.h.s16 %v2417_v34 }
  0x4e   : > { %v2502_v48 = vunpack.i.h.s16 %v2418_v36  ;;  %v2504_v3 = vunpack.i.h.s16 %v2419_v40  ;;  %v2691_v10 = vcombine.low %v2683_v41, %v2690_v47  ;;  %v5052_v53 = vpack.i.b16 %v2417_v34, %v2498_v45 }
  0x4f   : > { %v2724_v49 = vcombine.low %v2702_v42, %v2709_v39  ;;  %v2725_v52 = vcombine.low %v2716_v43, %v2723_v50  ;;  %v5053_v16 = vpack.i.b16 %v2418_v36, %v2500_v60  ;;  %v4093_v11 = vcombine.high %v5072_v20, %v5072_v20 }
  0x50   : > { %5147 = vmatmul.mubr.msk.bf16.vlgmr.msra.gmra.mrb[20].mxu0 %vm844_vm1, %v2593_v15  ;;  %5169 = vmatmul.mubr.msk.bf16.vlgmr.msra.gmra.mrb[20].mxu1 %vm844_vm1, %v2593_v15  ;;  %v5054_v56 = vpack.i.b16 %v2419_v40, %v2502_v48  ;;  %v5055_v57 = vpack.i.b16 %v2433_v5, %v2504_v3  ;;  %v4100_v59 = vrot.slane %v5072_v20, %v5265_v8 }
  0x51   : > { %5150 = vmatprep.mubr.msk.bf16.mxu0 %vm5213_vm0, %v5212_v2  ;;  %5172 = vmatprep.mubr.msk.bf16.mxu1 %vm5213_vm0, %v5212_v2  ;;  %v2739_v58 = vrot.slane %v2725_v52, %v5265_v8  ;;  %v2732_v61 = vrot.slane %v2724_v49, %v5265_v8  ;;  %v2741_v0 = vcombine.low %v5052_v53, %v5053_v16 }
  0x52   : > { %v2742_v4 = vcombine.low %v5054_v56, %v5055_v57  ;;  %v4107_v62 = vrot.slane %v4093_v11, %v5265_v8  ;;  %v4108_v29 = vcombine.high %v4100_v59, %v4100_v59  ;;  %v5606_v7 = vrot.slane %v4100_v59, %v5265_v8 }
  0x53   : > { %v2740_v6 = vcombine.low %v2732_v61, %v2739_v58  ;;  %v2749_v54 = vrot.slane %v2741_v0, %v5265_v8 }
  0x54   : > { %v2756_v55 = vrot.slane %v2742_v4, %v5265_v8  ;;  %v4109_v37 = vcombine.high %v4107_v62, %v4107_v62  ;;  %v5612_v38 = vrot.slane %v4108_v29, %v5265_v8  ;;  %v5621_v9 = vcombine.high %v5606_v7, %v5606_v7 }
  0x56   : > { %v2757_v46 = vcombine.low %v2749_v54, %v2756_v55  ;;  %v5615_v13 = vrot.slane %v4109_v37, %v5265_v8  ;;  %v5629_v31 = vcombine.high %v5612_v38, %v5612_v38 }
  0x58   : > { %5151 = vmatmul.mubr.msk.bf16.gmra.mrb[24].mxu0 %vm844_vm1, %v2642_v21  ;;  %5173 = vmatmul.mubr.msk.bf16.gmra.mrb[24].mxu1 %vm844_vm1, %v2642_v21  ;;  %v2764_v1 = vrot.slane %v2757_v46, %v5265_v8  ;;  %v5633_v32 = vcombine.high %v5615_v13, %v5615_v13 }
  0x59   : > { %5154 = vmatprep.mubr.msk.bf16.mxu0 %vm5213_vm0, %v5212_v2  ;;  %5176 = vmatprep.mubr.msk.bf16.mxu1 %vm5213_vm0, %v5212_v2 }
  0x60   : > { %5155 = vmatmul.mubr.msk.bf16.gmra.mrb[28].mxu0 %vm844_vm1, %v2691_v10  ;;  %5177 = vmatmul.mubr.msk.bf16.gmra.mrb[28].mxu1 %vm844_vm1, %v2691_v10 }
  0x61   : > { %5158 = vmatprep.mubr.msk.bf16.mxu0 %vm5213_vm0, %v5212_v2  ;;  %5180 = vmatprep.mubr.msk.bf16.mxu1 %vm5213_vm0, %v5212_v2 }
  0x68   : > { %5159 = vmatmul.mubr.msk.bf16.gmra.mrb[32].mxu0 %vm844_vm1, %v2740_v6  ;;  %5181 = vmatmul.mubr.msk.bf16.gmra.mrb[32].mxu1 %vm844_vm1, %v2740_v6 }
  0x69   : > { %5162 = vmatprep.mubr.msk.bf16.mxu0 %vm5213_vm0, %v5212_v2  ;;  %5184 = vmatprep.mubr.msk.bf16.mxu1 %vm5213_vm0, %v5212_v2  ;;  %v5609_v2 = vrot.slane %v4107_v62, %v5265_v8  ;;  %vm4878_vm0 = vcmask 125952  }
  0x6b   : > { %v5625_v30 = vcombine.high %v5609_v2, %v5609_v2 }
  0x70   : > { %5163 = vmatmul.mubr.msk.bf16.gmra.mrb[36].mxu0 %vm844_vm1, %v2764_v1  ;;  %5185 = vmatmul.mubr.msk.bf16.gmra.mrb[36].mxu1 %vm844_vm1, %v2764_v1 }
  0xfb   : > { %v894_v14 = vpop.f32.mrb[0].mxu0  ;;  %v1485_v15 = vpop.f32.mrb[0].mxu1 }
  0xfc   : > { %v941_v18 = vcombine.high %v894_v14, %v894_v14  ;;  %v948_v19 = vrot.slane %v894_v14, %v5265_v8  ;;  %v1532_v22 = vcombine.high %v1485_v15, %v1485_v15  ;;  %v1539_v26 = vrot.slane %v1485_v15, %v5265_v8  ;;  %v5104_v27 = vpop.f32.mrb[1].mxu0  ;;  %v5126_v28 = vpop.f32.mrb[1].mxu1 }
  0xfd   : > { %v897_v23 = vpop.f32.mrb[2].mxu0  ;;  %v1488_v24 = vpop.f32.mrb[2].mxu1 }
  0xfe   : > { %v955_v33 = vrot.slane %v941_v18, %v5265_v8  ;;  %v956_v34 = vcombine.high %v948_v19, %v948_v19  ;;  %v5637_v63 = vrot.slane %v948_v19, %v5265_v8  ;;  %v1546_v12 = vrot.slane %v1532_v22, %v5265_v8  ;;  %v5105_v25 = vpop.f32.mrb[3].mxu0  ;;  %v5127_v51 = vpop.f32.mrb[3].mxu1 }
  0xff   : > { %v1547_v35 = vcombine.high %v1539_v26, %v1539_v26  ;;  %v1555_v17 = vrot.slane %v1539_v26, %v5265_v8  ;;  %v990_v21 = vcombine.high %v897_v23, %v897_v23  ;;  %v997_v36 = vrot.slane %v897_v23, %v5265_v8 }
 0x100   : > { %v957_v40 = vcombine.high %v955_v33, %v955_v33  ;;  %v5643_v44 = vrot.slane %v955_v33, %v5265_v8  ;;  %v978_v41 = vrot.slane %v956_v34, %v5265_v8  ;;  %v1548_v45 = vcombine.high %v1546_v12, %v1546_v12 }
 0x101   : > { %v1562_v47 = vrot.slane %v1546_v12, %v5265_v8  ;;  %v5650_v42 = vrot.slane %v1547_v35, %v5265_v8  ;;  %v1577_v39 = vcombine.high %v1555_v17, %v1555_v17  ;;  %v1004_v48 = vrot.slane %v990_v21, %v5265_v8 }
 0x102   : > { %v985_v50 = vrot.slane %v957_v40, %v5265_v8  ;;  %v988_v60 = vcombine.high %v978_v41, %v978_v41  ;;  %v5657_v3 = vrot.slane %v1548_v45, %v5265_v8  ;;  %v1005_v57 = vcombine.high %v997_v36, %v997_v36 }
 0x103   : > { %v1578_v10 = vcombine.high %v1562_v47, %v1562_v47  ;;  %v5661_v52 = vadd.f32 %v1577_v39, %v978_v41  ;;  %v902_v53 = vpop.f32.mrb[4].mxu0  ;;  %v1493_v16 = vpop.f32.mrb[4].mxu1  ;;  %v1006_v58 = vcombine.high %v1004_v48, %v1004_v48  ;;  %v5666_v61 = vrot.slane %v997_v36, %v5265_v8 }
 0x104   : > { %v5663_v56 = vadd.f32 %v1562_v47, %v988_v60  ;;  %v5108_v0 = vpop.f32.mrb[5].mxu0  ;;  %v5130_v4 = vpop.f32.mrb[5].mxu1  ;;  %v5673_v55 = vrot.slane %v1004_v48, %v5265_v8  ;;  %v989_v46 = vcombine.high %v985_v50, %v985_v50  ;;  %v1027_v11 = vrot.slane %v1005_v57, %v5265_v8 }
 0x105   : > { %v5670_v54 = vadd.f32 %v1578_v10, %v985_v50  ;;  %v905_v1 = vpop.f32.mrb[6].mxu0  ;;  %v5675_v20 = vpop.f32.mrb[6].mxu1  ;;  %v1034_v59 = vrot.slane %v1006_v58, %v5265_v8  ;;  %v1581_v29 = vcombine.high %v1488_v24, %v1488_v24  ;;  %v1588_v18 = vrot.slane %v1488_v24, %v5265_v8 }
 0x106   : > { %v5109_v37 = vpop.f32.mrb[7].mxu0  ;;  %v5131_v14 = vpop.f32.mrb[7].mxu1  ;;  %v1039_v19 = vcombine.high %v902_v53, %v902_v53  ;;  %v1046_v22 = vrot.slane %v902_v53, %v5265_v8  ;;  %v1037_v26 = vcombine.high %v1027_v11, %v1027_v11  ;;  %v1630_v23 = vcombine.high %v1493_v16, %v1493_v16 }
 0x107   : > { %v1595_v27 = vrot.slane %v1581_v29, %v5265_v8  ;;  %v1038_v28 = vcombine.high %v1034_v59, %v1034_v59  ;;  %v1596_v33 = vcombine.high %v1588_v18, %v1588_v18  ;;  %v1604_v34 = vrot.slane %v1588_v18, %v5265_v8 }
 0x108   : > { %v1053_v12 = vrot.slane %v1039_v19, %v5265_v8  ;;  %v1054_v25 = vcombine.high %v1046_v22, %v1046_v22  ;;  %v5690_v17 = vrot.slane %v1046_v22, %v5265_v8  ;;  %v1637_v24 = vrot.slane %v1493_v16, %v5265_v8 }
 0x109   : > { %v1597_v51 = vcombine.high %v1595_v27, %v1595_v27  ;;  %v1611_v35 = vrot.slane %v1595_v27, %v5265_v8  ;;  %v5694_v21 = vrot.slane %v1596_v33, %v5265_v8  ;;  %v1626_v36 = vcombine.high %v1604_v34, %v1604_v34 }
 0x10a   : > { %v5696_v40 = vadd.f32 %v1604_v34, %v989_v46  ;;  %v1055_v41 = vcombine.high %v1053_v12, %v1053_v12  ;;  %v5708_v48 = vrot.slane %v1053_v12, %v5265_v8  ;;  %v1076_v58 = vrot.slane %v1054_v25, %v5265_v8 }
 0x10b   : > { %v5698_v45 = vpop.f32.mrb[8].mxu0  ;;  %v5700_v47 = vpop.f32.mrb[8].mxu1  ;;  %v5703_v39 = vrot.slane %v1597_v51, %v5265_v8  ;;  %v1627_v50 = vcombine.high %v1611_v35, %v1611_v35  ;;  %v5705_v60 = vadd.f32 %v1611_v35, %v1037_v26  ;;  %v5712_v57 = vadd.f32 %v1626_v36, %v1027_v11 }
 0x10c   : > { %v5112_v10 = vpop.f32.mrb[9].mxu0  ;;  %v5134_v53 = vpop.f32.mrb[9].mxu1  ;;  %v1083_v0 = vrot.slane %v1055_v41, %v5265_v8  ;;  %v1086_v22 = vcombine.high %v1076_v58, %v1076_v58  ;;  %v1644_v26 = vrot.slane %v1630_v23, %v5265_v8  ;;  %v1645_v27 = vcombine.high %v1637_v24, %v1637_v24 }
 0x10d   : > { %v5716_v4 = vpop.f32.mrb[10].mxu0  ;;  %v5718_v46 = vpop.f32.mrb[10].mxu1  ;;  %v5722_v37 = vadd.f32 %v1627_v50, %v1034_v59  ;;  %v1653_v33 = vrot.slane %v1637_v24, %v5265_v8  ;;  %v1088_v34 = vcombine.high %v905_v1, %v905_v1  ;;  %v5731_v12 = vrot.slane %v905_v1, %v5265_v8 }
 0x10e   : > { %v5113_v18 = vpop.f32.mrb[11].mxu0  ;;  %v5135_v19 = vpop.f32.mrb[11].mxu1  ;;  %v1087_v59 = vcombine.high %v1083_v0, %v1083_v0  ;;  %v1678_v25 = vcombine.high %v5675_v20, %v5675_v20  ;;  %v1646_v51 = vcombine.high %v1644_v26, %v1644_v26  ;;  %v1660_v35 = vrot.slane %v1644_v26, %v5265_v8 }
 0x10f   : > { %6722 = vst [vmem:[#allocation2_spill] sm:$0xff] %v5731_v12  ;;  %v5737_v36 = vrot.slane %v1645_v27, %v5265_v8  ;;  %v5739_v41 = vadd.f32 %v1653_v33, %v1038_v28  ;;  %v1102_v23 = vrot.slane %v1088_v34, %v5265_v8  ;;  %v1103_v24 = vcombine.high %v5731_v12, %v5731_v12 }
 0x110   : > { %v1685_v50 = vrot.slane %v5675_v20, %v5265_v8  ;;  %v5749_v10 = vrot.slane %v1646_v51, %v5265_v8  ;;  %v1675_v53 = vcombine.high %v1660_v35, %v1660_v35  ;;  %v5753_v28 = vadd.f32 %v1660_v35, %v1086_v22 }
 0x111   : > { %v1104_v26 = vcombine.high %v1102_v23, %v1102_v23  ;;  %v5760_v27 = vrot.slane %v1102_v23, %v5265_v8  ;;  %v1125_v33 = vrot.slane %v1103_v24, %v5265_v8  ;;  %v1692_v20 = vrot.slane %v1678_v25, %v5265_v8 }
 0x112   : > { %v5766_v11 = vadd.f32 %v1675_v53, %v1083_v0  ;;  %v1693_v22 = vcombine.high %v1685_v50, %v1685_v50  ;;  %v1701_v35 = vrot.slane %v1685_v50, %v5265_v8  ;;  %v1143_v24 = vrot.slane %v5698_v45, %v5265_v8 }
 0x113   : > { %v5755_v18 = vpop.f32.mrb[12].mxu0  ;;  %v5757_v19 = vpop.f32.mrb[12].mxu1  ;;  %6723 = vst [vmem:[#allocation3_spill] sm:$0xff] %v5760_v27  ;;  %v1132_v23 = vrot.slane %v1104_v26, %v5265_v8  ;;  %v1134_v25 = vcombine.high %v1125_v33, %v1125_v33  ;;  %v1708_v1 = vrot.slane %v1692_v20, %v5265_v8  ;;  %v1136_v26 = vcombine.high %v5698_v45, %v5698_v45 }
 0x114   : > { %v5116_v34 = vpop.f32.mrb[13].mxu0  ;;  %v5138_v51 = vpop.f32.mrb[13].mxu1  ;;  %v5778_v0 = vrot.slane %v1693_v22, %v5265_v8  ;;  %v1723_v53 = vcombine.high %v1701_v35, %v1701_v35  ;;  %v5780_v50 = vadd.f32 %v1701_v35, %v1087_v59  ;;  %v1726_v22 = vcombine.high %v5700_v47, %v5700_v47 }
 0x115   : > { %v5769_v58 = vpop.f32.mrb[14].mxu0  ;;  %v5771_v14 = vpop.f32.mrb[14].mxu1  ;;  %v1694_v34 = vcombine.high %v1692_v20, %v1692_v20  ;;  %v1135_v16 = vcombine.high %v1132_v23, %v1132_v23  ;;  %v5791_v20 = vadd.f32 %v1708_v1, %v1134_v25  ;;  %v1150_v35 = vrot.slane %v1136_v26, %v5265_v8 }
 0x116   : > { %v5117_v51 = vpop.f32.mrb[15].mxu0  ;;  %v5139_v29 = vpop.f32.mrb[15].mxu1  ;;  %6724 = vst [vmem:[#allocation4_spill] sm:$0xff] %v5778_v0  ;;  %6725 = vst [vmem:[#allocation5_spill] sm:$0xff] %v5780_v50  ;;  %v5799_v62 = vrot.slane %v1143_v24, %v5265_v8  ;;  %v1733_v45 = vrot.slane %v5700_v47, %v5265_v8 }
 0x117   : > { %v5783_v15 = vrot.slane %v1694_v34, %v5265_v8  ;;  %v1724_v51 = vcombine.high %v1708_v1, %v1708_v1  ;;  %v5789_v29 = vadd.f32 %v1723_v53, %v1125_v33  ;;  %6728 = vst [vmem:[#allocation8_spill] sm:$0xff] %v5791_v20  ;;  %v1151_v34 = vcombine.high %v1143_v24, %v1143_v24 }
 0x118   : > { %6729 = vst [vmem:[#allocation9_spill] sm:$0xff] %v5799_v62  ;;  %v1740_v1 = vrot.slane %v1726_v22, %v5265_v8  ;;  %v1184_v33 = vcombine.high %v5716_v4, %v5716_v4  ;;  %v1152_v59 = vcombine.high %v1150_v35, %v1150_v35  ;;  %v5813_v26 = vrot.slane %v1150_v35, %v5265_v8 }
 0x119   : > { %6726 = vst [vmem:[#allocation6_spill] sm:$0xff] %v5783_v15  ;;  %6727 = vst [vmem:[#allocation7_spill] sm:$0xff] %v5789_v29  ;;  %v5801_v6 = vadd.f32 %v1724_v51, %v1132_v23  ;;  %v1173_v24 = vrot.slane %v1151_v34, %v5265_v8  ;;  %v1741_v5 = vcombine.high %v1733_v45, %v1733_v45 }
 0x11a   : > { %6731 = vst [vmem:[#allocation11_spill] sm:$0xff] %v5813_v26  ;;  %v1742_v22 = vcombine.high %v1740_v1, %v1740_v1  ;;  %v1749_v49 = vrot.slane %v1733_v45, %v5265_v8  ;;  %v1756_v43 = vrot.slane %v1740_v1, %v5265_v8  ;;  %v1191_v34 = vrot.slane %v5716_v4, %v5265_v8 }
 0x11b   : > { %6730 = vst [vmem:[#allocation10_spill] sm:$0xff] %v5801_v6  ;;  %v5808_v25 = vpop.f32.mrb[16].mxu0  ;;  %v5810_v53 = vpop.f32.mrb[16].mxu1  ;;  %v1180_v6 = vrot.slane %v1152_v59, %v5265_v8  ;;  %v1198_v23 = vrot.slane %v1184_v33, %v5265_v8  ;;  %v5827_v62 = vrot.slane %v1741_v5, %v5265_v8 }
 0x11c   : > { %v5120_v51 = vpop.f32.mrb[17].mxu0  ;;  %v5142_v47 = vpop.f32.mrb[17].mxu1  ;;  %v5830_v45 = vrot.slane %v1742_v22, %v5265_v8  ;;  %v5832_v1 = vadd.f32 %v1749_v49, %v1135_v16  ;;  %v1199_v59 = vcombine.high %v1191_v34, %v1191_v34  ;;  %v5835_v35 = vrot.slane %v1191_v34, %v5265_v8 }
 0x11d   : > { %v929_v20 = vpop.f32.mrb[18].mxu0  ;;  %v1520_v50 = vpop.f32.mrb[18].mxu1  ;;  %6732 = vst [vmem:[#allocation12_spill] sm:$0xff] %v5827_v62  ;;  %v1200_v29 = vcombine.high %v1198_v23, %v1198_v23  ;;  %v5846_v22 = vrot.slane %v1198_v23, %v5265_v8  ;;  %v1183_v34 = vcombine.high %v1180_v6, %v1180_v6 }
 0x11e   : > { %v5121_v51 = vpop.f32.mrb[19].mxu0  ;;  %v5143_v47 = vpop.f32.mrb[19].mxu1  ;;  %6733 = vst [vmem:[#allocation13_spill] sm:$0xff] %v5830_v45  ;;  %v1771_v20 = vcombine.high %v1749_v49, %v1749_v49  ;;  %v1772_v50 = vcombine.high %v1756_v43, %v1756_v43  ;;  %6734 = vst [vmem:[#allocation14_spill] sm:$0xff] %v5832_v1  ;;  %v1221_v43 = vrot.slane %v1199_v59, %v5265_v8 }
 0x11f   : > { %6735 = vst [vmem:[#allocation15_spill] sm:$0xff] %v5835_v35  ;;  %6738 = vst [vmem:[#allocation18_spill] sm:$0xff] %v5846_v22  ;;  %v5850_v49 = vrot.slane %v1200_v29, %v5265_v8  ;;  %v1775_v47 = vcombine.high %v5718_v46, %v5718_v46 }
 0x120   : > { %v5841_v5 = vadd.f32 %v1771_v20, %v1173_v24  ;;  %v5843_v51 = vadd.f32 %v1772_v50, %v1180_v6  ;;  %v1782_v24 = vrot.slane %v5718_v46, %v5265_v8  ;;  %v1233_v20 = vcombine.high %v5755_v18, %v5755_v18 }
 0x121   : > { %v1231_v59 = vcombine.high %v1221_v43, %v1221_v43  ;;  %v1240_v6 = vrot.slane %v5755_v18, %v5265_v8  ;;  %v1232_v16 = vcombine.high %v5850_v49, %v5850_v49  ;;  %v1789_v46 = vrot.slane %v1775_v47, %v5265_v8 }
 0x122   : > { %6736 = vst [vmem:[#allocation16_spill] sm:$0xff] %v5841_v5  ;;  %6737 = vst [vmem:[#allocation17_spill] sm:$0xff] %v5843_v51  ;;  %v1790_v1 = vcombine.high %v1782_v24, %v1782_v24  ;;  %v1798_v35 = vrot.slane %v1782_v24, %v5265_v8  ;;  %v1247_v51 = vrot.slane %v1233_v20, %v5265_v8 }
 0x123   : > { %v5860_v23 = vpop.f32.mrb[20].mxu0  ;;  %v5862_v50 = vpop.f32.mrb[20].mxu1  ;;  %v1248_v29 = vcombine.high %v1240_v6, %v1240_v6  ;;  %v5878_v22 = vrot.slane %v1240_v6, %v5265_v8  ;;  %v1824_v18 = vcombine.high %v5757_v19, %v5757_v19  ;;  %v1791_v26 = vcombine.high %v1789_v46, %v1789_v46 }
 0x124   : > { %v5148_v33 = vpop.f32.mrb[21].mxu0  ;;  %v5170_v4 = vpop.f32.mrb[21].mxu1  ;;  %v1805_v24 = vrot.slane %v1789_v46, %v5265_v8  ;;  %v5886_v20 = vrot.slane %v1790_v1, %v5265_v8  ;;  %v1820_v62 = vcombine.high %v1798_v35, %v1798_v35  ;;  %v5888_v15 = vadd.f32 %v1798_v35, %v1183_v34 }
 0x125   : > { %v5873_v5 = vpop.f32.mrb[22].mxu0  ;;  %v5875_v45 = vpop.f32.mrb[22].mxu1  ;;  %6739 = vst [vmem:[#allocation19_spill] sm:$0xff] %v5878_v22  ;;  %v1831_v4 = vrot.slane %v5757_v19, %v5265_v8  ;;  %v1249_v27 = vcombine.high %v1247_v51, %v1247_v51  ;;  %v5891_v6 = vrot.slane %v1247_v51, %v5265_v8  ;;  %v1270_v0 = vrot.slane %v1248_v29, %v5265_v8 }
 0x126   : > { %v5149_v33 = vpop.f32.mrb[23].mxu0  ;;  %v5171_v47 = vpop.f32.mrb[23].mxu1  ;;  %6740 = vst [vmem:[#allocation20_spill] sm:$0xff] %v5886_v20  ;;  %6741 = vst [vmem:[#allocation21_spill] sm:$0xff] %v5888_v15  ;;  %v5895_v12 = vrot.slane %v1791_v26, %v5265_v8  ;;  %v1821_v19 = vcombine.high %v1805_v24, %v1805_v24  ;;  %v5899_v46 = vadd.f32 %v1820_v62, %v1221_v43 }
 0x127   : > { %6742 = vst [vmem:[#allocation22_spill] sm:$0xff] %v5891_v6  ;;  %v5901_v1 = vadd.f32 %v1805_v24, %v1231_v59  ;;  %v1277_v35 = vrot.slane %v1249_v27, %v5265_v8  ;;  %v1280_v47 = vcombine.high %v1270_v0, %v1270_v0  ;;  %v1838_v62 = vrot.slane %v1824_v18, %v5265_v8 }
 0x128   : > { %6743 = vst [vmem:[#allocation23_spill] sm:$0xff] %v5895_v12  ;;  %6744 = vst [vmem:[#allocation24_spill] sm:$0xff] %v5899_v46  ;;  %v5911_v29 = vadd.f32 %v1821_v19, %v5850_v49  ;;  %v1839_v27 = vcombine.high %v1831_v4, %v1831_v4  ;;  %v1847_v24 = vrot.slane %v1831_v4, %v5265_v8 }
 0x129   : > { %6745 = vst [vmem:[#allocation25_spill] sm:$0xff] %v5901_v1  ;;  %v1282_v34 = vcombine.high %v5769_v58, %v5769_v58  ;;  %v1289_v51 = vrot.slane %v5769_v58, %v5265_v8  ;;  %v1840_v49 = vcombine.high %v1838_v62, %v1838_v62  ;;  %v1854_v19 = vrot.slane %v1838_v62, %v5265_v8 }
 0x12a   : > { %6746 = vst [vmem:[#allocation26_spill] sm:$0xff] %v5911_v29  ;;  %v1281_v6 = vcombine.high %v1277_v35, %v1277_v35  ;;  %v1872_v18 = vcombine.high %v5771_v14, %v5771_v14  ;;  %v5931_v4 = vrot.slane %v1839_v27, %v5265_v8  ;;  %v1869_v15 = vcombine.high %v1847_v24, %v1847_v24 }
 0x12b   : > { %v5914_v43 = vpop.f32.mrb[24].mxu0  ;;  %v5916_v59 = vpop.f32.mrb[24].mxu1  ;;  %v5933_v29 = vadd.f32 %v1847_v24, %v1232_v16  ;;  %v5936_v58 = vrot.slane %v1282_v34, %v5265_v8  ;;  %v5939_v35 = vrot.slane %v1840_v49, %v5265_v8  ;;  %v5941_v62 = vadd.f32 %v1854_v19, %v1280_v47 }
 0x12c   : > { %v5152_v26 = vpop.f32.mrb[25].mxu0  ;;  %v5174_v33 = vpop.f32.mrb[25].mxu1  ;;  %6747 = vst [vmem:[#allocation27_spill] sm:$0xff] %v5931_v4  ;;  %v1297_v46 = vcombine.high %v1289_v51, %v1289_v51  ;;  %v5944_v12 = vrot.slane %v1289_v51, %v5265_v8  ;;  %v5948_v20 = vadd.f32 %v1869_v15, %v1270_v0  ;;  %v1879_v49 = vrot.slane %v5771_v14, %v5265_v8 }
 0x12d   : > { %v5926_v22 = vpop.f32.mrb[26].mxu0  ;;  %v5928_v1 = vpop.f32.mrb[26].mxu1  ;;  %6748 = vst [vmem:[#allocation28_spill] sm:$0xff] %v5933_v29  ;;  %6749 = vst [vmem:[#allocation29_spill] sm:$0xff] %v5936_v58  ;;  %v1298_v16 = vcombine.high %v5936_v58, %v5936_v58  ;;  %v1886_v0 = vrot.slane %v1872_v18, %v5265_v8  ;;  %v1330_v19 = vcombine.high %v5808_v25, %v5808_v25 }
 0x12e   : > { %v5153_v33 = vpop.f32.mrb[27].mxu0  ;;  %v5175_v26 = vpop.f32.mrb[27].mxu1  ;;  %6750 = vst [vmem:[#allocation30_spill] sm:$0xff] %v5939_v35  ;;  %6751 = vst [vmem:[#allocation31_spill] sm:$0xff] %v5941_v62  ;;  %v1319_v47 = vrot.slane %v1297_v46, %v5265_v8  ;;  %v1887_v34 = vcombine.high %v1879_v49, %v1879_v49  ;;  %v1895_v46 = vrot.slane %v1879_v49, %v5265_v8 }
 0x12f   : > { %6752 = vst [vmem:[#allocation32_spill] sm:$0xff] %v5944_v12  ;;  %6753 = vst [vmem:[#allocation33_spill] sm:$0xff] %v5948_v20  ;;  %v1326_v15 = vrot.slane %v1298_v16, %v5265_v8  ;;  %v1337_v33 = vrot.slane %v5808_v25, %v5265_v8  ;;  %v1920_v51 = vcombine.high %v5810_v53, %v5810_v53 }
 0x130   : > { %v1328_v26 = vcombine.high %v1319_v47, %v1319_v47  ;;  %v1888_v16 = vcombine.high %v1886_v0, %v1886_v0  ;;  %v1902_v18 = vrot.slane %v1886_v0, %v5265_v8  ;;  %v1344_v27 = vrot.slane %v1330_v19, %v5265_v8 }
 0x131   : > { %v1345_v58 = vcombine.high %v1337_v33, %v1337_v33  ;;  %v5977_v25 = vrot.slane %v1887_v34, %v5265_v8  ;;  %v1917_v62 = vcombine.high %v1895_v46, %v1895_v46  ;;  %v5979_v49 = vadd.f32 %v1895_v46, %v1281_v6 }
 0x132   : > { %v5982_v20 = vrot.slane %v1337_v33, %v5265_v8  ;;  %v5989_v0 = vrot.slane %v1888_v16, %v5265_v8  ;;  %v1918_v19 = vcombine.high %v1902_v18, %v1902_v18  ;;  %v5998_v33 = vrot.slane %v1344_v27, %v5265_v8 }
 0x133   : > { %v5970_v24 = vpop.f32.mrb[28].mxu0  ;;  %v5972_v14 = vpop.f32.mrb[28].mxu1  ;;  %6755 = vst [vmem:[#allocation35_spill] sm:$0xff] %v5977_v25  ;;  %6756 = vst [vmem:[#allocation36_spill] sm:$0xff] %v5979_v49  ;;  %v5995_v46 = vadd.f32 %v1917_v62, %v1319_v47  ;;  %v1367_v49 = vrot.slane %v1345_v58, %v5265_v8  ;;  %v1927_v62 = vrot.slane %v5810_v53, %v5265_v8 }
 0x134   : > { %6754 = vst [vmem:[#allocation34_spill] sm:$0xff] %v5972_v14  ;;  %v5156_v29 = vpop.f32.mrb[29].mxu0  ;;  %v5178_v12 = vpop.f32.mrb[29].mxu1  ;;  %6757 = vst [vmem:[#allocation37_spill] sm:$0xff] %v5982_v20  ;;  %v5991_v14 = vadd.f32 %v1902_v18, %v1328_v26  ;;  %v1329_v18 = vcombine.high %v1326_v15, %v1326_v15  ;;  %v2033_v58 = vadd.f32 %v5650_v42, %v5637_v63 }
 0x135   : > { %v5984_v35 = vpop.f32.mrb[30].mxu0  ;;  %v5986_v4 = vpop.f32.mrb[30].mxu1  ;;  %6759 = vst [vmem:[#allocation39_spill] sm:$0xff] %v5989_v0  ;;  %v1346_v12 = vcombine.high %v1344_v27, %v1344_v27  ;;  %6761 = vst [vmem:[#allocation41_spill] sm:$0xff] %v5995_v46  ;;  %v1934_v27 = vrot.slane %v1920_v51, %v5265_v8  ;;  %v6764_v47 = vcombine.high %v5637_v63, %v5637_v63 }
 0x136   : > { %6758 = vst [vmem:[#allocation38_spill] sm:$0xff] %v5986_v4  ;;  %6760 = vst [vmem:[#allocation40_spill] sm:$0xff] %v5991_v14  ;;  %v5157_v29 = vpop.f32.mrb[31].mxu0  ;;  %v5179_v34 = vpop.f32.mrb[31].mxu1  ;;  %v6001_v4 = vadd.f32 %v1918_v19, %v1326_v15  ;;  %v6765_v19 = vcombine.high %v5650_v42, %v5650_v42  ;;  %v2037_v15 = vadd.f32 %v5657_v3, %v5643_v44 }
 0x137   : > { %6762 = vst [vmem:[#allocation42_spill] sm:$0xff] %v5998_v33  ;;  %v1374_v16 = vrot.slane %v1346_v12, %v5265_v8  ;;  %v1377_v34 = vcombine.high %v1367_v49, %v1367_v49  ;;  %v6766_v29 = vcombine.high %v5643_v44, %v5643_v44  ;;  %v6767_v53 = vcombine.high %v5657_v3, %v5657_v3 }
 0x138   : > { %6763 = vst [vmem:[#allocation43_spill] sm:$0xff] %v6001_v4  ;;  %v2035_v12 = vadd.f32 %v6765_v19, %v6764_v47  ;;  %v1935_v26 = vcombine.high %v1927_v62, %v1927_v62  ;;  %v1936_v6 = vcombine.high %v1934_v27, %v1934_v27  ;;  %v1943_v33 = vrot.slane %v1927_v62, %v5265_v8 }
 0x139   : > { %v2039_v51 = vadd.f32 %v6767_v53, %v6766_v29  ;;  %v1950_v63 = vrot.slane %v1934_v27, %v5265_v8  ;;  %v2867_v42 = vcombine.high %v5860_v23, %v5860_v23  ;;  %v2874_v47 = vrot.slane %v5860_v23, %v5265_v8 }
 0x13a   : > { %v3522_v19 = vcombine.high %v5862_v50, %v5862_v50  ;;  %v3529_v44 = vrot.slane %v5862_v50, %v5265_v8  ;;  %v6038_v3 = vrot.slane %v1935_v26, %v5265_v8  ;;  %v6041_v29 = vrot.slane %v1936_v6, %v5265_v8 }
 0x13b   : > { %v1965_v62 = vcombine.high %v1943_v33, %v1943_v33  ;;  %v1966_v27 = vcombine.high %v1950_v63, %v1950_v63  ;;  %v6043_v53 = vadd.f32 %v1943_v33, %v1329_v18  ;;  %v6045_v20 = vadd.f32 %v1950_v63, %v1377_v34 }
 0x13c   : > { %6768 = vst [vmem:[#allocation44_spill] sm:$0xff] %v6038_v3  ;;  %6769 = vst [vmem:[#allocation45_spill] sm:$0xff] %v6041_v29  ;;  %v2881_v23 = vrot.slane %v2867_v42, %v5265_v8  ;;  %v2882_v14 = vcombine.high %v2874_v47, %v2874_v47  ;;  %v2890_v0 = vrot.slane %v2874_v47, %v5265_v8 }
 0x13d   : > { %6770 = vst [vmem:[#allocation46_spill] sm:$0xff] %v6043_v53  ;;  %6771 = vst [vmem:[#allocation47_spill] sm:$0xff] %v6045_v20  ;;  %v6052_v26 = vadd.f32 %v1965_v62, %v1367_v49  ;;  %v6054_v46 = vadd.f32 %v1966_v27, %v1374_v16  ;;  %v3536_v34 = vrot.slane %v3522_v19, %v5265_v8 }
 0x13e   : > { %v2883_v6 = vcombine.high %v2881_v23, %v2881_v23  ;;  %v2897_v33 = vrot.slane %v2881_v23, %v5265_v8  ;;  %v2904_v18 = vrot.slane %v2882_v14, %v5265_v8  ;;  %v3537_v63 = vcombine.high %v3529_v44, %v3529_v44 }
 0x13f   : > { %6772 = vst [vmem:[#allocation48_spill] sm:$0xff] %v6052_v26  ;;  %6773 = vst [vmem:[#allocation49_spill] sm:$0xff] %v6054_v46  ;;  %v3545_v42 = vrot.slane %v3529_v44, %v5265_v8  ;;  %v6774_v4 = vcombine.high %v5666_v61, %v5666_v61  ;;  %v6775_v49 = vcombine.high %v5694_v21, %v5694_v21 }
 0x140   : > { %v6070_v62 = vrot.slane %v2883_v6, %v5265_v8  ;;  %v2912_v47 = vcombine.high %v2890_v0, %v2890_v0  ;;  %v2913_v27 = vcombine.high %v2897_v33, %v2897_v33  ;;  %v2914_v23 = vcombine.high %v2904_v18, %v2904_v18 }
 0x141   : > { %v6067_v16 = vadd.f32 %v6775_v49, %v6774_v4  ;;  %v3368_v14 = vadd.f32 %v2890_v0, %v2033_v58  ;;  %v3369_v19 = vadd.f32 %v2904_v18, %v5661_v52  ;;  %v3372_v50 = vadd.f32 %v2897_v33, %v2037_v15  ;;  %v6076_v4 = vpop.f32.mrb[32].mxu0  ;;  %v6078_v49 = vpop.f32.mrb[32].mxu1 }
 0x142   : > { %v3538_v20 = vcombine.high %v3536_v34, %v3536_v34  ;;  %v3370_v44 = vadd.f32 %v2912_v47, %v2035_v12  ;;  %v3373_v61 = vadd.f32 %v6070_v62, %v5670_v54  ;;  %v3374_v53 = vadd.f32 %v2913_v27, %v2039_v51  ;;  %v5160_v58 = vpop.f32.mrb[33].mxu0  ;;  %v5182_v15 = vpop.f32.mrb[33].mxu1 }
 0x143   : > { %v3371_v21 = vadd.f32 %v2914_v23, %v5663_v56  ;;  %v3552_v6 = vrot.slane %v3536_v34, %v5265_v8  ;;  %v3559_v46 = vrot.slane %v3537_v63, %v5265_v8  ;;  %v3567_v52 = vcombine.high %v3545_v42, %v3545_v42 }
 0x144   : > { %v3566_v0 = vrot.slane %v3538_v20, %v5265_v8  ;;  %v2044_v12 = vadd.f32 %v5703_v39, %v5673_v55  ;;  %v6776_v54 = vcombine.high %v5673_v55, %v5673_v55  ;;  %v6777_v56 = vcombine.high %v5703_v39, %v5703_v39 }
 0x145   : > { %v2916_v33 = vcombine.high %v5873_v5, %v5873_v5  ;;  %v2923_v18 = vrot.slane %v5873_v5, %v5265_v8  ;;  %v3568_v20 = vcombine.high %v3552_v6, %v3552_v6  ;;  %v3569_v34 = vcombine.high %v3559_v46, %v3559_v46 }
 0x146   : > { %v2046_v51 = vadd.f32 %v6777_v56, %v6776_v54  ;;  %v3570_v63 = vcombine.high %v3566_v0, %v3566_v0  ;;  %v4023_v42 = vadd.f32 %v3559_v46, %v3368_v14  ;;  %v4024_v47 = vadd.f32 %v3567_v52, %v3369_v19 }
 0x147   : > { %v4026_v27 = vadd.f32 %v3552_v6, %v3371_v21  ;;  %v4027_v23 = vadd.f32 %v3566_v0, %v3372_v50  ;;  %v2930_v58 = vrot.slane %v2916_v33, %v5265_v8  ;;  %v4025_v55 = vadd.f32 %v3569_v34, %v3370_v44 }
 0x148   : > { %v4028_v15 = vadd.f32 %v3568_v20, %v3373_v61  ;;  %v4029_v26 = vadd.f32 %v3570_v63, %v3374_v53  ;;  %v4150_v39 = vadd.f32 %v5606_v7, %v4023_v42  ;;  %v4151_v54 = vadd.f32 %v5612_v38, %v4024_v47 }
 0x149   : > { %v4153_v56 = vadd.f32 %v5629_v31, %v4026_v27  ;;  %v4154_v5 = vadd.f32 %v5609_v2, %v4027_v23  ;;  %v2931_v29 = vcombine.high %v2923_v18, %v2923_v18  ;;  %v4152_v3 = vadd.f32 %v5621_v9, %v4025_v55 }
 0x14a   : > { %v4155_v46 = vadd.f32 %v5615_v13, %v4028_v15  ;;  %v4156_v50 = vadd.f32 %v5625_v30, %v4029_v26  ;;  %vm4214_vm2 = vcmp.ge.f32.partialorder %v4150_v39, 0.0  ;;  %vm4215_vm3 = vcmp.ge.f32.partialorder %v4151_v54, 0.0 }
 0x14b   : > { %vm4217_vm4 = vcmp.ge.f32.partialorder %v4153_v56, 0.0  ;;  %vm4218_vm5 = vcmp.ge.f32.partialorder %v4154_v5, 0.0  ;;  %v4278_v53 = vmul.f32 0.01, %v4150_v39  ;;  %vm4216_vm6 = vcmp.ge.f32.partialorder %v4152_v3, 0.0 }
 0x14c   : > { %vm4219_vm7 = vcmp.ge.f32.partialorder %v4155_v46, 0.0  ;;  %v4279_v14 = vmul.f32 0.01, %v4151_v54  ;;  %v4280_v19 = vmul.f32 0.01, %v4152_v3  ;;  %v2932_v20 = vcombine.high %v2930_v58, %v2930_v58 }
 0x14d   : > { %v4281_v44 = vmul.f32 0.01, %v4153_v56  ;;  %v4282_v61 = vmul.f32 0.01, %v4154_v5  ;;  %v4283_v21 = vmul.f32 0.01, %v4155_v46  ;;  %v4342_v6 = vsel %vm4214_vm2, %v4150_v39, %v4278_v53 }
 0x14e   : > { %v4284_v0 = vmul.f32 0.01, %v4156_v50  ;;  %v4343_v52 = vsel %vm4215_vm3, %v4151_v54, %v4279_v14  ;;  %v4344_v33 = vsel %vm4216_vm6, %v4152_v3, %v4280_v19  ;;  %v2939_v23 = vrot.slane %v2923_v18, %v5265_v8 }
 0x14f   : > { %v4345_v34 = vsel %vm4217_vm4, %v4153_v56, %v4281_v44  ;;  %v4346_v63 = vsel %vm4218_vm5, %v4154_v5, %v4282_v61  ;;  %v4347_v26 = vsel %vm4219_vm7, %v4155_v46, %v4283_v21  ;;  %v4470_v42 = vcombine.low %v4342_v6, %v4343_v52 }
 0x150   : > { %v4471_v47 = vcombine.low %v4344_v33, %v4345_v34  ;;  %v4472_v27 = vcombine.low %v4346_v63, %v4347_v26  ;;  %v2946_v55 = vrot.slane %v2930_v58, %v5265_v8  ;;  %v2953_v25 = vrot.slane %v2931_v29, %v5265_v8 }
 0x151   : > { %v4480_v15 = vrot.slane %v4470_v42, %v5265_v8  ;;  %v6108_v39 = vrot.slane %v2932_v20, %v5265_v8  ;;  %v2915_v3 = vcombine.high %v6070_v62, %v6070_v62  ;;  %v2961_v56 = vcombine.high %v2939_v23, %v2939_v23 }
 0x152   : > { %v4487_v54 = vrot.slane %v4471_v47, %v5265_v8  ;;  %v2962_v5 = vcombine.high %v2946_v55, %v2946_v55  ;;  %v3379_v46 = vadd.f32 %v2946_v55, %v2044_v12  ;;  %v2963_v53 = vcombine.high %v2953_v25, %v2953_v25  ;;  %v6163_v47 = vpop.f32.mrb[34].mxu0 }
 0x153   : > { %v3376_v18 = vadd.f32 %v2953_v25, %v5712_v57  ;;  %v3380_v58 = vadd.f32 %v6108_v39, %v5722_v37  ;;  %v3375_v14 = vadd.f32 %v2915_v3, %v5696_v40  ;;  %v3377_v19 = vadd.f32 %v2961_v56, %v6067_v16 }
 0x154   : > { %v4502_v29 = vcombine.low %v4480_v15, %v4487_v54  ;;  %v3381_v44 = vadd.f32 %v2962_v5, %v2046_v51  ;;  %v3571_v62 = vcombine.high %v5875_v45, %v5875_v45  ;;  %v3378_v61 = vadd.f32 %v2963_v53, %v5705_v60  ;;  %v5161_v15 = vpop.f32.mrb[35].mxu0 }
 0x155   : > { %v3578_v12 = vrot.slane %v5875_v45, %v5265_v8  ;;  %vm4220_vm8 = vcmp.ge.f32.partialorder %v4156_v50, 0.0  ;;  %v6124_v57 = vrot.slane %v4472_v27, %v5265_v8  ;;  %v6134_v16 = vadd.f32 %v5737_v36, %v5690_v17  ;;  %v6165_v27 = vpop.f32.mrb[34].mxu1 }
 0x156   : > { %v6127_v37 = vrot.slane %v4502_v29, %v5265_v8  ;;  %v3585_v40 = vrot.slane %v3571_v62, %v5265_v8  ;;  %v6130_v25 = vsel %vm4220_vm8, %v4156_v50, %v4284_v0  ;;  %v6778_v45 = vcombine.high %v5690_v17, %v5690_v17  ;;  %v5183_v3 = vpop.f32.mrb[35].mxu1 }
 0x157   : > { %v3586_v51 = vcombine.high %v3578_v12, %v3578_v12  ;;  %v3594_v60 = vrot.slane %v3578_v12, %v5265_v8  ;;  %v6779_v21 = vcombine.high %v5737_v36, %v5737_v36  ;;  %v6147_v52 = vadd.f32 %v5749_v10, %v5708_v48 }
 0x158   : > { %v3587_v50 = vcombine.high %v3585_v40, %v3585_v40  ;;  %v3601_v0 = vrot.slane %v3585_v40, %v5265_v8  ;;  %v6780_v33 = vcombine.high %v5708_v48, %v5708_v48  ;;  %v6781_v20 = vcombine.high %v5749_v10, %v5749_v10 }
 0x159   : > { %v6143_v6 = vadd.f32 %v6779_v21, %v6778_v45  ;;  %v2965_v17 = vcombine.high %v5914_v43, %v5914_v43  ;;  %v3608_v36 = vrot.slane %v3586_v51, %v5265_v8  ;;  %v3616_v63 = vcombine.high %v3594_v60, %v3594_v60 }
 0x15a   : > { %v6156_v34 = vadd.f32 %v6781_v20, %v6780_v33  ;;  %v4030_v26 = vadd.f32 %v3594_v60, %v3375_v14  ;;  %v2972_v42 = vrot.slane %v5914_v43, %v5265_v8  ;;  %v3615_v48 = vrot.slane %v3587_v50, %v5265_v8 }
 0x15b   : > { %v3617_v23 = vcombine.high %v3601_v0, %v3601_v0  ;;  %v4033_v10 = vadd.f32 %v3601_v0, %v3378_v61  ;;  %v2979_v55 = vrot.slane %v2965_v17, %v5265_v8  ;;  %v3618_v54 = vcombine.high %v3608_v36, %v3608_v36 }
 0x15c   : > { %v4031_v56 = vadd.f32 %v3616_v63, %v3376_v18  ;;  %v4157_v5 = vadd.f32 %v5633_v32, %v4030_v26  ;;  %v2980_v53 = vcombine.high %v2972_v42, %v2972_v42  ;;  %v3619_v14 = vcombine.high %v3615_v48, %v3615_v48 }
 0x15d   : > { %v4034_v29 = vadd.f32 %v3615_v48, %v3379_v46  ;;  %v4035_v43 = vadd.f32 %v3617_v23, %v3380_v58  ;;  %v4160_v62 = vadd.f32 %v5621_v9, %v4033_v10  ;;  %v4032_v12 = vadd.f32 %v3618_v54, %v3377_v19 }
 0x15e   : > { %v4158_v40 = vadd.f32 %v5606_v7, %v4031_v56  ;;  %vm4221_vm9 = vcmp.ge.f32.partialorder %v4157_v5, 0.0  ;;  %v4285_v51 = vmul.f32 0.01, %v4157_v5  ;;  %v4036_v61 = vadd.f32 %v3619_v14, %v3381_v44 }
 0x15f   : > { %v4161_v60 = vadd.f32 %v5629_v31, %v4034_v29  ;;  %v4162_v45 = vadd.f32 %v5609_v2, %v4035_v43  ;;  %vm4224_vm10 = vcmp.ge.f32.partialorder %v4160_v62, 0.0  ;;  %v4159_v18 = vadd.f32 %v5612_v38, %v4032_v12 }
 0x160   : > { %vm4222_vm11 = vcmp.ge.f32.partialorder %v4158_v40, 0.0  ;;  %v4286_v21 = vmul.f32 0.01, %v4158_v40  ;;  %v4288_v50 = vmul.f32 0.01, %v4160_v62  ;;  %v4163_v46 = vadd.f32 %v5615_v13, %v4036_v61 }
 0x161   : > { %vm4225_vm12 = vcmp.ge.f32.partialorder %v4161_v60, 0.0  ;;  %vm4226_vm13 = vcmp.ge.f32.partialorder %v4162_v45, 0.0  ;;  %v4289_v58 = vmul.f32 0.01, %v4161_v60  ;;  %vm4223_vm14 = vcmp.ge.f32.partialorder %v4159_v18, 0.0 }
 0x162   : > { %v4287_v19 = vmul.f32 0.01, %v4159_v18  ;;  %v4290_v0 = vmul.f32 0.01, %v4162_v45  ;;  %v4349_v44 = vsel %vm4221_vm9, %v4157_v5, %v4285_v51  ;;  %vm4227_vm15 = vcmp.ge.f32.partialorder %v4163_v46, 0.0 }
 0x163   : > { %v4291_v33 = vmul.f32 0.01, %v4163_v46  ;;  %v4350_v20 = vsel %vm4222_vm11, %v4158_v40, %v4286_v21  ;;  %v4352_v17 = vsel %vm4224_vm10, %v4160_v62, %v4288_v50  ;;  %v4353_v63 = vsel %vm4225_vm12, %v4161_v60, %v4289_v58  ;;  %v6782_v58 = vld [vmem:[#allocation2_spill] sm:$0xff] }
 0x164   : > { %v4351_v36 = vsel %vm4223_vm14, %v4159_v18, %v4287_v19  ;;  %v4354_v26 = vsel %vm4226_vm13, %v4162_v45, %v4290_v0  ;;  %v4473_v48 = vcombine.low %v6130_v25, %v4349_v44  ;;  %v4520_v15 = vcombine.low %v4352_v17, %v4353_v63  ;;  %v6784_v19 = vld [vmem:[#allocation4_spill] sm:$0xff]  ;;  %v6786_v44 = vld [vmem:[#allocation6_spill] sm:$0xff] }
 0x165   : > { %v4355_v23 = vsel %vm4227_vm15, %v4163_v46, %v4291_v33  ;;  %v4519_v10 = vcombine.low %v4350_v20, %v4351_v36  ;;  %v2981_v3 = vcombine.high %v2979_v55, %v2979_v55  ;;  %v2988_v5 = vrot.slane %v2972_v42, %v5265_v8 }
 0x166   : > { %v4501_v54 = vrot.slane %v4473_v48, %v5265_v8  ;;  %v4521_v56 = vcombine.low %v4354_v26, %v4355_v23  ;;  %v2995_v14 = vrot.slane %v2979_v55, %v5265_v8  ;;  %v4536_v43 = vrot.slane %v4520_v15, %v5265_v8  ;;  %v6243_v23 = vpop.f32.mrb[36].mxu0 }
 0x167   : > { %v4529_v29 = vrot.slane %v4519_v10, %v5265_v8  ;;  %v3002_v62 = vrot.slane %v2980_v53, %v5265_v8  ;;  %v6186_v25 = vrot.slane %v2981_v3, %v5265_v8  ;;  %v3010_v40 = vcombine.high %v2988_v5, %v2988_v5  ;;  %v6245_v10 = vpop.f32.mrb[36].mxu1 }
 0x168   : > { %v4503_v12 = vcombine.low %v6124_v57, %v4501_v54  ;;  %v3011_v51 = vcombine.high %v2995_v14, %v2995_v14  ;;  %v3383_v61 = vadd.f32 %v2988_v5, %v6134_v16  ;;  %v3386_v42 = vadd.f32 %v2995_v14, %v6147_v52  ;;  %v5164_v5 = vpop.f32.mrb[37].mxu0  ;;  %v5186_v14 = vpop.f32.mrb[37].mxu1 }
 0x169   : > { %v4551_v60 = vcombine.low %v4529_v29, %v4536_v43  ;;  %v3012_v45 = vcombine.high %v3002_v62, %v3002_v62  ;;  %v3387_v55 = vadd.f32 %v6186_v25, %v5766_v11  ;;  %v3384_v53 = vadd.f32 %v3010_v40, %v6143_v6  ;;  %v3510_v40 = vpop.f32.mrb[38].mxu1 }
 0x16a   : > { %v4517_v18 = vrot.slane %v4503_v12, %v5265_v8  ;;  %v3388_v21 = vadd.f32 %v3011_v51, %v6156_v34  ;;  %v2964_v57 = vcombine.high %v6108_v39, %v6108_v39  ;;  %v3620_v52 = vcombine.high %v5916_v59, %v5916_v59  ;;  %v2855_v12 = vpop.f32.mrb[38].mxu0 }
 0x16b   : > { %v6200_v50 = vrot.slane %v4551_v60, %v5265_v8  ;;  %v3385_v16 = vadd.f32 %v3012_v45, %v5753_v28  ;;  %v3627_v11 = vrot.slane %v5916_v59, %v5265_v8  ;;  %v6210_v34 = vrot.slane %v4521_v56, %v5265_v8 }
 0x16c   : > { %v4518_v46 = vcombine.low %v6127_v37, %v4517_v18  ;;  %v3382_v6 = vadd.f32 %v2964_v57, %v5739_v41  ;;  %v6783_v39 = vrot.slane %v6782_v58, %v5265_v8  ;;  %v3634_v28 = vrot.slane %v3620_v52, %v5265_v8  ;;  %v6785_v37 = vld [vmem:[#allocation3_spill] sm:$0xff]  ;;  %v5165_v57 = vpop.f32.mrb[39].mxu0  ;;  %v5187_v52 = vpop.f32.mrb[39].mxu1 }
 0x16d   : > { %v3635_v59 = vcombine.high %v3627_v11, %v3627_v11  ;;  %v3643_v41 = vrot.slane %v3627_v11, %v5265_v8  ;;  %v6227_v33 = vadd.f32 %v6786_v44, %v6785_v37  ;;  %v6787_v17 = vcombine.high %v6785_v37, %v6785_v37  ;;  %v6789_v52 = vld [vmem:[#allocation7_spill] sm:$0xff] }
 0x16e   : > { %v6216_v0 = vadd.f32 %v6784_v19, %v6783_v39  ;;  %v4870_v20 = vpack.c.bf16 %v4518_v46, %v4518_v46  ;;  %v6788_v36 = vcombine.high %v6786_v44, %v6786_v44  ;;  %v3014_v26 = vcombine.high %v5926_v22, %v5926_v22 }
 0x16f   : > { %v6241_v48 = vrot.slane %v5926_v22, %v5265_v8  ;;  %v3636_v15 = vcombine.high %v3634_v28, %v3634_v28  ;;  %v3650_v3 = vrot.slane %v3634_v28, %v5265_v8  ;;  %v3657_v54 = vrot.slane %v3635_v59, %v5265_v8 }
 0x170   : > { %v6235_v63 = vadd.f32 %v6788_v36, %v6787_v17  ;;  %v4037_v56 = vadd.f32 %v3643_v41, %v3382_v6  ;;  %4879 = vst.msk [vmem:[%s6221_s4] sm:$0xf] %vm4878_vm0, %v4870_v20  ;;  %v3028_v29 = vrot.slane %v3014_v26, %v5265_v8  ;;  %v3013_v62 = vcombine.high %v6186_v25, %v6186_v25 }
 0x171   : > { %v3029_v22 = vcombine.high %v6241_v48, %v6241_v48  ;;  %v3037_v43 = vrot.slane %v6241_v48, %v5265_v8  ;;  %v3664_v51 = vrot.slane %v3636_v15, %v5265_v8  ;;  %v3665_v60 = vcombine.high %v3650_v3, %v3650_v3 }
 0x172   : > { %v3666_v45 = vcombine.high %v3657_v54, %v3657_v54  ;;  %v4038_v18 = vadd.f32 %v3657_v54, %v3383_v61  ;;  %v4040_v11 = vadd.f32 %v3650_v3, %v3385_v16  ;;  %v4164_v46 = vadd.f32 %v5625_v30, %v4037_v56 }
 0x173   : > { %v3030_v6 = vcombine.high %v3028_v29, %v3028_v29  ;;  %v3044_v58 = vrot.slane %v3028_v29, %v5265_v8  ;;  %v3667_v39 = vcombine.high %v3664_v51, %v3664_v51  ;;  %v4041_v28 = vadd.f32 %v3664_v51, %v3386_v42 }
 0x174   : > { %v4039_v19 = vadd.f32 %v3666_v45, %v3384_v53  ;;  %v4042_v59 = vadd.f32 %v3665_v60, %v3387_v55  ;;  %v4165_v25 = vadd.f32 %v5633_v32, %v4038_v18  ;;  %v4167_v41 = vadd.f32 %v5612_v38, %v4040_v11 }
 0x175   : > { %vm4228_vm1 = vcmp.ge.f32.partialorder %v4164_v46, 0.0  ;;  %v4292_v37 = vmul.f32 0.01, %v4164_v46  ;;  %v4043_v44 = vadd.f32 %v3667_v39, %v3388_v21  ;;  %v4168_v16 = vadd.f32 %v5621_v9, %v4041_v28 }
 0x176   : > { %v4166_v61 = vadd.f32 %v5606_v7, %v4039_v19  ;;  %v4169_v20 = vadd.f32 %v5629_v31, %v4042_v59  ;;  %vm4229_vm2 = vcmp.ge.f32.partialorder %v4165_v25, 0.0  ;;  %vm4231_vm3 = vcmp.ge.f32.partialorder %v4167_v41, 0.0  ;;  %v6790_v19 = vld [vmem:[#allocation10_spill] sm:$0xff] }
 0x177   : > { %v4293_v17 = vmul.f32 0.01, %v4165_v25  ;;  %v4295_v36 = vmul.f32 0.01, %v4167_v41  ;;  %v4170_v42 = vadd.f32 %v5609_v2, %v4043_v44  ;;  %vm4232_vm5 = vcmp.ge.f32.partialorder %v4168_v16, 0.0 }
 0x178   : > { %vm4230_vm4 = vcmp.ge.f32.partialorder %v4166_v61, 0.0  ;;  %vm4233_vm6 = vcmp.ge.f32.partialorder %v4169_v20, 0.0  ;;  %v4294_v55 = vmul.f32 0.01, %v4166_v61  ;;  %v4296_v53 = vmul.f32 0.01, %v4168_v16 }
 0x179   : > { %v4297_v26 = vmul.f32 0.01, %v4169_v20  ;;  %v4356_v21 = vsel %vm4228_vm1, %v4164_v46, %v4292_v37  ;;  %v4298_v48 = vmul.f32 0.01, %v4170_v42  ;;  %v4357_v15 = vsel %vm4229_vm2, %v4165_v25, %v4293_v17  ;;  %v6791_v25 = vld [vmem:[#allocation5_spill] sm:$0xff]  ;;  %v6792_v37 = vld [vmem:[#allocation8_spill] sm:$0xff] }
 0x17a   : > { %v4359_v3 = vsel %vm4231_vm3, %v4167_v41, %v4295_v36  ;;  %v3051_v54 = vrot.slane %v3029_v22, %v5265_v8  ;;  %v4358_v56 = vsel %vm4230_vm4, %v4166_v61, %v4294_v55  ;;  %v4360_v5 = vsel %vm4232_vm5, %v4168_v16, %v4296_v53  ;;  %v6793_v16 = vld [vmem:[#allocation9_spill] sm:$0xff] }
 0x17b   : > { %v4361_v14 = vsel %vm4233_vm6, %v4169_v20, %v4297_v26  ;;  %v4522_v29 = vcombine.low %v4356_v21, %v4357_v15  ;;  %v4568_v12 = vcombine.low %v4358_v56, %v4359_v3  ;;  %v6270_v51 = vrot.slane %v3030_v6, %v5265_v8  ;;  %v6797_v26 = vld [vmem:[#allocation11_spill] sm:$0xff]  ;;  %v6798_v21 = vld [vmem:[#allocation13_spill] sm:$0xff] }
 0x17c   : > { %v4569_v40 = vcombine.low %v4360_v5, %v4361_v14  ;;  %v3059_v60 = vcombine.high %v3044_v58, %v3044_v58  ;;  %v3060_v18 = vcombine.high %v3051_v54, %v3051_v54  ;;  %v3390_v57 = vadd.f32 %v3037_v43, %v6216_v0 }
 0x17d   : > { %v4550_v45 = vrot.slane %v4522_v29, %v5265_v8  ;;  %v3391_v11 = vadd.f32 %v3051_v54, %v6789_v52  ;;  %v4578_v46 = vrot.slane %v4568_v12, %v5265_v8  ;;  %v3393_v39 = vadd.f32 %v3044_v58, %v6227_v33 }
 0x17e   : > { %v4585_v22 = vrot.slane %v4569_v40, %v5265_v8  ;;  %v3394_v28 = vadd.f32 %v6270_v51, %v6790_v19  ;;  %v3395_v59 = vadd.f32 %v3059_v60, %v6235_v63  ;;  %v3389_v41 = vadd.f32 %v3013_v62, %v6791_v25 }
 0x17f   : > { %v4552_v6 = vcombine.low %v6210_v34, %v4550_v45  ;;  %v3392_v44 = vadd.f32 %v3060_v18, %v6792_v37  ;;  %v3668_v43 = vcombine.high %v5928_v1, %v5928_v1  ;;  %v3675_v61 = vrot.slane %v5928_v1, %v5265_v8  ;;  %v6794_v34 = vld [vmem:[#allocation12_spill] sm:$0xff] }
 0x180   : > { %v4600_v0 = vcombine.low %v4578_v46, %v4585_v22  ;;  %vm4234_vm7 = vcmp.ge.f32.partialorder %v4170_v42, 0.0  ;;  %v6293_v20 = vadd.f32 %v6794_v34, %v6793_v16  ;;  %v6795_v63 = vcombine.high %v6793_v16, %v6793_v16 }
 0x181   : > { %v4566_v33 = vrot.slane %v4552_v6, %v5265_v8  ;;  %v6289_v58 = vsel %vm4234_vm7, %v4170_v42, %v4298_v48  ;;  %v6796_v62 = vcombine.high %v6794_v34, %v6794_v34  ;;  %v3682_v1 = vrot.slane %v3668_v43, %v5265_v8 }
 0x182   : > { %v6304_v36 = vrot.slane %v4600_v0, %v5265_v8  ;;  %v3683_v55 = vcombine.high %v3675_v61, %v3675_v61  ;;  %v3691_v42 = vrot.slane %v3675_v61, %v5265_v8  ;;  %v6311_v48 = vadd.f32 %v6798_v21, %v6797_v26 }
 0x183   : > { %v6301_v17 = vadd.f32 %v6796_v62, %v6795_v63  ;;  %v4567_v53 = vcombine.low %v6200_v50, %v4566_v33  ;;  %v6799_v15 = vcombine.high %v6797_v26, %v6797_v26  ;;  %v6800_v3 = vcombine.high %v6798_v21, %v6798_v21 }
 0x184   : > { %v3062_v56 = vcombine.high %v5970_v24, %v5970_v24  ;;  %v3684_v5 = vcombine.high %v3682_v1, %v3682_v1  ;;  %v3698_v14 = vrot.slane %v3682_v1, %v5265_v8  ;;  %v3705_v50 = vrot.slane %v3683_v55, %v5265_v8 }
 0x185   : > { %v6319_v54 = vadd.f32 %v6800_v3, %v6799_v15  ;;  %v3713_v29 = vcombine.high %v3691_v42, %v3691_v42  ;;  %v4871_v12 = vpack.c.bf16 %v4567_v53, %v4567_v53  ;;  %v4044_v40 = vadd.f32 %v3691_v42, %v3389_v41 }
 0x186   : > { %v3069_v60 = vrot.slane %v5970_v24, %v5265_v8  ;;  %v3076_v45 = vrot.slane %v3062_v56, %v5265_v8  ;;  %v3712_v18 = vrot.slane %v3684_v5, %v5265_v8  ;;  %v3714_v52 = vcombine.high %v3698_v14, %v3698_v14 }
 0x187   : > { %v4045_v46 = vadd.f32 %v3705_v50, %v3390_v57  ;;  %v4046_v22 = vadd.f32 %v3713_v29, %v3391_v11  ;;  %4880 = vst.msk [vmem:[%s6221_s4 + $0x4] sm:$0xf] %vm4878_vm0, %v4871_v12  ;;  %v4047_v19 = vadd.f32 %v3698_v14, %v3392_v44  ;;  %v4171_v6 = vadd.f32 %v5615_v13, %v4044_v40 }
 0x188   : > { %v3077_v25 = vcombine.high %v3069_v60, %v3069_v60  ;;  %v3078_v37 = vcombine.high %v3076_v45, %v3076_v45  ;;  %v3715_v0 = vcombine.high %v3712_v18, %v3712_v18  ;;  %v4048_v43 = vadd.f32 %v3712_v18, %v3393_v39 }
 0x189   : > { %v4049_v41 = vadd.f32 %v3714_v52, %v3394_v28  ;;  %v4172_v61 = vadd.f32 %v5625_v30, %v4045_v46  ;;  %v4173_v24 = vadd.f32 %v5633_v32, %v4046_v22  ;;  %v4174_v33 = vadd.f32 %v5606_v7, %v4047_v19 }
 0x18a   : > { %vm4235_vm8 = vcmp.ge.f32.partialorder %v4171_v6, 0.0  ;;  %v4299_v16 = vmul.f32 0.01, %v4171_v6  ;;  %v4050_v57 = vadd.f32 %v3715_v0, %v3395_v59  ;;  %v4175_v11 = vadd.f32 %v5612_v38, %v4048_v43 }
 0x18b   : > { %v4176_v44 = vadd.f32 %v5621_v9, %v4049_v41  ;;  %vm4236_vm9 = vcmp.ge.f32.partialorder %v4172_v61, 0.0  ;;  %vm4237_vm10 = vcmp.ge.f32.partialorder %v4173_v24, 0.0  ;;  %vm4238_vm11 = vcmp.ge.f32.partialorder %v4174_v33, 0.0 }
 0x18c   : > { %v4300_v34 = vmul.f32 0.01, %v4172_v61  ;;  %v4301_v63 = vmul.f32 0.01, %v4173_v24  ;;  %v4177_v39 = vadd.f32 %v5629_v31, %v4050_v57  ;;  %vm4239_vm12 = vcmp.ge.f32.partialorder %v4175_v11, 0.0 }
 0x18d   : > { %vm4240_vm13 = vcmp.ge.f32.partialorder %v4176_v44, 0.0  ;;  %v4302_v28 = vmul.f32 0.01, %v4174_v33  ;;  %v4303_v62 = vmul.f32 0.01, %v4175_v11  ;;  %v4363_v55 = vsel %vm4235_vm8, %v4171_v6, %v4299_v16 }
 0x18e   : > { %v4304_v1 = vmul.f32 0.01, %v4176_v44  ;;  %v4364_v42 = vsel %vm4236_vm9, %v4172_v61, %v4300_v34  ;;  %vm4241_vm14 = vcmp.ge.f32.partialorder %v4177_v39, 0.0  ;;  %v4305_v59 = vmul.f32 0.01, %v4177_v39  ;;  %v6805_v34 = vld [vmem:[#allocation20_spill] sm:$0xff] }
 0x18f   : > { %v4365_v53 = vsel %vm4237_vm10, %v4173_v24, %v4301_v63  ;;  %v4366_v26 = vsel %vm4238_vm11, %v4174_v33, %v4302_v28  ;;  %v4367_v21 = vsel %vm4239_vm12, %v4175_v11, %v4303_v62  ;;  %v4570_v3 = vcombine.low %v6289_v58, %v4363_v55  ;;  %v6802_v24 = vld [vmem:[#allocation17_spill] sm:$0xff]  ;;  %v6803_v11 = vld [vmem:[#allocation34_spill] sm:$0xff]  ;;  %v6810_v62 = vld [vmem:[#allocation23_spill] sm:$0xff] }
 0x190   : > { %v4368_v15 = vsel %vm4240_vm13, %v4176_v44, %v4304_v1  ;;  %v4571_v56 = vcombine.low %v4364_v42, %v4365_v53  ;;  %v4369_v5 = vsel %vm4241_vm14, %v4177_v39, %v4305_v59  ;;  %v4617_v14 = vcombine.low %v4366_v26, %v4367_v21  ;;  %v6808_v28 = vld [vmem:[#allocation18_spill] sm:$0xff] }
 0x191   : > { %v3085_v50 = vrot.slane %v3069_v60, %v5265_v8  ;;  %v3092_v29 = vrot.slane %v3076_v45, %v5265_v8  ;;  %v4592_v12 = vrot.slane %v4570_v3, %v5265_v8  ;;  %v4618_v18 = vcombine.low %v4368_v15, %v4369_v5  ;;  %v6801_v45 = vld [vmem:[#allocation16_spill] sm:$0xff]  ;;  %v6812_v53 = vld [vmem:[#allocation14_spill] sm:$0xff] }
 0x192   : > { %v4599_v40 = vrot.slane %v4571_v56, %v5265_v8  ;;  %v3099_v52 = vrot.slane %v3077_v25, %v5265_v8  ;;  %v4627_v46 = vrot.slane %v4617_v14, %v5265_v8  ;;  %v6347_v22 = vrot.slane %v3078_v37, %v5265_v8 }
 0x193   : > { %v3107_v58 = vcombine.high %v3085_v50, %v3085_v50  ;;  %v3108_v19 = vcombine.high %v3092_v29, %v3092_v29  ;;  %v4634_v0 = vrot.slane %v4618_v18, %v5265_v8  ;;  %v3397_v60 = vadd.f32 %v3085_v50, %v6293_v20 }
 0x194   : > { %v4601_v6 = vcombine.low %v4592_v12, %v4599_v40  ;;  %v3398_v43 = vadd.f32 %v3099_v52, %v6801_v45  ;;  %v3400_v61 = vadd.f32 %v3092_v29, %v6311_v48  ;;  %v3401_v25 = vadd.f32 %v6347_v22, %v6802_v24 }
 0x195   : > { %v3399_v41 = vadd.f32 %v3107_v58, %v6301_v17  ;;  %v3402_v33 = vadd.f32 %v3108_v19, %v6319_v54  ;;  %v4649_v16 = vcombine.low %v4627_v46, %v4634_v0  ;;  %v3061_v57 = vcombine.high %v6270_v51, %v6270_v51  ;;  %v6804_v17 = vld [vmem:[#allocation15_spill] sm:$0xff] }
 0x196   : > { %v4615_v37 = vrot.slane %v4601_v6, %v5265_v8  ;;  %v3716_v20 = vcombine.high %v6803_v11, %v6803_v11  ;;  %v3723_v44 = vrot.slane %v6803_v11, %v5265_v8  ;;  %v6366_v48 = vadd.f32 %v6805_v34, %v6804_v17 }
 0x197   : > { %v6806_v63 = vcombine.high %v6804_v17, %v6804_v17  ;;  %v6807_v54 = vcombine.high %v6805_v34, %v6805_v34  ;;  %v6809_v51 = vcombine.high %v6808_v28, %v6808_v28  ;;  %v6811_v1 = vcombine.high %v6810_v62, %v6810_v62 }
 0x198   : > { %v4616_v42 = vcombine.low %v6304_v36, %v4615_v37  ;;  %v6386_v59 = vrot.slane %v4649_v16, %v5265_v8  ;;  %v3396_v26 = vadd.f32 %v3061_v57, %v6812_v53  ;;  %v3730_v21 = vrot.slane %v3716_v20, %v5265_v8 }
 0x199   : > { %v6374_v39 = vadd.f32 %v6807_v54, %v6806_v63  ;;  %v6382_v55 = vadd.f32 %v6811_v1, %v6809_v51  ;;  %v3731_v15 = vcombine.high %v3723_v44, %v3723_v44  ;;  %v3739_v3 = vrot.slane %v3723_v44, %v5265_v8 }
 0x19a   : > { %v3110_v56 = vcombine.high %v5984_v35, %v5984_v35  ;;  %v3117_v5 = vrot.slane %v5984_v35, %v5265_v8  ;;  %v4872_v14 = vpack.c.bf16 %v4616_v42, %v4616_v42  ;;  %v3732_v50 = vcombine.high %v3730_v21, %v3730_v21 }
 0x19b   : > { %v3746_v36 = vrot.slane %v3730_v21, %v5265_v8  ;;  %v3109_v29 = vcombine.high %v6347_v22, %v6347_v22  ;;  %v3753_v12 = vrot.slane %v3731_v15, %v5265_v8  ;;  %v3761_v40 = vcombine.high %v3739_v3, %v3739_v3 }
 0x19c   : > { %v4051_v18 = vadd.f32 %v3739_v3, %v3396_v26  ;;  %v3124_v52 = vrot.slane %v3110_v56, %v5265_v8  ;;  %4881 = vst.msk [vmem:[%s6221_s4 + $0x8] sm:$0xf] %vm4878_vm0, %v4872_v14  ;;  %v3760_v46 = vrot.slane %v3732_v50, %v5265_v8  ;;  %v3125_v19 = vcombine.high %v3117_v5, %v3117_v5 }
 0x19d   : > { %v3762_v58 = vcombine.high %v3746_v36, %v3746_v36  ;;  %v3133_v35 = vrot.slane %v3117_v5, %v5265_v8  ;;  %v3763_v6 = vcombine.high %v3753_v12, %v3753_v12  ;;  %v4052_v0 = vadd.f32 %v3753_v12, %v3397_v60 }
 0x19e   : > { %v4053_v45 = vadd.f32 %v3761_v40, %v3398_v43  ;;  %v4178_v24 = vadd.f32 %v5609_v2, %v4051_v18  ;;  %v3764_v37 = vcombine.high %v3760_v46, %v3760_v46  ;;  %v4055_v16 = vadd.f32 %v3760_v46, %v3400_v61 }
 0x19f   : > { %v4056_v57 = vadd.f32 %v3762_v58, %v3401_v25  ;;  %v3126_v11 = vcombine.high %v3124_v52, %v3124_v52  ;;  %v4054_v20 = vadd.f32 %v3763_v6, %v3399_v41  ;;  %v4179_v44 = vadd.f32 %v5615_v13, %v4052_v0  ;;  %v6813_v0 = vld [vmem:[#allocation24_spill] sm:$0xff] }
 0x1a0   : > { %v4180_v17 = vadd.f32 %v5625_v30, %v4053_v45  ;;  %vm4242_vm15 = vcmp.ge.f32.partialorder %v4178_v24, 0.0  ;;  %v4057_v34 = vadd.f32 %v3764_v37, %v3402_v33  ;;  %v4182_v63 = vadd.f32 %v5606_v7, %v4055_v16 }
 0x1a1   : > { %v4183_v54 = vadd.f32 %v5612_v38, %v4056_v57  ;;  %v4306_v28 = vmul.f32 0.01, %v4178_v24  ;;  %v4181_v60 = vadd.f32 %v5633_v32, %v4054_v20  ;;  %vm4243_vm1 = vcmp.ge.f32.partialorder %v4179_v44, 0.0 }
 0x1a2   : > { %vm4244_vm2 = vcmp.ge.f32.partialorder %v4180_v17, 0.0  ;;  %v4307_v43 = vmul.f32 0.01, %v4179_v44  ;;  %v4184_v61 = vadd.f32 %v5621_v9, %v4057_v34  ;;  %vm4246_vm3 = vcmp.ge.f32.partialorder %v4182_v63, 0.0 }
 0x1a3   : > { %vm4247_vm4 = vcmp.ge.f32.partialorder %v4183_v54, 0.0  ;;  %v4308_v41 = vmul.f32 0.01, %v4180_v17  ;;  %vm4245_vm5 = vcmp.ge.f32.partialorder %v4181_v60, 0.0  ;;  %v4309_v25 = vmul.f32 0.01, %v4181_v60 }
 0x1a4   : > { %v4310_v51 = vmul.f32 0.01, %v4182_v63  ;;  %v4370_v33 = vsel %vm4242_vm15, %v4178_v24, %v4306_v28  ;;  %v4311_v62 = vmul.f32 0.01, %v4183_v54  ;;  %v4312_v1 = vmul.f32 0.01, %v4184_v61 }
 0x1a5   : > { %v4371_v42 = vsel %vm4243_vm1, %v4179_v44, %v4307_v43  ;;  %v4372_v53 = vsel %vm4244_vm2, %v4180_v17, %v4308_v41  ;;  %v4373_v26 = vsel %vm4245_vm5, %v4181_v60, %v4309_v25  ;;  %v3140_v3 = vrot.slane %v3124_v52, %v5265_v8  ;;  %v6814_v24 = vld [vmem:[#allocation26_spill] sm:$0xff]  ;;  %v6816_v44 = vld [vmem:[#allocation25_spill] sm:$0xff] }
 0x1a6   : > { %v4374_v21 = vsel %vm4246_vm3, %v4182_v63, %v4310_v51  ;;  %v4619_v15 = vcombine.low %v4370_v33, %v4371_v42  ;;  %v4375_v56 = vsel %vm4247_vm4, %v4183_v54, %v4311_v62  ;;  %v4620_v5 = vcombine.low %v4372_v53, %v4373_v26  ;;  %v6819_v63 = vld [vmem:[#allocation27_spill] sm:$0xff]  ;;  %v6822_v41 = vld [vmem:[#allocation22_spill] sm:$0xff] }
 0x1a7   : > { %v3147_v14 = vrot.slane %v3125_v19, %v5265_v8  ;;  %v6415_v50 = vrot.slane %v3126_v11, %v5265_v8  ;;  %v4666_v12 = vcombine.low %v4374_v21, %v4375_v56  ;;  %v3155_v40 = vcombine.high %v3133_v35, %v3133_v35  ;;  %v6815_v11 = vld [vmem:[#allocation21_spill] sm:$0xff]  ;;  %v6823_v25 = vld [vmem:[#allocation30_spill] sm:$0xff] }
 0x1a8   : > { %v4641_v36 = vrot.slane %v4619_v15, %v5265_v8  ;;  %v3156_v18 = vcombine.high %v3140_v3, %v3140_v3  ;;  %v4648_v46 = vrot.slane %v4620_v5, %v5265_v8  ;;  %v3404_v6 = vadd.f32 %v3133_v35, %v6366_v48  ;;  %v6817_v35 = vld [vmem:[#allocation38_spill] sm:$0xff] }
 0x1a9   : > { %v3157_v58 = vcombine.high %v3147_v14, %v3147_v14  ;;  %v3405_v45 = vadd.f32 %v3147_v14, %v6813_v0  ;;  %v6422_v52 = vrot.slane %v4666_v12, %v5265_v8  ;;  %v3406_v19 = vadd.f32 %v3155_v40, %v6374_v39  ;;  %v6818_v39 = vld [vmem:[#allocation19_spill] sm:$0xff] }
 0x1aa   : > { %v3408_v37 = vadd.f32 %v6415_v50, %v6814_v24  ;;  %v3409_v16 = vadd.f32 %v3156_v18, %v6382_v55  ;;  %v4650_v57 = vcombine.low %v4641_v36, %v4648_v46  ;;  %v3403_v20 = vadd.f32 %v3109_v29, %v6815_v11 }
 0x1ab   : > { %v3407_v48 = vadd.f32 %v3157_v58, %v6816_v44  ;;  %v3765_v17 = vcombine.high %v6817_v35, %v6817_v35  ;;  %v3772_v34 = vrot.slane %v6817_v35, %v5265_v8  ;;  %vm4248_vm6 = vcmp.ge.f32.partialorder %v4184_v61, 0.0 }
 0x1ac   : > { %v6439_v54 = vadd.f32 %v6819_v63, %v6818_v39  ;;  %v6820_v55 = vcombine.high %v6818_v39, %v6818_v39  ;;  %v6821_v22 = vcombine.high %v6819_v63, %v6819_v63  ;;  %v4664_v28 = vrot.slane %v4650_v57, %v5265_v8 }
 0x1ad   : > { %v3779_v60 = vrot.slane %v3765_v17, %v5265_v8  ;;  %v4376_v43 = vsel %vm4248_vm6, %v4184_v61, %v4312_v1  ;;  %v6453_v51 = vadd.f32 %v6823_v25, %v6822_v41  ;;  %v3780_v33 = vcombine.high %v3772_v34, %v3772_v34 }
 0x1ae   : > { %v6447_v29 = vadd.f32 %v6821_v22, %v6820_v55  ;;  %v3788_v62 = vrot.slane %v3772_v34, %v5265_v8  ;;  %v6824_v42 = vcombine.high %v6822_v41, %v6822_v41  ;;  %v6825_v53 = vcombine.high %v6823_v25, %v6823_v25 }
 0x1af   : > { %v3159_v21 = vcombine.high %v6076_v4, %v6076_v4  ;;  %v4665_v61 = vcombine.low %v6386_v59, %v4664_v28  ;;  %v3781_v1 = vcombine.high %v3779_v60, %v3779_v60  ;;  %v3795_v15 = vrot.slane %v3779_v60, %v5265_v8 }
 0x1b0   : > { %v6462_v26 = vadd.f32 %v6825_v53, %v6824_v42  ;;  %v3166_v3 = vrot.slane %v6076_v4, %v5265_v8  ;;  %v3802_v56 = vrot.slane %v3780_v33, %v5265_v8  ;;  %v3810_v5 = vcombine.high %v3788_v62, %v3788_v62 }
 0x1b1   : > { %v4058_v14 = vadd.f32 %v3788_v62, %v3403_v20  ;;  %v3173_v36 = vrot.slane %v3159_v21, %v5265_v8  ;;  %v4873_v12 = vpack.c.bf16 %v4665_v61, %v4665_v61  ;;  %v3809_v40 = vrot.slane %v3781_v1, %v5265_v8 }
 0x1b2   : > { %v3811_v18 = vcombine.high %v3795_v15, %v3795_v15  ;;  %v4062_v46 = vadd.f32 %v3795_v15, %v3407_v48  ;;  %v3812_v58 = vcombine.high %v3802_v56, %v3802_v56  ;;  %v4059_v59 = vadd.f32 %v3802_v56, %v3404_v6 }
 0x1b3   : > { %v4060_v0 = vadd.f32 %v3810_v5, %v3405_v45  ;;  %v4185_v24 = vadd.f32 %v5629_v31, %v4058_v14  ;;  %4882 = vst.msk [vmem:[%s6221_s4 + $0xc] sm:$0xf] %vm4878_vm0, %v4873_v12  ;;  %v3813_v57 = vcombine.high %v3809_v40, %v3809_v40  ;;  %v3174_v44 = vcombine.high %v3166_v3, %v3166_v3 }
 0x1b4   : > { %v4063_v4 = vadd.f32 %v3811_v18, %v3408_v37  ;;  %v4189_v11 = vadd.f32 %v5633_v32, %v4062_v46  ;;  %v4061_v20 = vadd.f32 %v3812_v58, %v3406_v19  ;;  %v4186_v35 = vadd.f32 %v5609_v2, %v4059_v59 }
 0x1b5   : > { %v4187_v17 = vadd.f32 %v5615_v13, %v4060_v0  ;;  %vm4249_vm7 = vcmp.ge.f32.partialorder %v4185_v24, 0.0  ;;  %v4064_v34 = vadd.f32 %v3813_v57, %v3409_v16  ;;  %v4313_v6 = vmul.f32 0.01, %v4185_v24 }
 0x1b6   : > { %v4190_v48 = vadd.f32 %v5606_v7, %v4063_v4  ;;  %vm4253_vm8 = vcmp.ge.f32.partialorder %v4189_v11, 0.0  ;;  %v4188_v45 = vadd.f32 %v5625_v30, %v4061_v20  ;;  %vm4250_vm9 = vcmp.ge.f32.partialorder %v4186_v35, 0.0 }
 0x1b7   : > { %vm4251_vm10 = vcmp.ge.f32.partialorder %v4187_v17, 0.0  ;;  %v4314_v39 = vmul.f32 0.01, %v4186_v35  ;;  %v4191_v37 = vadd.f32 %v5612_v38, %v4064_v34  ;;  %v4315_v63 = vmul.f32 0.01, %v4187_v17  ;;  %v6827_v34 = vld [vmem:[#allocation31_spill] sm:$0xff] }
 0x1b8   : > { %vm4254_vm11 = vcmp.ge.f32.partialorder %v4190_v48, 0.0  ;;  %v4317_v19 = vmul.f32 0.01, %v4189_v11  ;;  %vm4252_vm12 = vcmp.ge.f32.partialorder %v4188_v45, 0.0  ;;  %v4316_v55 = vmul.f32 0.01, %v4188_v45 }
 0x1b9   : > { %v4318_v22 = vmul.f32 0.01, %v4190_v48  ;;  %v4377_v28 = vsel %vm4249_vm7, %v4185_v24, %v4313_v6  ;;  %vm4255_vm13 = vcmp.ge.f32.partialorder %v4191_v37, 0.0  ;;  %v4319_v16 = vmul.f32 0.01, %v4191_v37 }
 0x1ba   : > { %v4378_v60 = vsel %vm4250_vm9, %v4186_v35, %v4314_v39  ;;  %v4379_v41 = vsel %vm4251_vm10, %v4187_v17, %v4315_v63  ;;  %v4380_v25 = vsel %vm4252_vm12, %v4188_v45, %v4316_v55  ;;  %v4381_v33 = vsel %vm4253_vm8, %v4189_v11, %v4317_v19  ;;  %v6832_v19 = vld [vmem:[#allocation28_spill] sm:$0xff] }
 0x1bb   : > { %v4382_v62 = vsel %vm4254_vm11, %v4190_v48, %v4318_v22  ;;  %v4667_v42 = vcombine.low %v4376_v43, %v4377_v28  ;;  %v4383_v53 = vsel %vm4255_vm13, %v4191_v37, %v4319_v16  ;;  %v4668_v21 = vcombine.low %v4378_v60, %v4379_v41  ;;  %v6833_v22 = vld [vmem:[#allocation29_spill] sm:$0xff]  ;;  %v6835_v16 = vld [vmem:[#allocation39_spill] sm:$0xff] }
 0x1bc   : > { %v4669_v61 = vcombine.low %v4380_v25, %v4381_v33  ;;  %v3175_v1 = vcombine.high %v3173_v36, %v3173_v36  ;;  %v4715_v56 = vcombine.low %v4382_v62, %v4383_v53  ;;  %v3182_v5 = vrot.slane %v3166_v3, %v5265_v8  ;;  %v6826_v3 = vld [vmem:[#allocation33_spill] sm:$0xff] }
 0x1bd   : > { %v4683_v15 = vrot.slane %v4667_v42, %v5265_v8  ;;  %v3189_v14 = vrot.slane %v3173_v36, %v5265_v8  ;;  %v4690_v12 = vrot.slane %v4668_v21, %v5265_v8  ;;  %v3196_v18 = vrot.slane %v3174_v44, %v5265_v8 }
 0x1be   : > { %v4697_v40 = vrot.slane %v4669_v61, %v5265_v8  ;;  %v3203_v46 = vrot.slane %v3175_v1, %v5265_v8  ;;  %v3204_v58 = vcombine.high %v3182_v5, %v3182_v5  ;;  %v3411_v0 = vadd.f32 %v3182_v5, %v6439_v54  ;;  %v6836_v61 = vld [vmem:[#allocation36_spill] sm:$0xff] }
 0x1bf   : > { %v4698_v43 = vcombine.low %v6422_v52, %v4683_v15  ;;  %v3205_v59 = vcombine.high %v3189_v14, %v3189_v14  ;;  %v3206_v57 = vcombine.high %v3196_v18, %v3196_v18  ;;  %v3412_v11 = vadd.f32 %v3196_v18, %v6826_v3 }
 0x1c0   : > { %v4699_v24 = vcombine.low %v4690_v12, %v4697_v40  ;;  %v3207_v4 = vcombine.high %v3203_v46, %v3203_v46  ;;  %v3413_v20 = vadd.f32 %v3204_v58, %v6447_v29  ;;  %v3415_v35 = vadd.f32 %v3189_v14, %v6453_v51  ;;  %v6828_v29 = vld [vmem:[#allocation32_spill] sm:$0xff]  ;;  %v6829_v51 = vld [vmem:[#allocation35_spill] sm:$0xff] }
 0x1c1   : > { %v4706_v36 = vrot.slane %v4698_v43, %v5265_v8  ;;  %v3416_v44 = vadd.f32 %v3205_v59, %v6462_v26  ;;  %v3158_v52 = vcombine.high %v6415_v50, %v6415_v50  ;;  %v3414_v54 = vadd.f32 %v3206_v57, %v6827_v34 }
 0x1c2   : > { %v4713_v17 = vrot.slane %v4699_v24, %v5265_v8  ;;  %v3814_v48 = vcombine.high %v6078_v49, %v6078_v49  ;;  %v3821_v6 = vrot.slane %v6078_v49, %v5265_v8  ;;  %v6507_v45 = vrot.slane %v4715_v56, %v5265_v8 }
 0x1c3   : > { %v6511_v39 = vadd.f32 %v6829_v51, %v6828_v29  ;;  %v6830_v26 = vcombine.high %v6828_v29, %v6828_v29  ;;  %v6831_v50 = vcombine.high %v6829_v51, %v6829_v51  ;;  %v3410_v55 = vadd.f32 %v3158_v52, %v6832_v19 }
 0x1c4   : > { %v4714_v63 = vcombine.low %v4706_v36, %v4713_v17  ;;  %v3828_v49 = vrot.slane %v3814_v48, %v5265_v8  ;;  %v6834_v28 = vrot.slane %v6833_v22, %v5265_v8  ;;  %v3829_v41 = vcombine.high %v3821_v6, %v3821_v6 }
 0x1c5   : > { %v6519_v37 = vadd.f32 %v6831_v50, %v6830_v26  ;;  %v3837_v25 = vrot.slane %v3821_v6, %v5265_v8  ;;  %v3208_v33 = vcombine.high %v6163_v47, %v6163_v47  ;;  %v3215_v62 = vrot.slane %v6163_v47, %v5265_v8 }
 0x1c6   : > { %v2087_v60 = vadd.f32 %v6835_v16, %v6834_v28  ;;  %v4874_v42 = vpack.c.bf16 %v4714_v63, %v4714_v63  ;;  %v3830_v53 = vcombine.high %v3828_v49, %v3828_v49  ;;  %v3844_v21 = vrot.slane %v3828_v49, %v5265_v8 }
 0x1c7   : > { %v6534_v1 = vadd.f32 %v3207_v4, %v6836_v61  ;;  %v3851_v15 = vrot.slane %v3829_v41, %v5265_v8  ;;  %v3859_v56 = vcombine.high %v3837_v25, %v3837_v25  ;;  %v4065_v5 = vadd.f32 %v3837_v25, %v3410_v55 }
 0x1c8   : > { %v3222_v14 = vrot.slane %v3208_v33, %v5265_v8  ;;  %4883 = vst.msk [vmem:[%s6221_s4 + $0x10] sm:$0xf] %vm4878_vm0, %v4874_v42  ;;  %v3858_v12 = vrot.slane %v3830_v53, %v5265_v8  ;;  %v4069_v40 = vadd.f32 %v3844_v21, %v3414_v54  ;;  %v3223_v18 = vcombine.high %v3215_v62, %v3215_v62 }
 0x1c9   : > { %v3231_v47 = vrot.slane %v3215_v62, %v5265_v8  ;;  %v3860_v46 = vcombine.high %v3851_v15, %v3851_v15  ;;  %v4066_v43 = vadd.f32 %v3851_v15, %v3411_v0  ;;  %v4067_v58 = vadd.f32 %v3859_v56, %v3412_v11 }
 0x1ca   : > { %v4192_v59 = vadd.f32 %v5621_v9, %v4065_v5  ;;  %v3861_v24 = vcombine.high %v3858_v12, %v3858_v12  ;;  %v4070_v57 = vadd.f32 %v3858_v12, %v3415_v35  ;;  %v4196_v4 = vadd.f32 %v5625_v30, %v4069_v40  ;;  %v6837_v5 = vld [vmem:[#allocation41_spill] sm:$0xff] }
 0x1cb   : > { %v3224_v3 = vcombine.high %v3222_v14, %v3222_v14  ;;  %v4068_v36 = vadd.f32 %v3860_v46, %v3413_v20  ;;  %v4193_v17 = vadd.f32 %v5629_v31, %v4066_v43  ;;  %v4194_v52 = vadd.f32 %v5609_v2, %v4067_v58 }
 0x1cc   : > { %vm4256_vm14 = vcmp.ge.f32.partialorder %v4192_v59, 0.0  ;;  %v4071_v34 = vadd.f32 %v3861_v24, %v3416_v44  ;;  %v4197_v54 = vadd.f32 %v5633_v32, %v4070_v57  ;;  %vm4260_vm15 = vcmp.ge.f32.partialorder %v4196_v4, 0.0  ;;  %v6840_v57 = vld [vmem:[#allocation37_spill] sm:$0xff] }
 0x1cd   : > { %v4320_v48 = vmul.f32 0.01, %v4192_v59  ;;  %v4195_v0 = vadd.f32 %v5615_v13, %v4068_v36  ;;  %vm4257_vm1 = vcmp.ge.f32.partialorder %v4193_v17, 0.0  ;;  %vm4258_vm2 = vcmp.ge.f32.partialorder %v4194_v52, 0.0 }
 0x1ce   : > { %v4321_v11 = vmul.f32 0.01, %v4193_v17  ;;  %v4198_v35 = vadd.f32 %v5606_v7, %v4071_v34  ;;  %vm4261_vm3 = vcmp.ge.f32.partialorder %v4197_v54, 0.0  ;;  %v4322_v6 = vmul.f32 0.01, %v4194_v52 }
 0x1cf   : > { %v4324_v20 = vmul.f32 0.01, %v4196_v4  ;;  %vm4259_vm4 = vcmp.ge.f32.partialorder %v4195_v0, 0.0  ;;  %v4323_v29 = vmul.f32 0.01, %v4195_v0  ;;  %v4384_v26 = vsel %vm4256_vm14, %v4192_v59, %v4320_v48 }
 0x1d0   : > { %v4325_v51 = vmul.f32 0.01, %v4197_v54  ;;  %v4326_v44 = vmul.f32 0.01, %v4198_v35  ;;  %v4385_v50 = vsel %vm4257_vm1, %v4193_v17, %v4321_v11  ;;  %v4386_v63 = vsel %vm4258_vm2, %v4194_v52, %v4322_v6  ;;  %v6845_v11 = vld [vmem:[#allocation45_spill] sm:$0xff] }
 0x1d1   : > { %v4388_v19 = vsel %vm4260_vm15, %v4196_v4, %v4324_v20  ;;  %v4387_v55 = vsel %vm4259_vm4, %v4195_v0, %v4323_v29  ;;  %v4716_v22 = vcombine.low %v4384_v26, %v4385_v50  ;;  %v3238_v28 = vrot.slane %v3222_v14, %v5265_v8  ;;  %v6844_v0 = vld [vmem:[#allocation42_spill] sm:$0xff] }
 0x1d2   : > { %v4389_v49 = vsel %vm4261_vm3, %v4197_v54, %v4325_v51  ;;  %v4717_v16 = vcombine.low %v4386_v63, %v4387_v55  ;;  %v3245_v25 = vrot.slane %v3223_v18, %v5265_v8  ;;  %v6554_v33 = vrot.slane %v3224_v3, %v5265_v8  ;;  %v6838_v18 = vld [vmem:[#allocation43_spill] sm:$0xff] }
 0x1d3   : > { %v4718_v41 = vcombine.low %v4388_v19, %v4389_v49  ;;  %v4732_v62 = vrot.slane %v4716_v22, %v5265_v8  ;;  %v3253_v42 = vcombine.high %v3231_v47, %v3231_v47  ;;  %v3418_v53 = vadd.f32 %v3231_v47, %v6511_v39  ;;  %v6839_v39 = vld [vmem:[#allocation40_spill] sm:$0xff] }
 0x1d4   : > { %v3422_v21 = vadd.f32 %v3238_v28, %v2087_v60  ;;  %v4739_v61 = vrot.slane %v4717_v16, %v5265_v8  ;;  %v3254_v56 = vcombine.high %v3245_v25, %v3245_v25  ;;  %v3419_v14 = vadd.f32 %v3245_v25, %v6837_v5 }
 0x1d5   : > { %v4746_v15 = vrot.slane %v4718_v41, %v5265_v8  ;;  %v4747_v12 = vcombine.low %v6507_v45, %v4732_v62  ;;  %v3420_v40 = vadd.f32 %v3253_v42, %v6519_v37  ;;  %v3423_v46 = vadd.f32 %v6554_v33, %v6838_v18  ;;  %v6841_v37 = vld [vmem:[#allocation44_spill] sm:$0xff] }
 0x1d6   : > { %v3862_v43 = vcombine.high %v6165_v27, %v6165_v27  ;;  %v3421_v60 = vadd.f32 %v3254_v56, %v6839_v39  ;;  %v3869_v47 = vrot.slane %v6165_v27, %v5265_v8  ;;  %vm4262_vm5 = vcmp.ge.f32.partialorder %v4198_v35, 0.0 }
 0x1d7   : > { %v4748_v58 = vcombine.low %v4739_v61, %v4746_v15  ;;  %v4755_v59 = vrot.slane %v4747_v12, %v5265_v8  ;;  %v4390_v45 = vsel %vm4262_vm5, %v4198_v35, %v4326_v44  ;;  %v6574_v4 = vadd.f32 %v6841_v37, %v6840_v57 }
 0x1d8   : > { %v3876_v24 = vrot.slane %v3862_v43, %v5265_v8  ;;  %v3877_v36 = vcombine.high %v3869_v47, %v3869_v47  ;;  %v3885_v17 = vrot.slane %v3869_v47, %v5265_v8  ;;  %v6842_v52 = vcombine.high %v6840_v57, %v6840_v57 }
 0x1d9   : > { %v4762_v3 = vrot.slane %v4748_v58, %v5265_v8  ;;  %v6843_v27 = vcombine.high %v6841_v37, %v6841_v37  ;;  %v6589_v35 = vadd.f32 %v6845_v11, %v6844_v0  ;;  %v6846_v6 = vcombine.high %v6844_v0, %v6844_v0 }
 0x1da   : > { %v3878_v54 = vcombine.high %v3876_v24, %v3876_v24  ;;  %v3892_v48 = vrot.slane %v3876_v24, %v5265_v8  ;;  %v6847_v20 = vcombine.high %v6845_v11, %v6845_v11  ;;  %v3899_v26 = vrot.slane %v3877_v36, %v5265_v8 }
 0x1db   : > { %v6584_v34 = vadd.f32 %v6843_v27, %v6842_v52  ;;  %v4763_v51 = vcombine.low %v4755_v59, %v4762_v3  ;;  %v3907_v44 = vcombine.high %v3885_v17, %v3885_v17  ;;  %v4072_v50 = vadd.f32 %v3885_v17, %v6534_v1 }
 0x1dc   : > { %v6597_v29 = vadd.f32 %v6847_v20, %v6846_v6  ;;  %v3906_v63 = vrot.slane %v3878_v54, %v5265_v8  ;;  %v3908_v19 = vcombine.high %v3892_v48, %v3892_v48  ;;  %v4076_v55 = vadd.f32 %v3892_v48, %v3421_v60 }
 0x1dd   : > { %v3256_v49 = vcombine.high %v6243_v23, %v6243_v23  ;;  %v4875_v22 = vpack.c.bf16 %v4763_v51, %v4763_v51  ;;  %v3909_v28 = vcombine.high %v3899_v26, %v3899_v26  ;;  %v4073_v16 = vadd.f32 %v3899_v26, %v3418_v53 }
 0x1de   : > { %v4074_v41 = vadd.f32 %v3907_v44, %v3419_v14  ;;  %v4077_v25 = vadd.f32 %v3906_v63, %v3422_v21  ;;  %v4078_v62 = vadd.f32 %v3908_v19, %v3423_v46  ;;  %v4199_v42 = vadd.f32 %v5612_v38, %v4072_v50 }
 0x1df   : > { %v4203_v61 = vadd.f32 %v5615_v13, %v4076_v55  ;;  %4884 = vst.msk [vmem:[%s6221_s4 + $0x14] sm:$0xf] %vm4878_vm0, %v4875_v22  ;;  %v4075_v1 = vadd.f32 %v3909_v28, %v3420_v40  ;;  %v4200_v15 = vadd.f32 %v5621_v9, %v4073_v16  ;;  %v3263_v5 = vrot.slane %v6243_v23, %v5265_v8 }
 0x1e0   : > { %v4201_v56 = vadd.f32 %v5629_v31, %v4074_v41  ;;  %v4204_v12 = vadd.f32 %v5625_v30, %v4077_v25  ;;  %v4205_v53 = vadd.f32 %v5633_v32, %v4078_v62  ;;  %vm4263_vm6 = vcmp.ge.f32.partialorder %v4199_v42, 0.0  ;;  %v6848_v41 = vld [vmem:[#allocation48_spill] sm:$0xff] }
 0x1e1   : > { %vm4267_vm7 = vcmp.ge.f32.partialorder %v4203_v61, 0.0  ;;  %v4202_v21 = vadd.f32 %v5609_v2, %v4075_v1  ;;  %vm4264_vm8 = vcmp.ge.f32.partialorder %v4200_v15, 0.0  ;;  %v4327_v14 = vmul.f32 0.01, %v4199_v42 }
 0x1e2   : > { %vm4265_vm9 = vcmp.ge.f32.partialorder %v4201_v56, 0.0  ;;  %vm4268_vm10 = vcmp.ge.f32.partialorder %v4204_v12, 0.0  ;;  %vm4269_vm11 = vcmp.ge.f32.partialorder %v4205_v53, 0.0  ;;  %v4328_v40 = vmul.f32 0.01, %v4200_v15 }
 0x1e3   : > { %v4329_v18 = vmul.f32 0.01, %v4201_v56  ;;  %vm4266_vm12 = vcmp.ge.f32.partialorder %v4202_v21, 0.0  ;;  %v4330_v46 = vmul.f32 0.01, %v4202_v21  ;;  %v4391_v58 = vsel %vm4263_vm6, %v4199_v42, %v4327_v14 }
 0x1e4   : > { %v4331_v43 = vmul.f32 0.01, %v4203_v61  ;;  %v4332_v23 = vmul.f32 0.01, %v4204_v12  ;;  %v4333_v39 = vmul.f32 0.01, %v4205_v53  ;;  %v4392_v60 = vsel %vm4264_vm8, %v4200_v15, %v4328_v40 }
 0x1e5   : > { %v4393_v47 = vsel %vm4265_vm9, %v4201_v56, %v4329_v18  ;;  %v4394_v59 = vsel %vm4266_vm12, %v4202_v21, %v4330_v46  ;;  %v4764_v57 = vcombine.low %v4390_v45, %v4391_v58  ;;  %v3270_v52 = vrot.slane %v3256_v49, %v5265_v8  ;;  %v6850_v56 = vld [vmem:[#allocation46_spill] sm:$0xff] }
 0x1e6   : > { %v4395_v24 = vsel %vm4267_vm7, %v4203_v61, %v4331_v43  ;;  %v4765_v37 = vcombine.low %v4392_v60, %v4393_v47  ;;  %v4396_v3 = vsel %vm4268_vm10, %v4204_v12, %v4332_v23  ;;  %v4397_v36 = vsel %vm4269_vm11, %v4205_v53, %v4333_v39  ;;  %v6849_v61 = vld [vmem:[#allocation49_spill] sm:$0xff] }
 0x1e7   : > { %v4766_v17 = vcombine.low %v4394_v59, %v4395_v24  ;;  %v4767_v27 = vcombine.low %v4396_v3, %v4397_v36  ;;  %v4774_v54 = vrot.slane %v4764_v57, %v5265_v8  ;;  %v3271_v0 = vcombine.high %v3263_v5, %v3263_v5 }
 0x1e8   : > { %v4781_v48 = vrot.slane %v4765_v37, %v5265_v8  ;;  %v3272_v6 = vcombine.high %v3270_v52, %v3270_v52  ;;  %v3279_v20 = vrot.slane %v3263_v5, %v5265_v8  ;;  %v3286_v45 = vrot.slane %v3270_v52, %v5265_v8 }
 0x1e9   : > { %v4788_v11 = vrot.slane %v4766_v17, %v5265_v8  ;;  %v4795_v51 = vrot.slane %v4767_v27, %v5265_v8  ;;  %v3293_v44 = vrot.slane %v3271_v0, %v5265_v8  ;;  %v3255_v50 = vcombine.high %v6554_v33, %v6554_v33 }
 0x1ea   : > { %v4796_v26 = vcombine.low %v4774_v54, %v4781_v48  ;;  %v3300_v63 = vrot.slane %v3272_v6, %v5265_v8  ;;  %v3301_v19 = vcombine.high %v3279_v20, %v3279_v20  ;;  %v3302_v55 = vcombine.high %v3286_v45, %v3286_v45 }
 0x1eb   : > { %v3425_v49 = vadd.f32 %v3279_v20, %v6574_v4  ;;  %v4797_v22 = vcombine.low %v4788_v11, %v4795_v51  ;;  %v3303_v16 = vcombine.high %v3293_v44, %v3293_v44  ;;  %v3426_v25 = vadd.f32 %v3293_v44, %v6848_v41  ;;  %v6851_v4 = vld [vmem:[#allocation47_spill] sm:$0xff] }
 0x1ec   : > { %v4804_v28 = vrot.slane %v4796_v26, %v5265_v8  ;;  %v3427_v62 = vadd.f32 %v3301_v19, %v6584_v34  ;;  %v3429_v42 = vadd.f32 %v3286_v45, %v6589_v35  ;;  %v3430_v1 = vadd.f32 %v3300_v63, %v6849_v61 }
 0x1ed   : > { %v3431_v33 = vadd.f32 %v3302_v55, %v6597_v29  ;;  %v4811_v15 = vrot.slane %v4797_v22, %v5265_v8  ;;  %v3424_v5 = vadd.f32 %v3255_v50, %v6850_v56  ;;  %v3428_v12 = vadd.f32 %v3303_v16, %v6851_v4 }
 0x1ee   : > { %v3910_v53 = vcombine.high %v6245_v10, %v6245_v10  ;;  %v3917_v21 = vrot.slane %v6245_v10, %v5265_v8 }
 0x1ef   : > { %v4812_v34 = vcombine.low %v4804_v28, %v4811_v15 }
 0x1f0   : > { %v3924_v35 = vrot.slane %v3910_v53, %v5265_v8  ;;  %v3925_v14 = vcombine.high %v3917_v21, %v3917_v21  ;;  %v3933_v40 = vrot.slane %v3917_v21, %v5265_v8 }
 0x1f1   : > { %v4876_v29 = vpack.c.bf16 %v4812_v34, %v4812_v34 }
 0x1f2   : > { %v3926_v18 = vcombine.high %v3924_v35, %v3924_v35  ;;  %v3940_v46 = vrot.slane %v3924_v35, %v5265_v8  ;;  %v3947_v43 = vrot.slane %v3925_v14, %v5265_v8  ;;  %v3955_v58 = vcombine.high %v3933_v40, %v3933_v40 }
 0x1f3   : > { %v4079_v23 = vadd.f32 %v3933_v40, %v3424_v5  ;;  %4885 = vst.msk [vmem:[%s6221_s4 + $0x18] sm:$0xf] %vm4878_vm0, %v4876_v29 }
 0x1f4   : > { %v3954_v39 = vrot.slane %v3926_v18, %v5265_v8  ;;  %v3956_v60 = vcombine.high %v3940_v46, %v3940_v46  ;;  %v4083_v10 = vadd.f32 %v3940_v46, %v3428_v12  ;;  %v3957_v47 = vcombine.high %v3947_v43, %v3947_v43 }
 0x1f5   : > { %v4080_v59 = vadd.f32 %v3947_v43, %v3425_v49  ;;  %v4081_v24 = vadd.f32 %v3955_v58, %v3426_v25  ;;  %v4206_v57 = vadd.f32 %v5606_v7, %v4079_v23 }
 0x1f6   : > { %v3958_v37 = vcombine.high %v3954_v39, %v3954_v39  ;;  %v4084_v3 = vadd.f32 %v3954_v39, %v3429_v42  ;;  %v4085_v36 = vadd.f32 %v3956_v60, %v3430_v1  ;;  %v4210_v17 = vadd.f32 %v5609_v2, %v4083_v10 }
 0x1f7   : > { %v4082_v52 = vadd.f32 %v3957_v47, %v3427_v62  ;;  %v4207_v27 = vadd.f32 %v5612_v38, %v4080_v59  ;;  %v4208_v54 = vadd.f32 %v5621_v9, %v4081_v24  ;;  %vm4270_vm13 = vcmp.ge.f32.partialorder %v4206_v57, 0.0 }
 0x1f8   : > { %v4086_v48 = vadd.f32 %v3958_v37, %v3431_v33  ;;  %v4211_v0 = vadd.f32 %v5615_v13, %v4084_v3  ;;  %v4212_v11 = vadd.f32 %v5625_v30, %v4085_v36  ;;  %vm4274_vm14 = vcmp.ge.f32.partialorder %v4210_v17, 0.0 }
 0x1f9   : > { %v4209_v6 = vadd.f32 %v5629_v31, %v4082_v52  ;;  %vm4271_vm15 = vcmp.ge.f32.partialorder %v4207_v27, 0.0  ;;  %vm4272_vm1 = vcmp.ge.f32.partialorder %v4208_v54, 0.0  ;;  %v4334_v7 = vmul.f32 0.01, %v4206_v57 }
 0x1fa   : > { %v4213_v20 = vadd.f32 %v5633_v32, %v4086_v48  ;;  %vm4275_vm2 = vcmp.ge.f32.partialorder %v4211_v0, 0.0  ;;  %vm4276_vm3 = vcmp.ge.f32.partialorder %v4212_v11, 0.0  ;;  %v4335_v2 = vmul.f32 0.01, %v4207_v27 }
 0x1fb   : > { %vm4273_vm4 = vcmp.ge.f32.partialorder %v4209_v6, 0.0  ;;  %v4336_v38 = vmul.f32 0.01, %v4208_v54  ;;  %v4337_v9 = vmul.f32 0.01, %v4209_v6  ;;  %v4398_v45 = vsel %vm4270_vm13, %v4206_v57, %v4334_v7 }
 0x1fc   : > { %vm4277_vm5 = vcmp.ge.f32.partialorder %v4213_v20, 0.0  ;;  %v4338_v13 = vmul.f32 0.01, %v4210_v17  ;;  %v4339_v51 = vmul.f32 0.01, %v4211_v0  ;;  %v4399_v30 = vsel %vm4271_vm15, %v4207_v27, %v4335_v2 }
 0x1fd   : > { %v4340_v26 = vmul.f32 0.01, %v4212_v11  ;;  %v4341_v44 = vmul.f32 0.01, %v4213_v20  ;;  %v4400_v31 = vsel %vm4272_vm1, %v4208_v54, %v4336_v38  ;;  %v4401_v50 = vsel %vm4273_vm4, %v4209_v6, %v4337_v9 }
 0x1fe   : > { %v4402_v63 = vsel %vm4274_vm14, %v4210_v17, %v4338_v13  ;;  %v4403_v32 = vsel %vm4275_vm2, %v4211_v0, %v4339_v51  ;;  %v4813_v19 = vcombine.low %v4398_v45, %v4399_v30  ;;  %v4814_v55 = vcombine.low %v4400_v31, %v4401_v50 }
 0x1ff   : > { %v4404_v49 = vsel %vm4276_vm3, %v4212_v11, %v4340_v26  ;;  %v4405_v22 = vsel %vm4277_vm5, %v4213_v20, %v4341_v44  ;;  %v4815_v28 = vcombine.low %v4402_v63, %v4403_v32 }
 0x200   : > { %v4816_v16 = vcombine.low %v4404_v49, %v4405_v22  ;;  %v4823_v41 = vrot.slane %v4813_v19, %v5265_v8  ;;  %v4830_v25 = vrot.slane %v4814_v55, %v5265_v8 }
 0x201   : > { %v4837_v62 = vrot.slane %v4815_v28, %v5265_v8 }
 0x202   : > { %v4844_v42 = vrot.slane %v4816_v16, %v5265_v8  ;;  %v4845_v61 = vcombine.low %v4823_v41, %v4830_v25 }
 0x204   : > { %v4846_v1 = vcombine.low %v4837_v62, %v4844_v42  ;;  %v4853_v33 = vrot.slane %v4845_v61, %v5265_v8 }
 0x206   : > { %v4860_v15 = vrot.slane %v4846_v1, %v5265_v8 }
 0x208   : > { %v4861_v56 = vcombine.low %v4853_v33, %v4860_v15 }
 0x20a   : > { %v4877_v5 = vpack.c.bf16 %v4861_v56, %v4861_v56 }
 0x20c   : > { %4886 = vst.msk [vmem:[%s6221_s4 + $0x1c] sm:$0xf] %vm4878_vm0, %v4877_v5 }
 0x20d PF: > { %s13_s12 = sadd.s32 1, %s5210_s12  }
 0x20e   : > { %p10_p4 = scmp.ge.s32.totalorder %s13_s12, 4  }
 0x210   :  { %12 = sbr.rel (!%p10_p4) target bundleno = 1 (0x1), region = 66 }

// kernel: vq_encoder_forward.5
= control target key start
LH: loop header
LB: loop body
LE: loop exit
PB: predicated region body
PF: predicated region fallthrough
CT: control target
= control target key end

     0   :  { %10 = vsyncpa [#allocation3], 0  ;;  %s3257_s0 = inlined_call_operand.vmem [shape: bf16[2,6,6,32], index: 0, kind: input, shape index: {}]   ;;  %s3258_s1 = inlined_call_operand.vmem [shape: bf16[9,32,32], index: 1, kind: input, shape index: {}]   ;;  %s3259_s2 = inlined_call_operand.vmem [shape: f32[1,1,32], index: 2, kind: input, shape index: {}]   ;;  %s3260_s3 = inlined_call_operand.vmem [shape: bf16[32,8], index: 3, kind: input, shape index: {}]   ;;  %s3261_s4 = inlined_call_operand.vmem [shape: f32[1,8], index: 4, kind: input, shape index: {}]   ;;  %s3262_s5 = inlined_call_operand.hbm [shape: f32[2,4,4,8], index: 5, kind: output, shape index: {}]  }
   0x1   :  { %12 = vsyncpa [#allocation3 + $0x1], 0  ;;  %s2705_s18 = smov 0   ;;  %s2707_s19 = smov 0  }
   0x2   :  { %s2709_s20 = smov 0   ;;  %s2711_s21 = smov 0  }
   0x3 LB: > { %s2726_s22 = sadd.s32 4294967295, %s2666_s21   ;;  %s2298_s23 = sadd.s32 4294967294, %s2666_s21   ;;  %s2666_s21 = sphi %s2711_s21, %s3272_s21   ;;  %s2662_s20 = sphi %s2709_s20, %s3271_s20   ;;  %s2658_s19 = sphi %s2707_s19, %s3270_s19   ;;  %s2654_s18 = sphi %s2705_s18, %s3269_s18  }
   0x4   : > { %s2730_s24 = sadd.s32 1, %s2666_s21   ;;  %s135_s25 = sadd.s32 1, %s2662_s20 }
   0x5   : > { %s132_s26 = ssub.s32 %s2666_s21, %s2730_s24  ;;  %p145_p0 = scmp.ne.s32.totalorder %s2662_s20, %s2658_s19 }
   0x6   : > { %p133_p1 = scmp.eq.s32.totalorder %s132_s26, 0  ;;  %p146_p2 = scmp.eq.s32.totalorder %s2726_s22, 1 }
   0x7   : > { %p151_p3 = scmp.ne.s32.totalorder %s2658_s19, %s2654_s18  ;;  %p152_p4 = scmp.eq.s32.totalorder %s2298_s23, 1 }
   0x8   : > { %s2741_s27 = scalar_select %p133_p1, %s2662_s20, %s135_s25  }
   0x9   : > { %p2743_p5 = por %p146_p2, %p145_p0  ;;  %p2747_p6 = por %p152_p4, %p151_p3 }
   0xa   : > { %p2301_p7 = scmp.ge.s32.totalorder %s2666_s21, 1  ;;  %p190_p8 = scmp.lt.s32.totalorder %s2666_s21, 3 }
   0xc   : > { %p191_p9 = pnand %p2301_p7, %p190_p8 }
   0xd   : > { %v2580_v0 = vld [vmem:[%s3258_s1] sm:$0xff] (!%p191_p9)   ;;  %p218_p10 = scmp.lt.s32.totalorder (!%p191_p9), %s2726_s22, 1  ;;  %v243_v1 = vlaneseq (!%p191_p9)  ;;  %v2581_v2 = vld [vmem:[%s3258_s1 + $0x10] sm:$0xff] (!%p191_p9)   ;;  %v2582_v3 = vld [vmem:[%s3258_s1 + $0x8] sm:$0xff] (!%p191_p9)   ;;  %v2668_v7 = vmov (!%p191_p9), 1966171168  }
   0xe   : > { %194 = sbr.rel (%p191_p9) target bundleno = 584 (0x248), region = 40  ;;  %2454 = vmatprep.subr.bf16.mxu0 (!%p191_p9), %v2580_v0  ;;  %2462 = vmatprep.subr.bf16.mxu1 (!%p191_p9), %v2581_v2  ;;  %v2583_v4 = vld [vmem:[%s3258_s1 + $0x18] sm:$0xff] (!%p191_p9)   ;;  %v2772_v6 = vld [vmem:[%s3258_s1 + $0x20] sm:$0xff] (!%p191_p9)   ;;  %v241_v8 = vunpack.c.l.s4 (!%p191_p9), %v2668_v7  ;;  %v2782_v9 = vld [vmem:[%s3258_s1 + $0x30] sm:$0xff] (!%p191_p9)   ;;  %vm413_vm0 = vcmask (!%p191_p9), 261120   ;;  %vm2670_vm1 = vmmov (!%p191_p9), 0  }
   0xf   : > { %2455 = vmatpush3.bf16.msra.mxu0 (!%p191_p9), %v2580_v0  ;;  %2463 = vmatpush3.bf16.msra.mxu1 (!%p191_p9), %v2581_v2  ;;  %v2767_v5 = vshrl.u32 (!%p191_p9), %v243_v1, 7  ;;  %vm647_vm2 = vcmask (!%p191_p9), 1040384   ;;  %vm648_vm3 = vcmask (!%p191_p9), 1042434   ;;  %vm650_vm5 = vcmask (!%p191_p9), 1044484   ;;  %s215_s6 = sand.u32 (!%p191_p9), 1, %s2658_s19   ;;  %s2414_s8 = sshll.u32 (!%p191_p9), %s2726_s22, 8 }
  0x10   : > { %2456 = vmatprep.subr.bf16.mxu0 (!%p191_p9), %v2582_v3  ;;  %2464 = vmatprep.subr.bf16.mxu1 (!%p191_p9), %v2583_v4  ;;  %v242_v11 = vunpack.c.0.s8 (!%p191_p9), %v241_v8  ;;  %v2586_v8 = vld [vmem:[%s3258_s1 + $0x28] sm:$0xff] (!%p191_p9)   ;;  %vm2914_vm4 = vmor (!%p191_p9), %vm647_vm2, %vm648_vm3  ;;  %vm652_vm6 = vcmask (!%p191_p9), 1046534   ;;  %s2302_s7 = sshll.u32 (!%p191_p9), %s215_s6, 4  ;;  %vm2217_vm2 = vcmask (!%p191_p9), 60416   ;;  %s3212_s13 = scalar_lea.hbm (!%p191_p9), %s3262_s5, %s2414_s8 }
  0x11   : > { %vm651_vm7 = vmor (!%p191_p9), %vm2914_vm4, %vm650_vm5  ;;  %s217_s9 = scalar_lea.vmem (!%p191_p9), [#allocation2], %s2302_s7  ;;  %s2672_s15 = smov (!%p191_p9), [#allocation2]  }
  0x12   : > { %v2789_v15 = vsub.s32 (!%p191_p9), %v242_v11, %v2767_v5  ;;  %vm2954_vm8 = vmor (!%p191_p9), %vm651_vm7, %vm652_vm6  ;;  %s2236_s10 = sshll.u32 (!%p191_p9), %s217_s9, 4  ;;  %s2608_s16 = sshll.u32 (!%p191_p9), %s2672_s15, 4  ;;  %s3214_s10 = int_to_ptr.vmem [resolvable:$true] %s2236_s10  ;;  %s2609_s16 = int_to_ptr.vmem [resolvable:$false] %s2608_s16 }
  0x13   : > { %2457 = vmatpush3.bf16.msra.mxu0 (!%p191_p9), %v2582_v3  ;;  %2465 = vmatpush3.bf16.msra.mxu1 (!%p191_p9), %v2583_v4  ;;  %s2610_s17 = scalar_lea.vmem (!%p191_p9), %s2609_s16, 512  ;;  %p2611_p0 = scmp.lt.s32.totalorder (!%p191_p9), %s3214_s10, %s2609_s16 }
  0x14   : > { %2470 = vmatprep.subr.bf16.mxu0 (!%p191_p9), %v2772_v6  ;;  %2478 = vmatprep.subr.bf16.mxu1 (!%p191_p9), %v2782_v9 }
  0x15   : > { %s219_s11 = scalar_select %p218_p10, %s2726_s22, 1 }
  0x16   : > { %s3216_s22 = scalar_lea.sflag [#allocation3], %s215_s6 }
  0x17   : > { %s2534_s14 = smul.u32 24, %s219_s11 }
  0x19   : > { %s2777_s25 = scalar_lea.vmem %s3257_s0, %s2534_s14  ;;  %s2604_s14 = scalar_lea.vmem %s3214_s10, 256 }
  0x1a   : > { %v2304_v10 = vld.sshfl [vmem:[%s2777_s25] sm:$0x13 pattern:$0x75316420]  ;;  %p2605_p11 = scmp.ne.s32.totalorder %s3214_s10, %s2604_s14  ;;  %p2612_p1 = scmp.lt.s32.totalorder %s2610_s17, %s2604_s14 }
  0x1b   : > { %v2305_v12 = vld.sshfl [vmem:[%s2777_s25 + $0x4] sm:$0x13 pattern:$0x75316420]  ;;  %v239_v13 = vcombine.high %v2304_v10, %v2304_v10  ;;  %v246_v19 = vrot.slane %v2304_v10, %v2789_v15  ;;  %v2587_v10 = vld [vmem:[%s3258_s1 + $0x38] sm:$0xff]  }
  0x1c   : > { %v2306_v14 = vld.sshfl [vmem:[%s2777_s25 + $0x8] sm:$0x13 pattern:$0x75316420]  ;;  %v262_v16 = vcombine.high %v2305_v12, %v2305_v12  ;;  %v269_v21 = vrot.slane %v2305_v12, %v2789_v15  ;;  %p2606_p12 = pnand %p2605_p11, %p2743_p5  ;;  %p2613_p2 = por %p2612_p1, %p2611_p0 }
  0x1d   : > { %v285_v17 = vcombine.high %v2306_v14, %v2306_v14  ;;  %v2307_v18 = vld.sshfl [vmem:[%s2777_s25 + $0xc] sm:$0x13 pattern:$0x75316420]  ;;  %v253_v20 = vrot.slane %v239_v13, %v2789_v15  ;;  %v292_v23 = vrot.slane %v2306_v14, %v2789_v15  ;;  %v254_v27 = vcombine.high %v246_v19, %v246_v19 }
  0x1e   : > { %v276_v22 = vrot.slane %v262_v16, %v2789_v15  ;;  %v308_v25 = vcombine.high %v2307_v18, %v2307_v18  ;;  %v315_v26 = vrot.slane %v2307_v18, %v2789_v15  ;;  %v277_v28 = vcombine.high %v269_v21, %v269_v21  ;;  %v2339_v35 = vld.sshfl [vmem:[%s2777_s25 + $0x10] sm:$0x13 pattern:$0x75316420]  ;;  %p2607_p13 = pneg %p2606_p12 }
  0x1f   : > { %v299_v24 = vrot.slane %v285_v17, %v2789_v15  ;;  %v328_v29 = vcombine.low %v246_v19, %v253_v20  ;;  %v300_v32 = vcombine.high %v292_v23, %v292_v23  ;;  %v329_v36 = vcombine.low %v254_v27, %v269_v21  ;;  %v2375_v63 = vld.sshfl [vmem:[%s2777_s25 + $0x14] sm:$0x13 pattern:$0x75316420]  ;;  %v2588_v19 = vld [vmem:[%s3258_s1 + $0x40] sm:$0xff]  }
  0x20   : > { %v937_v30 = vcombine.low %v269_v21, %v276_v22  ;;  %v322_v33 = vrot.slane %v308_v25, %v2789_v15  ;;  %v323_v34 = vcombine.high %v315_v26, %v315_v26  ;;  %v330_v37 = vcombine.low %v276_v22, %v277_v28  ;;  %v2589_v21 = vld [vmem:[%s3258_s1 + $0x50] sm:$0xff]   ;;  %v2591_v25 = vld [vmem:[%s3258_s1 + $0x58] sm:$0xff]   ;;  %p2614_p3 = pnand %p2613_p2, %p2607_p13 }
  0x21   : > { %v331_v31 = vcombine.low %v292_v23, %v299_v24  ;;  %v338_v38 = vrot.slane %v328_v29, %v2789_v15  ;;  %v938_v39 = vcombine.low %v277_v28, %v292_v23  ;;  %v377_v41 = vcombine.low %v300_v32, %v315_v26 }
  0x22   : > { %v378_v42 = vcombine.low %v322_v33, %v323_v34  ;;  %v939_v43 = vcombine.low %v299_v24, %v300_v32  ;;  %v345_v44 = vrot.slane %v329_v36, %v2789_v15  ;;  %v352_v45 = vrot.slane %v330_v37, %v2789_v15  ;;  %v2590_v24 = vld [vmem:[%s3258_s1 + $0x48] sm:$0xff]   ;;  %v2595_v37 = vld [vmem:[%s3258_s1 + $0x78] sm:$0xff]  }
  0x23   : > { %v2804_v40 = vrot.slane %v331_v31, %v2789_v15  ;;  %v940_v46 = vcombine.low %v315_v26, %v322_v33  ;;  %v947_v47 = vrot.slane %v937_v30, %v2789_v15  ;;  %v2810_v48 = vrot.slane %v377_v41, %v2789_v15  ;;  %v2592_v30 = vld [vmem:[%s3258_s1 + $0x60] sm:$0xff]   ;;  %v2593_v31 = vld [vmem:[%s3258_s1 + $0x70] sm:$0xff]   ;;  %v2594_v36 = vld [vmem:[%s3258_s1 + $0x68] sm:$0xff]  }
  0x24   : > { %v2813_v49 = vrot.slane %v378_v42, %v2789_v15  ;;  %v954_v50 = vrot.slane %v938_v39, %v2789_v15  ;;  %v961_v51 = vrot.slane %v939_v43, %v2789_v15  ;;  %v360_v52 = vcombine.low %v338_v38, %v345_v44  ;;  %v2597_v42 = vld [vmem:[%s3258_s1 + $0x88] sm:$0xff]  }
  0x25   : > { %v361_v53 = vcombine.low %v352_v45, %v2804_v40  ;;  %v968_v54 = vrot.slane %v940_v46, %v2789_v15  ;;  %v916_v55 = vcombine.high %v2339_v35, %v2339_v35  ;;  %v923_v58 = vrot.slane %v2339_v35, %v2789_v15  ;;  %v2599_v44 = vld [vmem:[%s3260_s3 + $0x8] sm:$0xff]  }
  0x26   : > { %v393_v56 = vcombine.low %v2810_v48, %v2813_v49  ;;  %v969_v57 = vcombine.low %v947_v47, %v954_v50  ;;  %v368_v59 = vrot.slane %v360_v52, %v2789_v15  ;;  %v1525_v17 = vcombine.high %v2375_v63, %v2375_v63 }
  0x27   : > { %v375_v60 = vrot.slane %v361_v53, %v2789_v15  ;;  %v970_v61 = vcombine.low %v961_v51, %v968_v54  ;;  %v930_v62 = vrot.slane %v916_v55, %v2789_v15  ;;  %v931_v2 = vcombine.high %v923_v58, %v923_v58 }
  0x28   : > { %v400_v0 = vrot.slane %v393_v56, %v2789_v15  ;;  %v977_v1 = vrot.slane %v969_v57, %v2789_v15  ;;  %v986_v3 = vcombine.low %v323_v34, %v923_v58  ;;  %v1532_v18 = vrot.slane %v2375_v63, %v2789_v15 }
  0x29   : > { %v376_v4 = vcombine.low %v368_v59, %v375_v60  ;;  %v984_v7 = vrot.slane %v970_v61, %v2789_v15  ;;  %v987_v11 = vcombine.low %v930_v62, %v931_v2  ;;  %v1549_v14 = vcombine.low %v923_v58, %v930_v62 }
  0x2a   : > { %v994_v12 = vrot.slane %v986_v3, %v2789_v15  ;;  %v1540_v23 = vcombine.high %v1532_v18, %v1532_v18  ;;  %v1578_v26 = vcombine.low %v2804_v40, %v2810_v48  ;;  %v1595_v28 = vcombine.low %v931_v2, %v1532_v18  ;;  %v2596_v40 = vld [vmem:[%s3258_s1 + $0x80] sm:$0xff]  }
  0x2b   : > { %2458 = vmatprep.mubr.msk.bf16.mxu0 %vm413_vm0, %v376_v4  ;;  %2466 = vmatprep.mubr.msk.bf16.mxu1 %vm413_vm0, %v376_v4  ;;  %v985_v13 = vcombine.low %v977_v1, %v984_v7  ;;  %v1001_v16 = vrot.slane %v987_v11, %v2789_v15  ;;  %v1577_v22 = vrot.slane %v1549_v14, %v2789_v15  ;;  %v2669_v43 = vmov 0.0   ;;  %v2404_v48 = vld [vmem:[%s3259_s2] ss:$0 sm:$0xff] }
  0x2c   : > { %2459 = vmatmul.mubr.msk.bf16.vlgmr.msra.gmra.mrb[0].mxu0 %vm413_vm0, %v400_v0  ;;  %2467 = vmatmul.mubr.msk.bf16.vlgmr.msra.gmra.mrb[0].mxu1 %vm413_vm0, %v400_v0  ;;  %v1586_v32 = vrot.slane %v1578_v26, %v2789_v15  ;;  %v1603_v34 = vrot.slane %v1595_v28, %v2789_v15  ;;  %v2671_v45 = vmov 1983009808  }
  0x2d   : > { %2471 = vmatpush3.bf16.msra.mxu0 %v2772_v6  ;;  %2479 = vmatpush3.bf16.msra.mxu1 %v2782_v9  ;;  %v1002_v20 = vcombine.low %v994_v12, %v1001_v16  ;;  %v1539_v9 = vrot.slane %v1525_v17, %v2789_v15  ;;  %v1579_v27 = vcombine.low %v2813_v49, %v1577_v22  ;;  %v473_v46 = vunpack.c.l.s4 %v2671_v45 }
  0x2e   : > { %2472 = vmatprep.subr.bf16.mxu0 %v2586_v8  ;;  %2480 = vmatprep.subr.bf16.mxu1 %v2587_v10 }
  0x2f   : > { %2474 = vmatprep.mubr.msk.bf16.mxu0 %vm413_vm0, %v376_v4  ;;  %2482 = vmatprep.mubr.msk.bf16.mxu1 %vm413_vm0, %v985_v13  ;;  %v1009_v6 = vrot.slane %v1002_v20, %v2789_v15  ;;  %v1596_v29 = vcombine.low %v1539_v9, %v1540_v23  ;;  %v1593_v33 = vrot.slane %v1579_v27, %v2789_v15  ;;  %v474_v47 = vunpack.c.0.s8 %v473_v46 }
  0x31   : > { %2473 = vmatpush3.bf16.msra.mxu0 %v2586_v8  ;;  %2481 = vmatpush3.bf16.msra.mxu1 %v2587_v10  ;;  %v1610_v35 = vrot.slane %v1596_v29, %v2789_v15  ;;  %v1594_v38 = vcombine.low %v1586_v32, %v1593_v33  ;;  %v2909_v49 = vsub.s32 %v474_v47, %v2767_v5 }
  0x32   : > { %2486 = vmatprep.subr.bf16.mxu0 %v2588_v19  ;;  %2494 = vmatprep.subr.bf16.mxu1 %v2589_v21 }
  0x33   : > { %v1611_v39 = vcombine.low %v1603_v34, %v1610_v35  ;;  %v2912_v50 = vrot.slane %v2404_v48, %v2909_v49 }
  0x34   : > { %2475 = vmatmul.mubr.msk.bf16.vlgmr.msra.gmra.mrb[4].mxu0 %vm413_vm0, %v400_v0  ;;  %2483 = vmatmul.mubr.msk.bf16.vlgmr.msra.gmra.mrb[4].mxu1 %vm413_vm0, %v1009_v6 }
  0x35   : > { %2487 = vmatpush3.bf16.msra.mxu0 %v2588_v19  ;;  %2495 = vmatpush3.bf16.msra.mxu1 %v2589_v21  ;;  %v1618_v41 = vrot.slane %v1611_v39, %v2789_v15  ;;  %v2598_v15 = vld [vmem:[%s3260_s3] sm:$0xff]   ;;  %v2920_v54 = vcombine.high %v2912_v50, %v2912_v50 }
  0x36   : > { %2488 = vmatprep.subr.bf16.mxu0 %v2590_v24  ;;  %2496 = vmatprep.subr.bf16.mxu1 %v2591_v25 }
  0x37   : > { %2490 = vmatprep.mubr.msk.bf16.mxu0 %vm413_vm0, %v985_v13  ;;  %2498 = vmatprep.mubr.msk.bf16.mxu1 %vm413_vm0, %v985_v13 }
  0x39   : > { %2489 = vmatpush3.bf16.msra.mxu0 %v2590_v24  ;;  %2497 = vmatpush3.bf16.msra.mxu1 %v2591_v25 }
  0x3a   : > { %2502 = vmatprep.subr.bf16.mxu0 %v2592_v30  ;;  %2510 = vmatprep.subr.bf16.mxu1 %v2593_v31 }
  0x3c   : > { %2491 = vmatmul.mubr.msk.bf16.vlgmr.msra.gmra.mrb[8].mxu0 %vm413_vm0, %v1009_v6  ;;  %2499 = vmatmul.mubr.msk.bf16.vlgmr.msra.gmra.mrb[8].mxu1 %vm413_vm0, %v1009_v6 }
  0x3d   : > { %2503 = vmatpush3.bf16.msra.mxu0 %v2592_v30  ;;  %2511 = vmatpush3.bf16.msra.mxu1 %v2593_v31 }
  0x3e   : > { %2504 = vmatprep.subr.bf16.mxu0 %v2594_v36  ;;  %2512 = vmatprep.subr.bf16.mxu1 %v2595_v37 }
  0x3f   : > { %2506 = vmatprep.mubr.msk.bf16.mxu0 %vm413_vm0, %v1594_v38  ;;  %2514 = vmatprep.mubr.msk.bf16.mxu1 %vm413_vm0, %v1594_v38 }
  0x41   : > { %2505 = vmatpush3.bf16.msra.mxu0 %v2594_v36  ;;  %2513 = vmatpush3.bf16.msra.mxu1 %v2595_v37 }
  0x42   : > { %2518 = vmatprep.subr.bf16.mxu0 %v2596_v40  ;;  %2526 = vmatprep.subr.bf16.mxu1 %v2669_v43 }
  0x44   : > { %2507 = vmatmul.mubr.msk.bf16.vlgmr.msra.gmra.mrb[12].mxu0 %vm413_vm0, %v1618_v41  ;;  %2515 = vmatmul.mubr.msk.bf16.vlgmr.msra.gmra.mrb[12].mxu1 %vm413_vm0, %v1618_v41 }
  0x45   : > { %2519 = vmatpush3.bf16.msra.mxu0 %v2596_v40  ;;  %2522 = vmatprep.mubr.msk.bf16.mxu0 %vm413_vm0, %v1594_v38 }
  0x46   : > { %2520 = vmatprep.subr.bf16.mxu0 %v2597_v42  ;;  %2530 = vmatprep.mubr.msk.bf16.mxu1 %vm2670_vm1, %v2669_v43 }
  0x47   : > { %2527 = vmatpush3.bf16.msra.mxu1 %v2598_v15 }
  0x48   : > { %2528 = vmatprep.subr.bf16.mxu1 %v2669_v43 }
  0x49   : > { %2521 = vmatpush3.bf16.msra.mxu0 %v2597_v42 }
  0x4b   : > { %2529 = vmatpush3.bf16.msra.mxu1 %v2599_v44 }
  0x4c   : > { %2523 = vmatmul.mubr.msk.bf16.vlgmr.msra.gmra.mrb[16].mxu0 %vm413_vm0, %v1618_v41 }
  0xff   : > { %v2460_v51 = vpop.f32.mrb[0].mxu0  ;;  %v2468_v52 = vpop.f32.mrb[0].mxu1 }
 0x100   : > { %v504_v55 = vcombine.high %v2460_v51, %v2460_v51  ;;  %v511_v5 = vrot.slane %v2460_v51, %v2909_v49  ;;  %v630_v56 = vcombine.high %v2468_v52, %v2468_v52  ;;  %v2924_v57 = vrot.slane %v2468_v52, %v2909_v49  ;;  %v454_v58 = vpop.f32.mrb[1].mxu0  ;;  %v579_v59 = vpop.f32.mrb[1].mxu1 }
 0x101   : > { %v471_v60 = vcombine.high %v454_v58, %v454_v58  ;;  %v2927_v61 = vrot.slane %v454_v58, %v2909_v49  ;;  %v596_v62 = vcombine.high %v579_v59, %v579_v59  ;;  %v2930_v63 = vrot.slane %v579_v59, %v2909_v49  ;;  %v2461_v0 = vpop.f32.mrb[2].mxu0  ;;  %v2469_v1 = vpop.f32.mrb[2].mxu1 }
 0x102   : > { %v518_v2 = vrot.slane %v504_v55, %v2909_v49  ;;  %v519_v3 = vcombine.high %v511_v5, %v511_v5  ;;  %v644_v4 = vrot.slane %v630_v56, %v2909_v49  ;;  %v645_v7 = vcombine.high %v2924_v57, %v2924_v57  ;;  %v2936_v8 = vpop.f32.mrb[3].mxu0  ;;  %v582_v10 = vpop.f32.mrb[3].mxu1 }
 0x103   : > { %v673_v11 = vrot.slane %v2924_v57, 7  ;;  %v2943_v12 = vrot.slane %v471_v60, %v2909_v49  ;;  %v486_v13 = vcombine.high %v2927_v61, %v2927_v61  ;;  %v610_v14 = vrot.slane %v596_v62, %v2909_v49 }
 0x104   : > { %v646_v16 = vcombine.high %v644_v4, %v644_v4  ;;  %v2323_v17 = vrot.slane %v645_v7, 9  ;;  %v677_v18 = vrot.slane %v644_v4, 7  ;;  %v611_v19 = vcombine.high %v2930_v63, %v2930_v63 }
 0x105   : > { %v487_v20 = vcombine.high %v2943_v12, %v2943_v12  ;;  %v612_v21 = vcombine.high %v610_v14, %v610_v14  ;;  %v2320_v22 = vrot.slane %v2930_v63, 9  ;;  %v659_v6 = vrot.slane %v610_v14, 7 }
 0x106   : > { %v679_v23 = vrot.slane %v677_v18, 2  ;;  %v680_v24 = vrot.slane %v646_v16, 7  ;;  %v656_v25 = vrot.slane %v611_v19, 7  ;;  %v488_v26 = vcombine.high %v2936_v8, %v2936_v8 }
 0x107   : > { %v2321_v27 = vrot.slane %v612_v21, 9  ;;  %v495_v28 = vrot.slane %v2936_v8, %v2909_v49  ;;  %v613_v29 = vcombine.high %v582_v10, %v582_v10  ;;  %v620_v30 = vrot.slane %v582_v10, %v2909_v49  ;;  %v2963_v31 = vpop.f32.mrb[4].mxu0  ;;  %v2484_v32 = vpop.f32.mrb[4].mxu1 }
 0x108   : > { %v658_v33 = vrot.slane %v656_v25, 2  ;;  %v502_v34 = vrot.slane %v488_v26, %v2909_v49  ;;  %v678_v35 = vsel %vm2954_vm8, %v2323_v17, %v677_v18  ;;  %v799_v36 = vcombine.high %v2963_v31, %v2963_v31  ;;  %v749_v37 = vpop.f32.mrb[5].mxu0  ;;  %v1062_v38 = vpop.f32.mrb[5].mxu1 }
 0x109   : > { %v627_v39 = vrot.slane %v613_v29, %v2909_v49  ;;  %v628_v40 = vcombine.high %v620_v30, %v620_v30  ;;  %v663_v41 = vrot.slane %v620_v30, 7  ;;  %v696_v42 = vadd.f32 %v678_v35, %v519_v3  ;;  %v2477_v15 = vpop.f32.mrb[6].mxu0  ;;  %v2485_v43 = vpop.f32.mrb[6].mxu1 }
 0x10a   : > { %v503_v44 = vcombine.high %v502_v34, %v502_v34  ;;  %v806_v45 = vrot.slane %v2963_v31, %v2909_v49  ;;  %v813_v46 = vrot.slane %v799_v36, %v2909_v49  ;;  %v681_v47 = vsel %vm2954_vm8, %v679_v23, %v680_v24  ;;  %v752_v48 = vpop.f32.mrb[7].mxu0  ;;  %v2976_v51 = vpop.f32.mrb[7].mxu1 }
 0x10b   : > { %v629_v52 = vcombine.high %v627_v39, %v627_v39  ;;  %v665_v53 = vrot.slane %v663_v41, 2  ;;  %v666_v55 = vrot.slane %v628_v40, 7  ;;  %v2322_v5 = vrot.slane %v627_v39, 9 }
 0x10c   : > { %v814_v56 = vcombine.high %v813_v46, %v813_v46  ;;  %v829_v58 = vadd.f32 %v813_v46, %v696_v42  ;;  %v697_v59 = vadd.f32 %v681_v47, %v518_v2  ;;  %v1112_v60 = vcombine.high %v2484_v32, %v2484_v32 }
 0x10d   : > { %v670_v62 = vrot.slane %v629_v52, 7  ;;  %v1119_v63 = vrot.slane %v2484_v32, %v2909_v49  ;;  %v657_v0 = vsel %vm2954_vm8, %v2320_v22, %v656_v25  ;;  %v660_v1 = vsel %vm2954_vm8, %v658_v33, %v659_v6 }
 0x10e   : > { %v830_v3 = vadd.f32 %v814_v56, %v697_v59  ;;  %v1126_v4 = vrot.slane %v1112_v60, %v2909_v49  ;;  %v690_v7 = vadd.f32 %v657_v0, %v2927_v61  ;;  %v691_v10 = vadd.f32 %v660_v1, %v486_v13 }
 0x10f   : > { %v672_v14 = vrot.slane %v670_v62, 2  ;;  %v1127_v16 = vcombine.high %v1119_v63, %v1119_v63  ;;  %v766_v17 = vcombine.high %v749_v37, %v749_v37  ;;  %v773_v2 = vrot.slane %v749_v37, %v2909_v49  ;;  %v2492_v18 = vpop.f32.mrb[8].mxu0  ;;  %v2986_v19 = vpop.f32.mrb[8].mxu1 }
 0x110   : > { %v2988_v21 = vadd.f32 %v1126_v4, %v830_v3  ;;  %v1079_v22 = vcombine.high %v1062_v38, %v1062_v38  ;;  %v1086_v23 = vrot.slane %v1062_v38, %v2909_v49  ;;  %v664_v6 = vsel %vm2954_vm8, %v2321_v27, %v663_v41  ;;  %v2993_v24 = vpop.f32.mrb[9].mxu0  ;;  %v2995_v61 = vpop.f32.mrb[9].mxu1 }
 0x111   : > { %v674_v13 = vsel %vm2954_vm8, %v672_v14, %v673_v11  ;;  %v3001_v25 = vadd.f32 %v1127_v16, %v829_v58  ;;  %v780_v26 = vrot.slane %v766_v17, %v2909_v49  ;;  %v781_v29 = vcombine.high %v773_v2, %v773_v2  ;;  %v2493_v30 = vpop.f32.mrb[10].mxu0  ;;  %v2501_v31 = vpop.f32.mrb[10].mxu1 }
 0x112   : > { %v695_v32 = vadd.f32 %v674_v13, %v503_v44  ;;  %v1093_v33 = vrot.slane %v1079_v22, %v2909_v49  ;;  %v1094_v27 = vcombine.high %v1086_v23, %v1086_v23  ;;  %v671_v35 = vsel %vm2954_vm8, %v2322_v5, %v670_v62  ;;  %v3007_v36 = vpop.f32.mrb[11].mxu0  ;;  %v3009_v57 = vpop.f32.mrb[11].mxu1 }
 0x113   : > { %v823_v37 = vadd.f32 %v781_v29, %v690_v7  ;;  %v824_v11 = vadd.f32 %v780_v26, %v691_v10  ;;  %v692_v38 = vadd.f32 %v664_v6, %v487_v20  ;;  %v694_v39 = vadd.f32 %v671_v35, %v502_v34 }
 0x114   : > { %v828_v40 = vadd.f32 %v806_v45, %v695_v32  ;;  %v1095_v41 = vcombine.high %v1093_v33, %v1093_v33  ;;  %v782_v42 = vcombine.high %v752_v48, %v752_v48  ;;  %v789_v15 = vrot.slane %v752_v48, %v2909_v49 }
 0x115   : > { %v3015_v43 = vadd.f32 %v1086_v23, %v823_v37  ;;  %v3017_v44 = vadd.f32 %v1094_v27, %v824_v11  ;;  %v667_v46 = vsel %vm2954_vm8, %v665_v53, %v666_v55  ;;  %v1096_v47 = vcombine.high %v2976_v51, %v2976_v51 }
 0x116   : > { %v796_v52 = vrot.slane %v782_v42, %v2909_v49  ;;  %v797_v12 = vcombine.high %v789_v15, %v789_v15  ;;  %v825_v20 = vadd.f32 %v789_v15, %v692_v38  ;;  %v693_v34 = vadd.f32 %v667_v46, %v495_v28 }
 0x117   : > { %v1103_v45 = vrot.slane %v2976_v51, %v2909_v49  ;;  %v1110_v48 = vrot.slane %v1096_v47, %v2909_v49  ;;  %v1246_v5 = vcombine.high %v2492_v18, %v2492_v18  ;;  %v3031_v56 = vrot.slane %v2492_v18, %v2909_v49  ;;  %v3033_v53 = vpop.f32.mrb[12].mxu0  ;;  %v3035_v55 = vpop.f32.mrb[12].mxu1 }
 0x118   : > { %v798_v58 = vcombine.high %v796_v52, %v796_v52  ;;  %v3037_v59 = vadd.f32 %v1095_v41, %v825_v20  ;;  %v826_v60 = vadd.f32 %v797_v12, %v693_v34  ;;  %v1408_v8 = vcombine.high %v2986_v19, %v2986_v19  ;;  %v3041_v28 = vpop.f32.mrb[13].mxu0  ;;  %v3043_v51 = vpop.f32.mrb[13].mxu1 }
 0x119   : > { %v1111_v62 = vcombine.high %v1110_v48, %v1110_v48  ;;  %v1260_v63 = vrot.slane %v1246_v5, %v2909_v49  ;;  %v1261_v0 = vcombine.high %v3031_v56, %v3031_v56  ;;  %v1282_v1 = vrot.slane %v3031_v56, 7  ;;  %v2509_v3 = vpop.f32.mrb[14].mxu0  ;;  %v2517_v4 = vpop.f32.mrb[14].mxu1 }
 0x11a   : > { %v827_v7 = vadd.f32 %v798_v58, %v694_v39  ;;  %v3049_v10 = vadd.f32 %v1103_v45, %v826_v60  ;;  %v1415_v14 = vrot.slane %v2986_v19, %v2909_v49  ;;  %v3054_v16 = vrot.slane %v1408_v8, %v2909_v49  ;;  %v3056_v17 = vpop.f32.mrb[15].mxu0  ;;  %v3058_v2 = vpop.f32.mrb[15].mxu1 }
 0x11b   : > { %v3060_v18 = vadd.f32 %v1111_v62, %v828_v40  ;;  %v1262_v22 = vcombine.high %v1260_v63, %v1260_v63  ;;  %v2359_v23 = vrot.slane %v1261_v0, 9  ;;  %v1286_v6 = vrot.slane %v1260_v63, 7 }
 0x11c   : > { %v1140_v13 = vadd.f32 %v1110_v48, %v827_v7  ;;  %v1423_v26 = vcombine.high %v3054_v16, %v3054_v16  ;;  %v1212_v29 = vcombine.high %v2993_v24, %v2993_v24  ;;  %v1219_v30 = vrot.slane %v2993_v24, %v2909_v49 }
 0x11d   : > { %v1288_v31 = vrot.slane %v1286_v6, 2  ;;  %v1289_v32 = vrot.slane %v1262_v22, 7  ;;  %v1287_v33 = vsel %vm2954_vm8, %v2359_v23, %v1286_v6  ;;  %v1375_v27 = vcombine.high %v2995_v61, %v2995_v61 }
 0x11e   : > { %v1305_v35 = vadd.f32 %v1287_v33, %v3001_v25  ;;  %v1226_v37 = vrot.slane %v1212_v29, %v2909_v49  ;;  %v1227_v11 = vcombine.high %v1219_v30, %v1219_v30  ;;  %v2356_v38 = vrot.slane %v1219_v30, 9 }
 0x11f   : > { %v1382_v39 = vrot.slane %v2995_v61, %v2909_v49  ;;  %v1389_v40 = vrot.slane %v1375_v27, %v2909_v49  ;;  %v1229_v24 = vcombine.high %v3007_v36, %v3007_v36  ;;  %v1236_v41 = vrot.slane %v3007_v36, %v2909_v49  ;;  %v3081_v42 = vpop.f32.mrb[16].mxu0 }
 0x120   : > { %v1438_v15 = vadd.f32 %v3054_v16, %v1305_v35  ;;  %v1228_v25 = vcombine.high %v1226_v37, %v1226_v37  ;;  %v1265_v46 = vrot.slane %v1227_v11, 7  ;;  %v1268_v47 = vrot.slane %v1226_v37, 7  ;;  %v3084_v52 = vpop.f32.mrb[17].mxu0 }
 0x121   : > { %v1390_v12 = vcombine.high %v1382_v39, %v1382_v39  ;;  %v1243_v61 = vrot.slane %v1229_v24, %v2909_v49  ;;  %v1244_v20 = vcombine.high %v1236_v41, %v1236_v41  ;;  %v1272_v34 = vrot.slane %v1236_v41, 7  ;;  %v2525_v45 = vpop.f32.mrb[18].mxu0 }
 0x122   : > { %v1267_v48 = vrot.slane %v1265_v46, 2  ;;  %v2357_v5 = vrot.slane %v1228_v25, 9  ;;  %v1266_v36 = vsel %vm2954_vm8, %v2356_v38, %v1265_v46  ;;  %v1391_v58 = vcombine.high %v3009_v57, %v3009_v57  ;;  %v3091_v60 = vpop.f32.mrb[19].mxu0 }
 0x123   : > { %v1299_v8 = vadd.f32 %v1266_v36, %v3015_v43  ;;  %v1245_v62 = vcombine.high %v1243_v61, %v1243_v61  ;;  %v1274_v63 = vrot.slane %v1272_v34, 2  ;;  %v1275_v0 = vrot.slane %v1244_v20, 7 }
 0x124   : > { %v1269_v3 = vsel %vm2954_vm8, %v1267_v48, %v1268_v47  ;;  %v2358_v4 = vrot.slane %v1243_v61, 9  ;;  %v1273_v7 = vsel %vm2954_vm8, %v2357_v5, %v1272_v34  ;;  %v1398_v16 = vrot.slane %v3009_v57, %v2909_v49 }
 0x125   : > { %v1300_v22 = vadd.f32 %v1269_v3, %v3017_v44  ;;  %v1432_v23 = vadd.f32 %v1390_v12, %v1299_v8  ;;  %v3101_v6 = vrot.slane %v1245_v62, 7  ;;  %v1301_v43 = vadd.f32 %v1273_v7, %v3037_v59 }
 0x126   : > { %v1405_v29 = vrot.slane %v1391_v58, %v2909_v49  ;;  %v1406_v30 = vcombine.high %v1398_v16, %v1398_v16  ;;  %v1290_v33 = vsel %vm2954_vm8, %v1288_v31, %v1289_v32  ;;  %v1721_v27 = vcombine.high %v3033_v53, %v3033_v53 }
 0x127   : > { %v1433_v35 = vadd.f32 %v1389_v40, %v1300_v22  ;;  %v1281_v37 = vrot.slane %v3101_v6, 2  ;;  %v1280_v57 = vsel %vm2954_vm8, %v2358_v4, %v3101_v6  ;;  %v1434_v44 = vadd.f32 %v1398_v16, %v1301_v43 }
 0x128   : > { %v1303_v11 = vadd.f32 %v1280_v57, %v1140_v13  ;;  %v1407_v38 = vcombine.high %v1405_v29, %v1405_v29  ;;  %v1306_v59 = vadd.f32 %v1290_v33, %v2988_v21  ;;  %v1728_v39 = vrot.slane %v3033_v53, %v2909_v49 }
 0x129   : > { %v1735_v31 = vrot.slane %v1721_v27, %v2909_v49  ;;  %v1855_v32 = vcombine.high %v3035_v55, %v3035_v55  ;;  %v3121_v40 = vrot.slane %v3035_v55, %v2909_v49  ;;  %v1688_v24 = vcombine.high %v3041_v28, %v3041_v28 }
 0x12a   : > { %v1436_v41 = vadd.f32 %v1407_v38, %v1303_v11  ;;  %v1439_v13 = vadd.f32 %v1423_v26, %v1306_v59  ;;  %v1736_v25 = vcombine.high %v1728_v39, %v1728_v39  ;;  %v1695_v21 = vrot.slane %v3041_v28, %v2909_v49 }
 0x12b   : > { %v1869_v53 = vrot.slane %v1855_v32, %v2909_v49  ;;  %v1870_v46 = vcombine.high %v3121_v40, %v3121_v40  ;;  %v1891_v47 = vrot.slane %v3121_v40, 7  ;;  %v1702_v12 = vrot.slane %v1688_v24, %v2909_v49 }
 0x12c   : > { %v1751_v55 = vadd.f32 %v1736_v25, %v1438_v15  ;;  %v1752_v61 = vadd.f32 %v1735_v31, %v1439_v13  ;;  %v1703_v20 = vcombine.high %v1695_v21, %v1695_v21  ;;  %v1745_v34 = vadd.f32 %v1695_v21, %v1432_v23 }
 0x12d   : > { %v1871_v45 = vcombine.high %v1869_v53, %v1869_v53  ;;  %v2395_v48 = vrot.slane %v1870_v46, 9  ;;  %v1895_v26 = vrot.slane %v1869_v53, 7  ;;  %v1704_v5 = vcombine.high %v1702_v12, %v1702_v12 }
 0x12e   : > { %v1746_v36 = vadd.f32 %v1703_v20, %v1433_v35  ;;  %v1821_v28 = vcombine.high %v3043_v51, %v3043_v51  ;;  %v1828_v58 = vrot.slane %v3043_v51, %v2909_v49  ;;  %v1276_v8 = vsel %vm2954_vm8, %v1274_v63, %v1275_v0 }
 0x12f   : > { %v1897_v62 = vrot.slane %v1895_v26, 2  ;;  %v1898_v3 = vrot.slane %v1871_v45, 7  ;;  %v1747_v15 = vadd.f32 %v1704_v5, %v1434_v44  ;;  %v1302_v4 = vadd.f32 %v1276_v8, %v3049_v10 }
 0x130   : > { %v1835_v7 = vrot.slane %v1821_v28, %v2909_v49  ;;  %v1836_v16 = vcombine.high %v1828_v58, %v1828_v58  ;;  %v2392_v22 = vrot.slane %v1828_v58, 9  ;;  %v1705_v23 = vcombine.high %v3056_v17, %v3056_v17 }
 0x131   : > { %v1435_v6 = vadd.f32 %v1406_v30, %v1302_v4  ;;  %v1712_v43 = vrot.slane %v3056_v17, %v2909_v49  ;;  %v1838_v51 = vcombine.high %v3058_v2, %v3058_v2  ;;  %v1845_v63 = vrot.slane %v3058_v2, %v2909_v49 }
 0x132   : > { %v1837_v0 = vcombine.high %v1835_v7, %v1835_v7  ;;  %v1874_v29 = vrot.slane %v1836_v16, 7  ;;  %v1877_v10 = vrot.slane %v1835_v7, 7  ;;  %v1719_v33 = vrot.slane %v1705_v23, %v2909_v49 }
 0x133   : > { %v1748_v27 = vadd.f32 %v1712_v43, %v1435_v6  ;;  %v1852_v35 = vrot.slane %v1838_v51, %v2909_v49  ;;  %v1853_v57 = vcombine.high %v1845_v63, %v1845_v63  ;;  %v1881_v44 = vrot.slane %v1845_v63, 7 }
 0x134   : > { %v1876_v30 = vrot.slane %v1874_v29, 2  ;;  %v2393_v11 = vrot.slane %v1837_v0, 9  ;;  %v1720_v38 = vcombine.high %v1719_v33, %v1719_v33  ;;  %v1749_v17 = vadd.f32 %v1719_v33, %v1436_v41 }
 0x135   : > { %v1854_v59 = vcombine.high %v1852_v35, %v1852_v35  ;;  %v1883_v39 = vrot.slane %v1881_v44, 2  ;;  %v1884_v31 = vrot.slane %v1853_v57, 7  ;;  %v2394_v32 = vrot.slane %v1852_v35, 9 }
 0x136   : > { %v1283_v2 = vsel %vm2954_vm8, %v1281_v37, %v1282_v1  ;;  %v1896_v24 = vsel %vm2954_vm8, %v2395_v48, %v1895_v26  ;;  %v1899_v13 = vsel %vm2954_vm8, %v1897_v62, %v1898_v3  ;;  %v2017_v25 = vcombine.high %v3081_v42, %v3081_v42 }
 0x137   : > { %v1888_v21 = vrot.slane %v1854_v59, 7  ;;  %v1304_v41 = vadd.f32 %v1283_v2, %v3060_v18  ;;  %v1914_v53 = vadd.f32 %v1896_v24, %v1751_v55  ;;  %v1915_v46 = vadd.f32 %v1899_v13, %v1752_v61 }
 0x138   : > { %v2024_v56 = vrot.slane %v3081_v42, %v2909_v49  ;;  %v2031_v12 = vrot.slane %v2017_v25, %v2909_v49  ;;  %v1875_v1 = vsel %vm2954_vm8, %v2392_v22, %v1874_v29  ;;  %v1878_v37 = vsel %vm2954_vm8, %v1876_v30, %v1877_v10 }
 0x139   : > { %v1890_v20 = vrot.slane %v1888_v21, 2  ;;  %v1437_v45 = vadd.f32 %v1415_v14, %v1304_v41  ;;  %v1908_v48 = vadd.f32 %v1875_v1, %v1745_v34  ;;  %v1909_v18 = vadd.f32 %v1878_v37, %v1746_v36 }
 0x13a   : > { %v2032_v55 = vcombine.high %v2031_v12, %v2031_v12  ;;  %v2047_v61 = vadd.f32 %v2031_v12, %v1914_v53  ;;  %v1984_v42 = vcombine.high %v3084_v52, %v3084_v52  ;;  %v1991_v26 = vrot.slane %v3084_v52, %v2909_v49 }
 0x13b   : > { %v1750_v5 = vadd.f32 %v1720_v38, %v1437_v45  ;;  %v1892_v28 = vsel %vm2954_vm8, %v1890_v20, %v1891_v47  ;;  %v1882_v19 = vsel %vm2954_vm8, %v2393_v11, %v1881_v44  ;;  %v1885_v14 = vsel %vm2954_vm8, %v1883_v39, %v1884_v31 }
 0x13c   : > { %v2048_v34 = vadd.f32 %v2032_v55, %v1915_v46  ;;  %v2071_v36 = vadd.f32 %v2912_v50, %v2047_v61  ;;  %v1998_v58 = vrot.slane %v1984_v42, %v2909_v49  ;;  %v1999_v8 = vcombine.high %v1991_v26, %v1991_v26 }
 0x13d   : > { %v1913_v62 = vadd.f32 %v1892_v28, %v1750_v5  ;;  %v1889_v52 = vsel %vm2954_vm8, %v2394_v32, %v1888_v21  ;;  %v1910_v40 = vadd.f32 %v1882_v19, %v1747_v15  ;;  %v1911_v3 = vadd.f32 %v1885_v14, %v1748_v27 }
 0x13e   : > { %v2072_v47 = vadd.f32 %v2920_v54, %v2048_v34  ;;  %vm2079_vm9 = vcmp.ge.f32.partialorder %v2071_v36, 0.0  ;;  %v2087_v4 = vmul.f32 0.01, %v2071_v36  ;;  %v2041_v7 = vadd.f32 %v1999_v8, %v1908_v48 }
 0x13f   : > { %v2046_v16 = vadd.f32 %v2024_v56, %v1913_v62  ;;  %v2042_v22 = vadd.f32 %v1998_v58, %v1909_v18  ;;  %v1912_v23 = vadd.f32 %v1889_v52, %v1749_v17  ;;  %v2000_v6 = vcombine.high %v3091_v60, %v3091_v60  ;;  %v2405_v18 = vld [vmem:[%s3261_s4] ss:$0 sm:$0xff] }
 0x140   : > { %vm2080_vm10 = vcmp.ge.f32.partialorder %v2072_v47, 0.0  ;;  %v2088_v43 = vmul.f32 0.01, %v2072_v47  ;;  %v2065_v51 = vadd.f32 %v2912_v50, %v2041_v7  ;;  %v2007_v63 = vrot.slane %v3091_v60, %v2909_v49 }
 0x141   : > { %v2070_v9 = vadd.f32 %v2920_v54, %v2046_v16  ;;  %v2066_v15 = vadd.f32 %v2920_v54, %v2042_v22  ;;  %v2014_v0 = vrot.slane %v2000_v6, %v2909_v49  ;;  %v2095_v29 = vsel %vm2079_vm9, %v2071_v36, %v2087_v4 }
 0x142   : > { %v2096_v10 = vsel %vm2080_vm10, %v2072_v47, %v2088_v43  ;;  %vm2073_vm11 = vcmp.ge.f32.partialorder %v2065_v51, 0.0  ;;  %v2081_v33 = vmul.f32 0.01, %v2065_v51  ;;  %v2015_v44 = vcombine.high %v2007_v63, %v2007_v63 }
 0x143   : > { %v2123_v27 = vcombine.low %v2095_v29, %v2096_v10  ;;  %vm2074_vm12 = vcmp.ge.f32.partialorder %v2066_v15, 0.0  ;;  %v2082_v35 = vmul.f32 0.01, %v2066_v15  ;;  %v2016_v30 = vcombine.high %v2014_v0, %v2014_v0 }
 0x144   : > { %v2089_v57 = vsel %vm2073_vm11, %v2065_v51, %v2081_v33  ;;  %v2086_v11 = vmul.f32 0.01, %v2070_v9  ;;  %v2043_v17 = vadd.f32 %v2007_v63, %v1910_v40  ;;  %vm2078_vm13 = vcmp.ge.f32.partialorder %v2070_v9, 0.0 }
 0x145   : > { %v2137_v38 = vrot.slane %v2123_v27, %v2909_v49  ;;  %v2090_v59 = vsel %vm2074_vm12, %v2066_v15, %v2082_v35  ;;  %v2044_v39 = vadd.f32 %v2015_v44, %v1911_v3  ;;  %v2045_v60 = vadd.f32 %v2016_v30, %v1912_v23 }
 0x146   : > { %v2105_v31 = vcombine.low %v2089_v57, %v2090_v59  ;;  %v2067_v32 = vadd.f32 %v2912_v50, %v2043_v17  ;;  %v2094_v13 = vsel %vm2078_vm13, %v2070_v9, %v2086_v11 }
 0x147   : > { %v2068_v2 = vadd.f32 %v2920_v54, %v2044_v39  ;;  %v2069_v24 = vadd.f32 %v2912_v50, %v2045_v60 }
 0x148   : > { %v2113_v25 = vrot.slane %v2105_v31, %v2909_v49  ;;  %vm2075_vm14 = vcmp.ge.f32.partialorder %v2067_v32, 0.0  ;;  %v2083_v21 = vmul.f32 0.01, %v2067_v32 }
 0x149   : > { %vm2076_vm15 = vcmp.ge.f32.partialorder %v2068_v2, 0.0  ;;  %vm2077_vm1 = vcmp.ge.f32.partialorder %v2069_v24, 0.0  ;;  %v2084_v41 = vmul.f32 0.01, %v2068_v2  ;;  %v2085_v53 = vmul.f32 0.01, %v2069_v24 }
 0x14a   : > { %v2091_v46 = vsel %vm2075_vm14, %v2067_v32, %v2083_v21 }
 0x14b   : > { %v2092_v56 = vsel %vm2076_vm15, %v2068_v2, %v2084_v41  ;;  %v2093_v12 = vsel %vm2077_vm1, %v2069_v24, %v2085_v53 }
 0x14c   : > { %v2106_v1 = vcombine.low %v2091_v46, %v2092_v56  ;;  %v2122_v37 = vcombine.low %v2093_v12, %v2094_v13 }
 0x14e   : > { %v2120_v20 = vrot.slane %v2106_v1, %v2909_v49  ;;  %v2130_v54 = vrot.slane %v2122_v37, %v2909_v49 }
 0x150   : > { %v2121_v50 = vcombine.low %v2113_v25, %v2120_v20  ;;  %v2138_v45 = vcombine.low %v2130_v54, %v2137_v38 }
 0x152   : > { %v2141_v48 = vpack.c.bf16 %v2138_v45, %v2121_v50 }
 0x154   : > { %2531 = vmatmul.mubr.msk.bf16.vlgmr.msra.gmra.mrb[16].mxu1 %vm413_vm0, %v2141_v48 }
 0x227   : > { %v2202_v55 = vpop.f32.mrb[16].mxu1 }
 0x228   : > { %v2203_v61 = vadd.f32 %v2405_v18, %v2202_v55  ;;  %v2532_v42 = vpop.f32.mrb[17].mxu1 }
 0x229   : > { %v2205_v26 = vpop.f32.mrb[18].mxu1 }
 0x22a   : > { %2600 = vtanh.f32 %v2203_v61  ;;  %v2206_v5 = vadd.f32 %v2405_v18, %v2205_v26  ;;  %v2533_v28 = vpop.f32.mrb[19].mxu1 }
 0x22c   : > { %2602 = vtanh.f32 %v2206_v5 }
 0x234   : > { %v2601_v49 = vpop.eup %2600 }
 0x235   : > { %v2213_v19 = vcombine.high %v2601_v49, %v2601_v49  ;;  %2218 = vst.msk [vmem:[%s217_s9] sm:$0xf] %vm2217_vm2, %v2601_v49 }
 0x236   : > { %v2603_v14 = vpop.eup %2602 }
 0x237   : > { %2219 = vst.msk [vmem:[%s217_s9 + $0x4] sm:$0xf] %vm2217_vm2, %v2213_v19  ;;  %v2214_v34 = vcombine.high %v2603_v14, %v2603_v14  ;;  %2220 = vst.msk [vmem:[%s217_s9 + $0x8] sm:$0xf] %vm2217_vm2, %v2603_v14 }
 0x239   : > { %2221 = vst.msk [vmem:[%s217_s9 + $0xc] sm:$0xf] %vm2217_vm2, %v2214_v34 }
 0x23a   : > { %2617 = shalt.err (!%p2614_p3)
}
 0x23b   : > { %s2618_s23 = scalar_lea.hbm %s3212_s13, 256  ;;  %s2622_s30 = scalar_lea.hbm %s3262_s5, 512 }
 0x23c   : > { %p2619_p4 = scmp.ne.s32.totalorder %s3212_s13, %s2618_s23  ;;  %p2623_p9 = scmp.lt.u32.totalorder %s3212_s13, %s3262_s5 }
 0x23d   : > { %p2624_p10 = scmp.lt.u32.totalorder %s2622_s30, %s2618_s23  ;;  %p2626_p12 = scmp.lt.u32.totalorder %s2618_s23, %s3212_s13 }
 0x23e   : > { %p2620_p7 = pnand %p2619_p4, %p2743_p5 }
 0x23f   : > { %p2625_p11 = por %p2624_p10, %p2623_p9 }
 0x240   : > { %p2621_p8 = pneg %p2620_p7 }
 0x241   : > { %p2627_p13 = por %p2626_p12, %p2625_p11 }
 0x243   : > { %p2628_p0 = pnand %p2627_p13, %p2621_p8 }
 0x245   : > { %2631 = shalt.err (!%p2628_p0)
}
 0x246   : > { %s2673_s8 = smov 64   ;;  %s2674_s9 = smov 4  }
 0x247   : > { %2535 = dma.vmem_to_hbm [thread:$0]  (%p2743_p5), %s3214_s10, 256, %s3212_s13, %s3216_s22, %s2673_s8, %s2673_s8, %s2674_s9  }
 0x248 PF: > { %p2541_p1 = scmp.ge.s32.totalorder %s2666_s21, 2  ;;  %s2251_s11 = sand.u32 1, %s2654_s18  }
 0x249   : > { %s2252_s12 = scalar_lea.sflag [#allocation3], %s2251_s11 }
 0x24a   : > { %p2538_p2 = pnand %p2541_p1, %p2747_p6 }
 0x24c   : > { %2649 = dma.done.wait (!%p2538_p2), %s2252_s12, 256  }
 0x24d   : > { %2651 = vsyncadd (!%p2538_p2), %s2252_s12, 4294967040  ;;  %p15_p3 = scmp.ge.s32.totalorder %s2730_s24, 4   ;;  %s3269_s18 = smov %s2658_s19 }
 0x24e   : > { %s3270_s19 = smov %s2662_s20  ;;  %s3271_s20 = smov %s2741_s27 }
 0x24f   : > { %s3272_s21 = smov %s2730_s24  ;;  %17 = sbr.rel (!%p15_p3) target bundleno = 3 (0x3), region = 85 }
 0x256   :  { %2257 = vsyncpa [#allocation3], 1 }
 0x257   :  { %2259 = vsyncpa [#allocation3 + $0x1], 1 }

</bundles_post_ra>
